<compile_context>
chip_gen: v5e
topology: v5e:2x2
jax: 0.10.0
libtpu: 0.0.40
codegen_flags: <defaults>
</compile_context>

<pallas_src>
import functools

import jax
import jax.numpy as jnp
from jax.experimental import pallas as pl
from jax.experimental.pallas import tpu as pltpu

LAYERS = 4
EN_CH = [3, 32, 64, 128, 256]
DE_CH = [256, 128, 64, 32, 3]
# 32 MiB scoped VMEM: inside v7x's 64 MiB physical VMEM (budget ~48 MiB) and well above v5e's
# 16 MiB default; per-call working sets here are << 4 MiB.
_VMEM_LIMIT = 32 * 1024 * 1024


def _round_up(x, m):
    return (x + m - 1) // m * m


def _apply_act(x, activation):
    if activation == "relu":
        return jnp.maximum(x, 0.0)
    if activation == "sigmoid":
        return jax.nn.sigmoid(x)
    return x


# ----------------------------------------------------------------------------
# Tap-accumulated matmul kernel (shared by conv and deconv): bf16 MXU, f32 accumulate,
# fused bias + activation, single K block (no K grid, no accumulator scratch).
# ----------------------------------------------------------------------------
def _tap_matmul_kernel(col_ref, w_ref, b_ref, o_ref, *, activation):
    """col_ref: (4, tm, K) tap windows; w_ref: (4, K, tn); b_ref: (1, tn); o_ref: (tm, tn)."""
    acc = jnp.dot(col_ref[0], w_ref[0], preferred_element_type=jnp.float32)
    for t in range(1, 4):
        acc = acc + jnp.dot(col_ref[t], w_ref[t], preferred_element_type=jnp.float32)
    acc = acc + b_ref[...]                       # bias + activation in f32 (v5e-safe)
    o_ref[...] = _apply_act(acc, activation).astype(o_ref.dtype)


def _pick_tm(M, want_split):
    """Full-dim M blocks for small M (no padding); halve M only to expose a 2nd parallel cell."""
    if M <= 256:
        if want_split and M % 16 == 0 and (M // 2) % 8 == 0:
            return M // 2
        return M
    for tm in (256, 128, 64, 32, 16, 8):
        if M % tm == 0:
            return tm
    return M


def _tap_matmul(col, layer, activation, out_dtype, phases):
    """col: (4*phases, M, K) bf16 tap-stacked windows -> out (phases, M, Np)."""
    _, M, K = col.shape
    w, b = layer["w"], layer["b"]                # w: (phases, 4, K, Np) bf16, b: (1, Np) f32
    Np = w.shape[-1]
    tn = 128
    tm = _pick_tm(M, want_split=(phases == 1 and Np == tn))
    grid = (phases, M // tm, Np // tn)
    return pl.pallas_call(
        functools.partial(_tap_matmul_kernel, activation=activation),
        out_shape=jax.ShapeDtypeStruct((phases, M, Np), out_dtype),
        grid_spec=pltpu.PrefetchScalarGridSpec(
            num_scalar_prefetch=0,
            grid=grid,
            in_specs=[
                pl.BlockSpec((4, tm, K), lambda p, i, j: (p, i, 0)),
                pl.BlockSpec((None, 4, K, tn), lambda p, i, j: (p, 0, 0, j)),
                pl.BlockSpec((1, tn), lambda p, i, j: (0, j)),
            ],
            out_specs=pl.BlockSpec((None, tm, tn), lambda p, i, j: (p, i, j)),
        ),
        compiler_params=pltpu.CompilerParams(
            dimension_semantics=("parallel", "parallel", "parallel"),
            vmem_limit_bytes=_VMEM_LIMIT,
        ),
    )(col, w, b)


# ----------------------------------------------------------------------------
# Conv2d / ConvTranspose2d (k=4, s=2, p=1) wrappers on NHWC activations
# ----------------------------------------------------------------------------
def conv2d_nhwc(x, layer, activation="relu", out_dtype=jnp.bfloat16):
    """(B, H, W, Cin) -> (B, H/2, W/2, Cout).  Space-to-depth + 4 contiguous 2x2 tap windows
    (no 16*Cin col materialization, no stride-2 relayout slices)."""
    B, H, W, Cin = x.shape
    Ho, Wo = H // 2, W // 2
    Cin_p = layer["cin_p"]
    xp = jnp.pad(x.astype(jnp.bfloat16), ((0, 0), (1, 1), (1, 1), (0, Cin_p - Cin)))
    sd = xp.reshape(B, Ho + 1, 2, Wo + 1, 2, Cin_p)
    sd = jnp.transpose(sd, (0, 1, 3, 2, 4, 5)).reshape(B, Ho + 1, Wo + 1, 4 * Cin_p)
    wins = [sd[:, a:a + Ho, b:b + Wo, :] for a in (0, 1) for b in (0, 1)]
    col = jnp.stack(wins, axis=0).reshape(4, B * Ho * Wo, 4 * Cin_p)
    out = _tap_matmul(col, layer, activation, out_dtype, phases=1)   # (1, M, Np)
    Cout = layer["cout"]
    return out[0, :, :Cout].reshape(B, Ho, Wo, Cout)


def conv_transpose2d_nhwc(x, layer, activation, out_dtype=jnp.bfloat16):
    """(B, H, W, Cin) -> (B, 2H, 2W, Cout) via sub-pixel decomposition; all 4 output phases are
    produced by ONE pallas_call (leading 'phase' grid axis, no zero-insertion work)."""
    B, H, W, Cin = x.shape
    xp = jnp.pad(x.astype(jnp.bfloat16), ((0, 0), (1, 1), (1, 1), (0, 0)))
    wins = [xp[:, po + a:po + a + H, qo + b:qo + b + W, :]
            for po in (0, 1) for qo in (0, 1) for a in (0, 1) for b in (0, 1)]
    col = jnp.stack(wins, axis=0).reshape(16, B * H * W, Cin)        # phase-major, tap-minor
    out = _tap_matmul(col, layer, activation, out_dtype, phases=4)   # (4, M, Np)
    Cout = layer["cout"]
    y = out.reshape(2, 2, B, H, W, -1)[..., :Cout]                   # (po, qo, b, h, w, c)
    y = jnp.transpose(y, (2, 3, 0, 4, 1, 5)).reshape(B, 2 * H, 2 * W, Cout)
    return y


# ----------------------------------------------------------------------------
# Fused bottleneck kernels (everything resident in VMEM, one pallas_call)
# ----------------------------------------------------------------------------
def _bn_core(h, eps, w1, b1, w2, b2, w3, b3, wdec, bdec):
    f32, bf16 = jnp.float32, jnp.bfloat16
    hb = h.astype(bf16)
    mu = jnp.dot(hb, w1, preferred_element_type=f32) + b1
    logvar = jnp.dot(hb, w2, preferred_element_type=f32) + b2
    z = mu + eps * jnp.exp(0.5 * logvar)                              # f32 elementwise (VPU/EUP)
    t = jnp.dot(z.astype(bf16), w3, preferred_element_type=f32) + b3
    d = jnp.dot(t.astype(bf16), wdec, preferred_element_type=f32) + bdec
    return d, mu, logvar, z


def _bottleneck_kernel(h_ref, eps_ref, wenc_ref, benc_ref, w1_ref, b1_ref, w2_ref, b2_ref,
                       w3_ref, b3_ref, wdec_ref, bdec_ref,
                       d_ref, mu_ref, lv_ref, z_ref):
    h = jnp.dot(h_ref[...], wenc_ref[...], preferred_element_type=jnp.float32) + benc_ref[...]
    d, mu, lv, z = _bn_core(h, eps_ref[...], w1_ref[...], b1_ref[...], w2_ref[...], b2_ref[...],
                            w3_ref[...], b3_ref[...], wdec_ref[...], bdec_ref[...])
    d_ref[...] = d.astype(d_ref.dtype)
    mu_ref[...] = mu
    lv_ref[...] = lv
    z_ref[...] = z


def _bottleneck_fused_kernel(x_ref, eps_ref, wc3_ref, bc3_ref, wenc_ref, benc_ref,
                             w1_ref, b1_ref, w2_ref, b2_ref, w3_ref, b3_ref,
                             wdec_ref, bdec_ref, wd0_ref, bd0_ref,
                             d_ref, mu_ref, lv_ref, z_ref):
    """conv3(as linear)+ReLU -> enc_lin -> fc1/fc2 -> reparam -> fc3 -> dec_lin ->
    deconv0(as linear)+ReLU; valid when the bottleneck spatial size is 1x1 (image_size==16)."""
    f32, bf16 = jnp.float32, jnp.bfloat16
    hc = jnp.dot(x_ref[...], wc3_ref[...], preferred_element_type=f32) + bc3_ref[...]
    hc = jnp.maximum(hc, 0.0)
    h = jnp.dot(hc.astype(bf16), wenc_ref[...], preferred_element_type=f32) + benc_ref[...]
    d, mu, lv, z = _bn_core(h, eps_ref[...], w1_ref[...], b1_ref[...], w2_ref[...], b2_ref[...],
                            w3_ref[...], b3_ref[...], wdec_ref[...], bdec_ref[...])
    d0 = jnp.dot(d.astype(bf16), wd0_ref[...], preferred_element_type=f32) + bd0_ref[...]
    d0 = jnp.maximum(d0, 0.0)
    d_ref[...] = d0.astype(d_ref.dtype)
    mu_ref[...] = mu
    lv_ref[...] = lv
    z_ref[...] = z


def _bottleneck_call(kernel, args, d_cols, ldp, batch):
    vmem = pl.BlockSpec(memory_space=pltpu.MemorySpace.VMEM)
    return pl.pallas_call(
        kernel,
        out_shape=(
            jax.ShapeDtypeStruct((batch, d_cols), jnp.bfloat16),
            jax.ShapeDtypeStruct((batch, ldp), jnp.float32),
            jax.ShapeDtypeStruct((batch, ldp), jnp.float32),
            jax.ShapeDtypeStruct((batch, ldp), jnp.float32),
        ),
        in_specs=[vmem] * len(args),
        out_specs=(vmem, vmem, vmem, vmem),
        compiler_params=pltpu.CompilerParams(vmem_limit_bytes=_VMEM_LIMIT),
    )(*args)


def pallas_bottleneck(h_flat, eps_p, bn):
    args = (h_flat, eps_p, bn["wenc"], bn["benc"], bn["w1"], bn["b1"], bn["w2"], bn["b2"],
            bn["w3"], bn["b3"], bn["wdec"], bn["bdec"])
    return _bottleneck_call(_bottleneck_kernel, args, bn["wdec"].shape[1],
                            bn["w1"].shape[1], h_flat.shape[0])


def pallas_bottleneck_fused(x_flat, eps_p, bn):
    args = (x_flat, eps_p, bn["wc3"], bn["bc3"], bn["wenc"], bn["benc"],
            bn["w1"], bn["b1"], bn["w2"], bn["b2"], bn["w3"], bn["b3"],
            bn["wdec"], bn["bdec"], bn["wd0"], bn["bd0"])
    return _bottleneck_call(_bottleneck_fused_kernel, args, bn["wd0"].shape[1],
                            bn["w1"].shape[1], x_flat.shape[0])


# ----------------------------------------------------------------------------
# Parameters (PyTorch layouts) + one-time preparation (reshape / permute / bf16 / pad)
# ----------------------------------------------------------------------------
def init_params(key, image_size, linear_dim, latent_dim):
    s = image_size // (2 ** LAYERS)
    flatten_dim = s * s * EN_CH[-1]
    keys = iter(jax.random.split(key, 32))
    scale = 0.05
    p = {}
    for h in range(LAYERS):
        p[f"enc_conv{h}_w"] = scale * jax.random.normal(next(keys), (EN_CH[h + 1], EN_CH[h], 4, 4), jnp.float32)
        p[f"enc_conv{h}_b"] = jnp.zeros((EN_CH[h + 1],), jnp.float32)
    p["enc_lin_w"] = scale * jax.random.normal(next(keys), (flatten_dim, linear_dim), jnp.float32)
    p["enc_lin_b"] = jnp.zeros((linear_dim,), jnp.float32)
    p["fc1_w"] = scale * jax.random.normal(next(keys), (linear_dim, latent_dim), jnp.float32)
    p["fc1_b"] = jnp.zeros((latent_dim,), jnp.float32)
    p["fc2_w"] = scale * jax.random.normal(next(keys), (linear_dim, latent_dim), jnp.float32)
    p["fc2_b"] = jnp.zeros((latent_dim,), jnp.float32)
    p["fc3_w"] = scale * jax.random.normal(next(keys), (latent_dim, linear_dim), jnp.float32)
    p["fc3_b"] = jnp.zeros((linear_dim,), jnp.float32)
    p["dec_lin_w"] = scale * jax.random.normal(next(keys), (linear_dim, flatten_dim), jnp.float32)
    p["dec_lin_b"] = jnp.zeros((flatten_dim,), jnp.float32)
    for h in range(LAYERS):
        p[f"dec_conv{h}_w"] = scale * jax.random.normal(next(keys), (DE_CH[h], DE_CH[h + 1], 4, 4), jnp.float32)
        p[f"dec_conv{h}_b"] = jnp.zeros((DE_CH[h + 1],), jnp.float32)
    return p


def _prep_conv(w, b):
    """Conv2d weight (Cout, Cin, 4, 4) -> tap-stacked (1, 4, 4*Cin_p, Coutp) bf16; rows ordered
    (kh%2, kw%2, Cin) to match the space-to-depth window channel order (kh = 2a + kh%2)."""
    Cout, Cin = w.shape[0], w.shape[1]
    Cin_p = _round_up(Cin, 8)
    Coutp = _round_up(Cout, 128)
    wt = w.reshape(Cout, Cin, 2, 2, 2, 2)                  # (cout, c, a, p, b, q)
    wt = jnp.transpose(wt, (2, 4, 3, 5, 1, 0))             # (a, b, p, q, c, cout)
    wt = jnp.pad(wt, ((0, 0), (0, 0), (0, 0), (0, 0), (0, Cin_p - Cin), (0, Coutp - Cout)))
    wt = wt.reshape(4, 4 * Cin_p, Coutp).astype(jnp.bfloat16)[None]  # (1, 4, 4*Cin_p, Coutp)
    bp = jnp.pad(b.astype(jnp.float32), (0, Coutp - Cout)).reshape(1, Coutp)
    return {"w": wt, "b": bp, "cout": Cout, "cin_p": Cin_p}


def _prep_deconv(w, b):
    """ConvTranspose2d weight (Cin, Cout, 4, 4) -> per-(phase, tap) (4, 4, Cin, Coutp) bf16.
    Phase (po,qo), tap a uses kernel row kh = 3 - po - 2a (sub-pixel decomposition)."""
    Cin, Cout = w.shape[0], w.shape[1]
    Coutp = _round_up(Cout, 128)
    tap_sel = ((3, 1), (2, 0))
    phases = []
    for po in (0, 1):
        for qo in (0, 1):
            taps = [w[:, :, tap_sel[po][a], tap_sel[qo][bb]]
                    for a in (0, 1) for bb in (0, 1)]       # each (Cin, Cout)
            phases.append(jnp.stack(taps, axis=0))
    wt = jnp.stack(phases, axis=0)                          # (4, 4, Cin, Cout)
    wt = jnp.pad(wt, ((0, 0), (0, 0), (0, 0), (0, Coutp - Cout))).astype(jnp.bfloat16)
    bp = jnp.pad(b.astype(jnp.float32), (0, Coutp - Cout)).reshape(1, Coutp)
    return {"w": wt, "b": bp, "cout": Cout}


def prepare_params(params, image_size, linear_dim, latent_dim):
    s = image_size // (2 ** LAYERS)
    fuse_edges = (s == 1)          # bottleneck spatial size 1x1 -> fuse edge conv/deconv
    Fd = s * s * EN_CH[-1]
    Linp = _round_up(linear_dim, 128)
    Ldp = _round_up(latent_dim, 128)
    f32, bf16 = jnp.float32, jnp.bfloat16

    prep = {"s": s, "fuse_edges": fuse_edges}
    enc_layers = range(LAYERS - 1) if fuse_edges else range(LAYERS)
    dec_layers = range(1, LAYERS) if fuse_edges else range(LAYERS)
    prep["enc"] = [_prep_conv(params[f"enc_conv{i}_w"], params[f"enc_conv{i}_b"]) for i in enc_layers]
    prep["dec"] = [_prep_deconv(params[f"dec_conv{i}_w"], params[f"dec_conv{i}_b"]) for i in dec_layers]
    prep["dec_first_ch"] = DE_CH[1] if fuse_edges else DE_CH[0]

    # enc_lin rows / dec_lin cols: PyTorch (C,H,W) flatten order -> NHWC order, once.
    wenc = params["enc_lin_w"].reshape(EN_CH[-1], s, s, linear_dim)
    wenc = jnp.transpose(wenc, (1, 2, 0, 3)).reshape(Fd, linear_dim)
    wdec = params["dec_lin_w"].reshape(linear_dim, EN_CH[-1], s, s)
    wdec = jnp.transpose(wdec, (0, 2, 3, 1)).reshape(linear_dim, Fd)
    bdec = jnp.transpose(params["dec_lin_b"].reshape(EN_CH[-1], s, s), (1, 2, 0)).reshape(Fd)
    bn = {
        "latent_dim": latent_dim,
        "wenc": jnp.pad(wenc.astype(bf16), ((0, 0), (0, Linp - linear_dim))),
        "benc": jnp.pad(params["enc_lin_b"].astype(f32), (0, Linp - linear_dim)).reshape(1, Linp),
        "w1": jnp.pad(params["fc1_w"].astype(bf16), ((0, Linp - linear_dim), (0, Ldp - latent_dim))),
        "b1": jnp.pad(params["fc1_b"].astype(f32), (0, Ldp - latent_dim)).reshape(1, Ldp),
        "w2": jnp.pad(params["fc2_w"].astype(bf16), ((0, Linp - linear_dim), (0, Ldp - latent_dim))),
        "b2": jnp.pad(params["fc2_b"].astype(f32), (0, Ldp - latent_dim)).reshape(1, Ldp),
        "w3": jnp.pad(params["fc3_w"].astype(bf16), ((0, Ldp - latent_dim), (0, Linp - linear_dim))),
        "b3": jnp.pad(params["fc3_b"].astype(f32), (0, Linp - linear_dim)).reshape(1, Linp),
        "wdec": jnp.pad(wdec.astype(bf16), ((0, Linp - linear_dim), (0, 0))),
        "bdec": bdec.astype(f32).reshape(1, Fd),
    }
    if fuse_edges:
        # Last encoder conv on a 2x2 input -> 1x1 output: only kernel taps kh,kw in {1,2} see
        # real data, so it is exactly a Linear(4*Cin -> Cout) on the NHWC-flattened input.
        wc = params[f"enc_conv{LAYERS - 1}_w"]                       # (256, 128, 4, 4)
        bn["wc3"] = jnp.transpose(wc[:, :, 1:3, 1:3], (2, 3, 1, 0)).reshape(
            4 * wc.shape[1], wc.shape[0]).astype(bf16)
        bn["bc3"] = params[f"enc_conv{LAYERS - 1}_b"].astype(f32).reshape(1, wc.shape[0])
        # First decoder deconv on a 1x1 input -> 2x2 output: each phase uses a single tap, so it
        # is a Linear(Cin -> 4*Cout) with output columns ordered (po, qo, cout) == NHWC.
        wd = params["dec_conv0_w"]                                   # (256, 128, 4, 4)
        bn["wd0"] = jnp.transpose(wd[:, :, 1:3, 1:3], (0, 2, 3, 1)).reshape(
            wd.shape[0], 4 * wd.shape[1]).astype(bf16)
        bn["bd0"] = jnp.tile(params["dec_conv0_b"].astype(f32), 4).reshape(1, 4 * wd.shape[1])
    prep["bn"] = bn
    return prep


# ----------------------------------------------------------------------------
# VAE_Module forward
# ----------------------------------------------------------------------------
def vae_forward(prep, x, eps):
    # x: (B, 3, H, W) NCHW (PyTorch).  One NCHW->NHWC transpose in, one NHWC->NCHW out.
    h = jnp.transpose(x, (0, 2, 3, 1))
    for layer in prep["enc"]:
        h = conv2d_nhwc(h, layer, "relu", jnp.bfloat16)

    B = h.shape[0]
    bn = prep["bn"]
    Ld = bn["latent_dim"]
    Ldp = bn["w1"].shape[1]
    eps_p = jnp.pad(eps.astype(jnp.float32), ((0, 0), (0, Ldp - Ld)))
    h_flat = h.reshape(B, -1)                        # NHWC flatten (linear weights pre-permuted)

    if prep["fuse_edges"]:
        d_flat, mu, logvar, z = pallas_bottleneck_fused(h_flat, eps_p, bn)
        d = d_flat.reshape(B, 2 * prep["s"], 2 * prep["s"], prep["dec_first_ch"])
    else:
        d_flat, mu, logvar, z = pallas_bottleneck(h_flat, eps_p, bn)
        d = d_flat.reshape(B, prep["s"], prep["s"], prep["dec_first_ch"])

    for i, layer in enumerate(prep["dec"]):
        last = (i == len(prep["dec"]) - 1)
        d = conv_transpose2d_nhwc(
            d, layer,
            activation="sigmoid" if last else "relu",
            out_dtype=jnp.float32 if last else jnp.bfloat16)

    recon = jnp.transpose(d, (0, 3, 1, 2))           # back to NCHW
    return recon, mu[:, :Ld], logvar[:, :Ld], z[:, :Ld]


if __name__ == "__main__":
    BATCH = 2
    IMAGE_SIZE = 16      # divisible by 2**4 -> 1x1 bottleneck spatial size (edge-fused path)
    LINEAR_DIM = 32
    LATENT_DIM = 8

    key = jax.random.PRNGKey(0)
    kx, keps, kparam = jax.random.split(key, 3)
    x = jax.random.uniform(kx, (BATCH, 3, IMAGE_SIZE, IMAGE_SIZE), jnp.float32)
    eps = jax.random.normal(keps, (BATCH, LATENT_DIM), jnp.float32)

    params = init_params(kparam, IMAGE_SIZE, LINEAR_DIM, LATENT_DIM)
    prep = prepare_params(params, IMAGE_SIZE, LINEAR_DIM, LATENT_DIM)   # one-time bf16/pad/permute

    fwd = jax.jit(lambda x_, eps_: vae_forward(prep, x_, eps_))
    recon, mu, logvar, z = fwd(x, eps)
    jax.block_until_ready((recon, mu, logvar, z))

    assert recon.shape == (BATCH, 3, IMAGE_SIZE, IMAGE_SIZE)
    assert mu.shape == (BATCH, LATENT_DIM)
    assert logvar.shape == (BATCH, LATENT_DIM)
    assert z.shape == (BATCH, LATENT_DIM)
    print("KERNEL_OK")
</pallas_src>

<mosaic_0001>
module attributes {stable_mosaic.version = 11 : i64} {
  func.func @_tap_matmul_kernel(%arg0: i32, %arg1: i32, %arg2: i32, %arg3: memref<4x64x32xbf16, #tpu.memory_space<vmem>>, %arg4: memref<1x4x32x128xbf16, #tpu.memory_space<vmem>>, %arg5: memref<1x128xf32, #tpu.memory_space<vmem>>, %arg6: memref<1x64x128xbf16, #tpu.memory_space<vmem>>) attributes {dimension_semantics = [#tpu.dimension_semantics<parallel>, #tpu.dimension_semantics<parallel>, #tpu.dimension_semantics<parallel>], iteration_bounds = array<i64: 1, 2, 1>, scalar_prefetch = 0 : i64, scratch_operands = 0 : i64, tpu.core_type = #tpu.core_type<tc>, window_params = [{transform_indices = @transform_0, window_bounds = array<i64: 4, 64, 32>}, {transform_indices = @transform_1, window_bounds = array<i64: 1, 4, 32, 128>}, {transform_indices = @transform_2, window_bounds = array<i64: 1, 128>}, {transform_indices = @transform_3, window_bounds = array<i64: 1, 64, 128>}]} {
    %c0 = arith.constant 0 : index
    %c0_0 = arith.constant 0 : index
    %c0_1 = arith.constant 0 : index
    %0 = vector.load %arg3[%c0, %c0_0, %c0_1] : memref<4x64x32xbf16, #tpu.memory_space<vmem>>, vector<1x64x32xbf16>
    %1 = vector.shape_cast %0 : vector<1x64x32xbf16> to vector<64x32xbf16>
    %c0_2 = arith.constant 0 : index
    %c0_3 = arith.constant 0 : index
    %c0_4 = arith.constant 0 : index
    %c0_5 = arith.constant 0 : index
    %2 = vector.load %arg4[%c0_2, %c0_3, %c0_4, %c0_5] : memref<1x4x32x128xbf16, #tpu.memory_space<vmem>>, vector<1x1x32x128xbf16>
    %3 = vector.shape_cast %2 : vector<1x1x32x128xbf16> to vector<32x128xbf16>
    %cst = arith.constant dense<0.000000e+00> : vector<64x128xf32>
    %4 = tpu.matmul %1, %3, %cst {dimension_numbers = #tpu.dot_dimension_numbers<[1], [0], [0], [1], [0, 0, 1, 1], [], []>} : vector<64x32xbf16>, vector<32x128xbf16>, vector<64x128xf32> -> vector<64x128xf32>
    %c1 = arith.constant 1 : index
    %c0_6 = arith.constant 0 : index
    %c0_7 = arith.constant 0 : index
    %5 = vector.load %arg3[%c1, %c0_6, %c0_7] : memref<4x64x32xbf16, #tpu.memory_space<vmem>>, vector<1x64x32xbf16>
    %6 = vector.shape_cast %5 : vector<1x64x32xbf16> to vector<64x32xbf16>
    %c0_8 = arith.constant 0 : index
    %c1_9 = arith.constant 1 : index
    %c0_10 = arith.constant 0 : index
    %c0_11 = arith.constant 0 : index
    %7 = vector.load %arg4[%c0_8, %c1_9, %c0_10, %c0_11] : memref<1x4x32x128xbf16, #tpu.memory_space<vmem>>, vector<1x1x32x128xbf16>
    %8 = vector.shape_cast %7 : vector<1x1x32x128xbf16> to vector<32x128xbf16>
    %cst_12 = arith.constant dense<0.000000e+00> : vector<64x128xf32>
    %9 = tpu.matmul %6, %8, %cst_12 {dimension_numbers = #tpu.dot_dimension_numbers<[1], [0], [0], [1], [0, 0, 1, 1], [], []>} : vector<64x32xbf16>, vector<32x128xbf16>, vector<64x128xf32> -> vector<64x128xf32>
    %10 = arith.addf %4, %9 : vector<64x128xf32>
    %c2 = arith.constant 2 : index
    %c0_13 = arith.constant 0 : index
    %c0_14 = arith.constant 0 : index
    %11 = vector.load %arg3[%c2, %c0_13, %c0_14] : memref<4x64x32xbf16, #tpu.memory_space<vmem>>, vector<1x64x32xbf16>
    %12 = vector.shape_cast %11 : vector<1x64x32xbf16> to vector<64x32xbf16>
    %c0_15 = arith.constant 0 : index
    %c2_16 = arith.constant 2 : index
    %c0_17 = arith.constant 0 : index
    %c0_18 = arith.constant 0 : index
    %13 = vector.load %arg4[%c0_15, %c2_16, %c0_17, %c0_18] : memref<1x4x32x128xbf16, #tpu.memory_space<vmem>>, vector<1x1x32x128xbf16>
    %14 = vector.shape_cast %13 : vector<1x1x32x128xbf16> to vector<32x128xbf16>
    %cst_19 = arith.constant dense<0.000000e+00> : vector<64x128xf32>
    %15 = tpu.matmul %12, %14, %cst_19 {dimension_numbers = #tpu.dot_dimension_numbers<[1], [0], [0], [1], [0, 0, 1, 1], [], []>} : vector<64x32xbf16>, vector<32x128xbf16>, vector<64x128xf32> -> vector<64x128xf32>
    %16 = arith.addf %10, %15 : vector<64x128xf32>
    %c3 = arith.constant 3 : index
    %c0_20 = arith.constant 0 : index
    %c0_21 = arith.constant 0 : index
    %17 = vector.load %arg3[%c3, %c0_20, %c0_21] : memref<4x64x32xbf16, #tpu.memory_space<vmem>>, vector<1x64x32xbf16>
    %18 = vector.shape_cast %17 : vector<1x64x32xbf16> to vector<64x32xbf16>
    %c0_22 = arith.constant 0 : index
    %c3_23 = arith.constant 3 : index
    %c0_24 = arith.constant 0 : index
    %c0_25 = arith.constant 0 : index
    %19 = vector.load %arg4[%c0_22, %c3_23, %c0_24, %c0_25] : memref<1x4x32x128xbf16, #tpu.memory_space<vmem>>, vector<1x1x32x128xbf16>
    %20 = vector.shape_cast %19 : vector<1x1x32x128xbf16> to vector<32x128xbf16>
    %cst_26 = arith.constant dense<0.000000e+00> : vector<64x128xf32>
    %21 = tpu.matmul %18, %20, %cst_26 {dimension_numbers = #tpu.dot_dimension_numbers<[1], [0], [0], [1], [0, 0, 1, 1], [], []>} : vector<64x32xbf16>, vector<32x128xbf16>, vector<64x128xf32> -> vector<64x128xf32>
    %22 = arith.addf %16, %21 : vector<64x128xf32>
    %c0_27 = arith.constant 0 : index
    %c0_28 = arith.constant 0 : index
    %23 = vector.load %arg5[%c0_27, %c0_28] : memref<1x128xf32, #tpu.memory_space<vmem>>, vector<1x128xf32>
    %24 = vector.broadcast %23 : vector<1x128xf32> to vector<64x128xf32>
    %25 = arith.addf %22, %24 : vector<64x128xf32>
    %cst_29 = arith.constant 0.000000e+00 : f32
    %26 = vector.broadcast %cst_29 : f32 to vector<64x128xf32>
    %27 = arith.maximumf %25, %26 : vector<64x128xf32>
    %28 = arith.truncf %27 : vector<64x128xf32> to vector<64x128xbf16>
    %c0_30 = arith.constant 0 : index
    %c0_31 = arith.constant 0 : index
    %c0_32 = arith.constant 0 : index
    %29 = vector.load %arg6[%c0_30, %c0_31, %c0_32] : memref<1x64x128xbf16, #tpu.memory_space<vmem>>, vector<1x64x128xbf16>
    %30 = vector.shape_cast %29 : vector<1x64x128xbf16> to vector<64x128xbf16>
    %31 = vector.shape_cast %28 : vector<64x128xbf16> to vector<1x64x128xbf16>
    tpu.vector_store %arg6[%c0_30, %c0_31, %c0_32], %31 {strides = array<i32>} : memref<1x64x128xbf16, #tpu.memory_space<vmem>>, vector<1x64x128xbf16>,
    return
  }
  func.func @transform_0(%arg0: i32, %arg1: i32, %arg2: i32) -> (i32, i32, i32) {
    %c0_i32 = arith.constant 0 : i32
    %c0_i32_0 = arith.constant 0 : i32
    return %arg0, %arg1, %c0_i32 : i32, i32, i32
  }
  func.func @transform_1(%arg0: i32, %arg1: i32, %arg2: i32) -> (i32, i32, i32, i32) {
    %c0_i32 = arith.constant 0 : i32
    %c0_i32_0 = arith.constant 0 : i32
    %c0_i32_1 = arith.constant 0 : i32
    return %arg0, %c0_i32, %c0_i32_0, %arg2 : i32, i32, i32, i32
  }
  func.func @transform_2(%arg0: i32, %arg1: i32, %arg2: i32) -> (i32, i32) {
    %c0_i32 = arith.constant 0 : i32
    %c0_i32_0 = arith.constant 0 : i32
    return %c0_i32, %arg2 : i32, i32
  }
  func.func @transform_3(%arg0: i32, %arg1: i32, %arg2: i32) -> (i32, i32, i32) {
    %c0_i32 = arith.constant 0 : i32
    return %arg0, %arg1, %arg2 : i32, i32, i32
  }
}

module attributes {stable_mosaic.version = 11 : i64} {
  func.func @_tap_matmul_kernel(%arg0: i32, %arg1: i32, %arg2: i32, %arg3: memref<4x16x128xbf16, #tpu.memory_space<vmem>>, %arg4: memref<1x4x128x128xbf16, #tpu.memory_space<vmem>>, %arg5: memref<1x128xf32, #tpu.memory_space<vmem>>, %arg6: memref<1x16x128xbf16, #tpu.memory_space<vmem>>) attributes {dimension_semantics = [#tpu.dimension_semantics<parallel>, #tpu.dimension_semantics<parallel>, #tpu.dimension_semantics<parallel>], iteration_bounds = array<i64: 1, 2, 1>, scalar_prefetch = 0 : i64, scratch_operands = 0 : i64, tpu.core_type = #tpu.core_type<tc>, window_params = [{transform_indices = @transform_0, window_bounds = array<i64: 4, 16, 128>}, {transform_indices = @transform_1, window_bounds = array<i64: 1, 4, 128, 128>}, {transform_indices = @transform_2, window_bounds = array<i64: 1, 128>}, {transform_indices = @transform_3, window_bounds = array<i64: 1, 16, 128>}]} {
    %c0 = arith.constant 0 : index
    %c0_0 = arith.constant 0 : index
    %c0_1 = arith.constant 0 : index
    %0 = vector.load %arg3[%c0, %c0_0, %c0_1] : memref<4x16x128xbf16, #tpu.memory_space<vmem>>, vector<1x16x128xbf16>
    %1 = vector.shape_cast %0 : vector<1x16x128xbf16> to vector<16x128xbf16>
    %c0_2 = arith.constant 0 : index
    %c0_3 = arith.constant 0 : index
    %c0_4 = arith.constant 0 : index
    %c0_5 = arith.constant 0 : index
    %2 = vector.load %arg4[%c0_2, %c0_3, %c0_4, %c0_5] : memref<1x4x128x128xbf16, #tpu.memory_space<vmem>>, vector<1x1x128x128xbf16>
    %3 = vector.shape_cast %2 : vector<1x1x128x128xbf16> to vector<128x128xbf16>
    %cst = arith.constant dense<0.000000e+00> : vector<16x128xf32>
    %4 = tpu.matmul %1, %3, %cst {dimension_numbers = #tpu.dot_dimension_numbers<[1], [0], [0], [1], [0, 0, 1, 1], [], []>} : vector<16x128xbf16>, vector<128x128xbf16>, vector<16x128xf32> -> vector<16x128xf32>
    %c1 = arith.constant 1 : index
    %c0_6 = arith.constant 0 : index
    %c0_7 = arith.constant 0 : index
    %5 = vector.load %arg3[%c1, %c0_6, %c0_7] : memref<4x16x128xbf16, #tpu.memory_space<vmem>>, vector<1x16x128xbf16>
    %6 = vector.shape_cast %5 : vector<1x16x128xbf16> to vector<16x128xbf16>
    %c0_8 = arith.constant 0 : index
    %c1_9 = arith.constant 1 : index
    %c0_10 = arith.constant 0 : index
    %c0_11 = arith.constant 0 : index
    %7 = vector.load %arg4[%c0_8, %c1_9, %c0_10, %c0_11] : memref<1x4x128x128xbf16, #tpu.memory_space<vmem>>, vector<1x1x128x128xbf16>
    %8 = vector.shape_cast %7 : vector<1x1x128x128xbf16> to vector<128x128xbf16>
    %cst_12 = arith.constant dense<0.000000e+00> : vector<16x128xf32>
    %9 = tpu.matmul %6, %8, %cst_12 {dimension_numbers = #tpu.dot_dimension_numbers<[1], [0], [0], [1], [0, 0, 1, 1], [], []>} : vector<16x128xbf16>, vector<128x128xbf16>, vector<16x128xf32> -> vector<16x128xf32>
    %10 = arith.addf %4, %9 : vector<16x128xf32>
    %c2 = arith.constant 2 : index
    %c0_13 = arith.constant 0 : index
    %c0_14 = arith.constant 0 : index
    %11 = vector.load %arg3[%c2, %c0_13, %c0_14] : memref<4x16x128xbf16, #tpu.memory_space<vmem>>, vector<1x16x128xbf16>
    %12 = vector.shape_cast %11 : vector<1x16x128xbf16> to vector<16x128xbf16>
    %c0_15 = arith.constant 0 : index
    %c2_16 = arith.constant 2 : index
    %c0_17 = arith.constant 0 : index
    %c0_18 = arith.constant 0 : index
    %13 = vector.load %arg4[%c0_15, %c2_16, %c0_17, %c0_18] : memref<1x4x128x128xbf16, #tpu.memory_space<vmem>>, vector<1x1x128x128xbf16>
    %14 = vector.shape_cast %13 : vector<1x1x128x128xbf16> to vector<128x128xbf16>
    %cst_19 = arith.constant dense<0.000000e+00> : vector<16x128xf32>
    %15 = tpu.matmul %12, %14, %cst_19 {dimension_numbers = #tpu.dot_dimension_numbers<[1], [0], [0], [1], [0, 0, 1, 1], [], []>} : vector<16x128xbf16>, vector<128x128xbf16>, vector<16x128xf32> -> vector<16x128xf32>
    %16 = arith.addf %10, %15 : vector<16x128xf32>
    %c3 = arith.constant 3 : index
    %c0_20 = arith.constant 0 : index
    %c0_21 = arith.constant 0 : index
    %17 = vector.load %arg3[%c3, %c0_20, %c0_21] : memref<4x16x128xbf16, #tpu.memory_space<vmem>>, vector<1x16x128xbf16>
    %18 = vector.shape_cast %17 : vector<1x16x128xbf16> to vector<16x128xbf16>
    %c0_22 = arith.constant 0 : index
    %c3_23 = arith.constant 3 : index
    %c0_24 = arith.constant 0 : index
    %c0_25 = arith.constant 0 : index
    %19 = vector.load %arg4[%c0_22, %c3_23, %c0_24, %c0_25] : memref<1x4x128x128xbf16, #tpu.memory_space<vmem>>, vector<1x1x128x128xbf16>
    %20 = vector.shape_cast %19 : vector<1x1x128x128xbf16> to vector<128x128xbf16>
    %cst_26 = arith.constant dense<0.000000e+00> : vector<16x128xf32>
    %21 = tpu.matmul %18, %20, %cst_26 {dimension_numbers = #tpu.dot_dimension_numbers<[1], [0], [0], [1], [0, 0, 1, 1], [], []>} : vector<16x128xbf16>, vector<128x128xbf16>, vector<16x128xf32> -> vector<16x128xf32>
    %22 = arith.addf %16, %21 : vector<16x128xf32>
    %c0_27 = arith.constant 0 : index
    %c0_28 = arith.constant 0 : index
    %23 = vector.load %arg5[%c0_27, %c0_28] : memref<1x128xf32, #tpu.memory_space<vmem>>, vector<1x128xf32>
    %24 = vector.broadcast %23 : vector<1x128xf32> to vector<16x128xf32>
    %25 = arith.addf %22, %24 : vector<16x128xf32>
    %cst_29 = arith.constant 0.000000e+00 : f32
    %26 = vector.broadcast %cst_29 : f32 to vector<16x128xf32>
    %27 = arith.maximumf %25, %26 : vector<16x128xf32>
    %28 = arith.truncf %27 : vector<16x128xf32> to vector<16x128xbf16>
    %c0_30 = arith.constant 0 : index
    %c0_31 = arith.constant 0 : index
    %c0_32 = arith.constant 0 : index
    %29 = vector.load %arg6[%c0_30, %c0_31, %c0_32] : memref<1x16x128xbf16, #tpu.memory_space<vmem>>, vector<1x16x128xbf16>
    %30 = vector.shape_cast %29 : vector<1x16x128xbf16> to vector<16x128xbf16>
    %31 = vector.shape_cast %28 : vector<16x128xbf16> to vector<1x16x128xbf16>
    tpu.vector_store %arg6[%c0_30, %c0_31, %c0_32], %31 {strides = array<i32>} : memref<1x16x128xbf16, #tpu.memory_space<vmem>>, vector<1x16x128xbf16>,
    return
  }
  func.func @transform_0(%arg0: i32, %arg1: i32, %arg2: i32) -> (i32, i32, i32) {
    %c0_i32 = arith.constant 0 : i32
    %c0_i32_0 = arith.constant 0 : i32
    return %arg0, %arg1, %c0_i32 : i32, i32, i32
  }
  func.func @transform_1(%arg0: i32, %arg1: i32, %arg2: i32) -> (i32, i32, i32, i32) {
    %c0_i32 = arith.constant 0 : i32
    %c0_i32_0 = arith.constant 0 : i32
    %c0_i32_1 = arith.constant 0 : i32
    return %arg0, %c0_i32, %c0_i32_0, %arg2 : i32, i32, i32, i32
  }
  func.func @transform_2(%arg0: i32, %arg1: i32, %arg2: i32) -> (i32, i32) {
    %c0_i32 = arith.constant 0 : i32
    %c0_i32_0 = arith.constant 0 : i32
    return %c0_i32, %arg2 : i32, i32
  }
  func.func @transform_3(%arg0: i32, %arg1: i32, %arg2: i32) -> (i32, i32, i32) {
    %c0_i32 = arith.constant 0 : i32
    return %arg0, %arg1, %arg2 : i32, i32, i32
  }
}

module attributes {stable_mosaic.version = 11 : i64} {
  func.func @_bottleneck_fused_kernel(%arg0: memref<2x512xbf16, #tpu.memory_space<vmem>>, %arg1: memref<2x128xf32, #tpu.memory_space<vmem>>, %arg2: memref<512x256xbf16, #tpu.memory_space<vmem>>, %arg3: memref<1x256xf32, #tpu.memory_space<vmem>>, %arg4: memref<256x128xbf16, #tpu.memory_space<vmem>>, %arg5: memref<1x128xf32, #tpu.memory_space<vmem>>, %arg6: memref<128x128xbf16, #tpu.memory_space<vmem>>, %arg7: memref<1x128xf32, #tpu.memory_space<vmem>>, %arg8: memref<128x128xbf16, #tpu.memory_space<vmem>>, %arg9: memref<1x128xf32, #tpu.memory_space<vmem>>, %arg10: memref<128x128xbf16, #tpu.memory_space<vmem>>, %arg11: memref<1x128xf32, #tpu.memory_space<vmem>>, %arg12: memref<128x256xbf16, #tpu.memory_space<vmem>>, %arg13: memref<1x256xf32, #tpu.memory_space<vmem>>, %arg14: memref<256x512xbf16, #tpu.memory_space<vmem>>, %arg15: memref<1x512xf32, #tpu.memory_space<vmem>>, %arg16: memref<2x512xbf16, #tpu.memory_space<vmem>>, %arg17: memref<2x128xf32, #tpu.memory_space<vmem>>, %arg18: memref<2x128xf32, #tpu.memory_space<vmem>>, %arg19: memref<2x128xf32, #tpu.memory_space<vmem>>) attributes {dimension_semantics = [], scalar_prefetch = 0 : i64, scratch_operands = 0 : i64, tpu.core_type = #tpu.core_type<tc>} {
    %c0 = arith.constant 0 : index
    %c0_0 = arith.constant 0 : index
    %0 = vector.load %arg0[%c0, %c0_0] : memref<2x512xbf16, #tpu.memory_space<vmem>>, vector<2x512xbf16>
    %c0_1 = arith.constant 0 : index
    %c0_2 = arith.constant 0 : index
    %1 = vector.load %arg2[%c0_1, %c0_2] : memref<512x256xbf16, #tpu.memory_space<vmem>>, vector<512x256xbf16>
    %cst = arith.constant dense<0.000000e+00> : vector<2x256xf32>
    %2 = tpu.matmul %0, %1, %cst {dimension_numbers = #tpu.dot_dimension_numbers<[1], [0], [0], [1], [0, 0, 1, 1], [], []>} : vector<2x512xbf16>, vector<512x256xbf16>, vector<2x256xf32> -> vector<2x256xf32>
    %c0_3 = arith.constant 0 : index
    %c0_4 = arith.constant 0 : index
    %3 = vector.load %arg3[%c0_3, %c0_4] : memref<1x256xf32, #tpu.memory_space<vmem>>, vector<1x256xf32>
    %4 = vector.broadcast %3 : vector<1x256xf32> to vector<2x256xf32>
    %5 = arith.addf %2, %4 : vector<2x256xf32>
    %cst_5 = arith.constant 0.000000e+00 : f32
    %6 = vector.broadcast %cst_5 : f32 to vector<2x256xf32>
    %7 = arith.maximumf %5, %6 : vector<2x256xf32>
    %8 = arith.truncf %7 : vector<2x256xf32> to vector<2x256xbf16>
    %c0_6 = arith.constant 0 : index
    %c0_7 = arith.constant 0 : index
    %9 = vector.load %arg4[%c0_6, %c0_7] : memref<256x128xbf16, #tpu.memory_space<vmem>>, vector<256x128xbf16>
    %cst_8 = arith.constant dense<0.000000e+00> : vector<2x128xf32>
    %10 = tpu.matmul %8, %9, %cst_8 {dimension_numbers = #tpu.dot_dimension_numbers<[1], [0], [0], [1], [0, 0, 1, 1], [], []>} : vector<2x256xbf16>, vector<256x128xbf16>, vector<2x128xf32> -> vector<2x128xf32>
    %c0_9 = arith.constant 0 : index
    %c0_10 = arith.constant 0 : index
    %11 = vector.load %arg5[%c0_9, %c0_10] : memref<1x128xf32, #tpu.memory_space<vmem>>, vector<1x128xf32>
    %12 = vector.broadcast %11 : vector<1x128xf32> to vector<2x128xf32>
    %13 = arith.addf %10, %12 : vector<2x128xf32>
    %c0_11 = arith.constant 0 : index
    %c0_12 = arith.constant 0 : index
    %14 = vector.load %arg1[%c0_11, %c0_12] : memref<2x128xf32, #tpu.memory_space<vmem>>, vector<2x128xf32>
    %c0_13 = arith.constant 0 : index
    %c0_14 = arith.constant 0 : index
    %15 = vector.load %arg6[%c0_13, %c0_14] : memref<128x128xbf16, #tpu.memory_space<vmem>>, vector<128x128xbf16>
    %c0_15 = arith.constant 0 : index
    %c0_16 = arith.constant 0 : index
    %16 = vector.load %arg7[%c0_15, %c0_16] : memref<1x128xf32, #tpu.memory_space<vmem>>, vector<1x128xf32>
    %c0_17 = arith.constant 0 : index
    %c0_18 = arith.constant 0 : index
    %17 = vector.load %arg8[%c0_17, %c0_18] : memref<128x128xbf16, #tpu.memory_space<vmem>>, vector<128x128xbf16>
    %c0_19 = arith.constant 0 : index
    %c0_20 = arith.constant 0 : index
    %18 = vector.load %arg9[%c0_19, %c0_20] : memref<1x128xf32, #tpu.memory_space<vmem>>, vector<1x128xf32>
    %c0_21 = arith.constant 0 : index
    %c0_22 = arith.constant 0 : index
    %19 = vector.load %arg10[%c0_21, %c0_22] : memref<128x128xbf16, #tpu.memory_space<vmem>>, vector<128x128xbf16>
    %c0_23 = arith.constant 0 : index
    %c0_24 = arith.constant 0 : index
    %20 = vector.load %arg11[%c0_23, %c0_24] : memref<1x128xf32, #tpu.memory_space<vmem>>, vector<1x128xf32>
    %c0_25 = arith.constant 0 : index
    %c0_26 = arith.constant 0 : index
    %21 = vector.load %arg12[%c0_25, %c0_26] : memref<128x256xbf16, #tpu.memory_space<vmem>>, vector<128x256xbf16>
    %c0_27 = arith.constant 0 : index
    %c0_28 = arith.constant 0 : index
    %22 = vector.load %arg13[%c0_27, %c0_28] : memref<1x256xf32, #tpu.memory_space<vmem>>, vector<1x256xf32>
    %23 = arith.truncf %13 : vector<2x128xf32> to vector<2x128xbf16>
    %cst_29 = arith.constant dense<0.000000e+00> : vector<2x128xf32>
    %24 = tpu.matmul %23, %15, %cst_29 {dimension_numbers = #tpu.dot_dimension_numbers<[1], [0], [0], [1], [0, 0, 1, 1], [], []>} : vector<2x128xbf16>, vector<128x128xbf16>, vector<2x128xf32> -> vector<2x128xf32>
    %25 = vector.broadcast %16 : vector<1x128xf32> to vector<2x128xf32>
    %26 = arith.addf %24, %25 : vector<2x128xf32>
    %cst_30 = arith.constant dense<0.000000e+00> : vector<2x128xf32>
    %27 = tpu.matmul %23, %17, %cst_30 {dimension_numbers = #tpu.dot_dimension_numbers<[1], [0], [0], [1], [0, 0, 1, 1], [], []>} : vector<2x128xbf16>, vector<128x128xbf16>, vector<2x128xf32> -> vector<2x128xf32>
    %28 = vector.broadcast %18 : vector<1x128xf32> to vector<2x128xf32>
    %29 = arith.addf %27, %28 : vector<2x128xf32>
    %cst_31 = arith.constant 5.000000e-01 : f32
    %30 = vector.broadcast %cst_31 : f32 to vector<2x128xf32>
    %31 = arith.mulf %30, %29 : vector<2x128xf32>
    %32 = math.exp %31 : vector<2x128xf32>
    %33 = arith.mulf %14, %32 : vector<2x128xf32>
    %34 = arith.addf %26, %33 : vector<2x128xf32>
    %35 = arith.truncf %34 : vector<2x128xf32> to vector<2x128xbf16>
    %cst_32 = arith.constant dense<0.000000e+00> : vector<2x128xf32>
    %36 = tpu.matmul %35, %19, %cst_32 {dimension_numbers = #tpu.dot_dimension_numbers<[1], [0], [0], [1], [0, 0, 1, 1], [], []>} : vector<2x128xbf16>, vector<128x128xbf16>, vector<2x128xf32> -> vector<2x128xf32>
    %37 = vector.broadcast %20 : vector<1x128xf32> to vector<2x128xf32>
    %38 = arith.addf %36, %37 : vector<2x128xf32>
    %39 = arith.truncf %38 : vector<2x128xf32> to vector<2x128xbf16>
    %cst_33 = arith.constant dense<0.000000e+00> : vector<2x256xf32>
    %40 = tpu.matmul %39, %21, %cst_33 {dimension_numbers = #tpu.dot_dimension_numbers<[1], [0], [0], [1], [0, 0, 1, 1], [], []>} : vector<2x128xbf16>, vector<128x256xbf16>, vector<2x256xf32> -> vector<2x256xf32>
    %41 = vector.broadcast %22 : vector<1x256xf32> to vector<2x256xf32>
    %42 = arith.addf %40, %41 : vector<2x256xf32>
    %43 = arith.truncf %42 : vector<2x256xf32> to vector<2x256xbf16>
    %c0_34 = arith.constant 0 : index
    %c0_35 = arith.constant 0 : index
    %44 = vector.load %arg14[%c0_34, %c0_35] : memref<256x512xbf16, #tpu.memory_space<vmem>>, vector<256x512xbf16>
    %cst_36 = arith.constant dense<0.000000e+00> : vector<2x512xf32>
    %45 = tpu.matmul %43, %44, %cst_36 {dimension_numbers = #tpu.dot_dimension_numbers<[1], [0], [0], [1], [0, 0, 1, 1], [], []>} : vector<2x256xbf16>, vector<256x512xbf16>, vector<2x512xf32> -> vector<2x512xf32>
    %c0_37 = arith.constant 0 : index
    %c0_38 = arith.constant 0 : index
    %46 = vector.load %arg15[%c0_37, %c0_38] : memref<1x512xf32, #tpu.memory_space<vmem>>, vector<1x512xf32>
    %47 = vector.broadcast %46 : vector<1x512xf32> to vector<2x512xf32>
    %48 = arith.addf %45, %47 : vector<2x512xf32>
    %cst_39 = arith.constant 0.000000e+00 : f32
    %49 = vector.broadcast %cst_39 : f32 to vector<2x512xf32>
    %50 = arith.maximumf %48, %49 : vector<2x512xf32>
    %51 = arith.truncf %50 : vector<2x512xf32> to vector<2x512xbf16>
    %c0_40 = arith.constant 0 : index
    %c0_41 = arith.constant 0 : index
    %52 = vector.load %arg16[%c0_40, %c0_41] : memref<2x512xbf16, #tpu.memory_space<vmem>>, vector<2x512xbf16>
    tpu.vector_store %arg16[%c0_40, %c0_41], %51 {strides = array<i32>} : memref<2x512xbf16, #tpu.memory_space<vmem>>, vector<2x512xbf16>,
    %c0_42 = arith.constant 0 : index
    %c0_43 = arith.constant 0 : index
    %53 = vector.load %arg17[%c0_42, %c0_43] : memref<2x128xf32, #tpu.memory_space<vmem>>, vector<2x128xf32>
    tpu.vector_store %arg17[%c0_42, %c0_43], %26 {strides = array<i32>} : memref<2x128xf32, #tpu.memory_space<vmem>>, vector<2x128xf32>,
    %c0_44 = arith.constant 0 : index
    %c0_45 = arith.constant 0 : index
    %54 = vector.load %arg18[%c0_44, %c0_45] : memref<2x128xf32, #tpu.memory_space<vmem>>, vector<2x128xf32>
    tpu.vector_store %arg18[%c0_44, %c0_45], %29 {strides = array<i32>} : memref<2x128xf32, #tpu.memory_space<vmem>>, vector<2x128xf32>,
    %c0_46 = arith.constant 0 : index
    %c0_47 = arith.constant 0 : index
    %55 = vector.load %arg19[%c0_46, %c0_47] : memref<2x128xf32, #tpu.memory_space<vmem>>, vector<2x128xf32>
    tpu.vector_store %arg19[%c0_46, %c0_47], %34 {strides = array<i32>} : memref<2x128xf32, #tpu.memory_space<vmem>>, vector<2x128xf32>,
    return
  }
}

module attributes {stable_mosaic.version = 11 : i64} {
  func.func @_tap_matmul_kernel(%arg0: i32, %arg1: i32, %arg2: i32, %arg3: memref<4x8x256xbf16, #tpu.memory_space<vmem>>, %arg4: memref<1x4x256x128xbf16, #tpu.memory_space<vmem>>, %arg5: memref<1x128xf32, #tpu.memory_space<vmem>>, %arg6: memref<1x8x128xbf16, #tpu.memory_space<vmem>>) attributes {dimension_semantics = [#tpu.dimension_semantics<parallel>, #tpu.dimension_semantics<parallel>, #tpu.dimension_semantics<parallel>], iteration_bounds = array<i64: 1, 1, 1>, scalar_prefetch = 0 : i64, scratch_operands = 0 : i64, tpu.core_type = #tpu.core_type<tc>, window_params = [{transform_indices = @transform_0, window_bounds = array<i64: 4, 8, 256>}, {transform_indices = @transform_1, window_bounds = array<i64: 1, 4, 256, 128>}, {transform_indices = @transform_2, window_bounds = array<i64: 1, 128>}, {transform_indices = @transform_3, window_bounds = array<i64: 1, 8, 128>}]} {
    %c0 = arith.constant 0 : index
    %c0_0 = arith.constant 0 : index
    %c0_1 = arith.constant 0 : index
    %0 = vector.load %arg3[%c0, %c0_0, %c0_1] : memref<4x8x256xbf16, #tpu.memory_space<vmem>>, vector<1x8x256xbf16>
    %1 = vector.shape_cast %0 : vector<1x8x256xbf16> to vector<8x256xbf16>
    %c0_2 = arith.constant 0 : index
    %c0_3 = arith.constant 0 : index
    %c0_4 = arith.constant 0 : index
    %c0_5 = arith.constant 0 : index
    %2 = vector.load %arg4[%c0_2, %c0_3, %c0_4, %c0_5] : memref<1x4x256x128xbf16, #tpu.memory_space<vmem>>, vector<1x1x256x128xbf16>
    %3 = vector.shape_cast %2 : vector<1x1x256x128xbf16> to vector<256x128xbf16>
    %cst = arith.constant dense<0.000000e+00> : vector<8x128xf32>
    %4 = tpu.matmul %1, %3, %cst {dimension_numbers = #tpu.dot_dimension_numbers<[1], [0], [0], [1], [0, 0, 1, 1], [], []>} : vector<8x256xbf16>, vector<256x128xbf16>, vector<8x128xf32> -> vector<8x128xf32>
    %c1 = arith.constant 1 : index
    %c0_6 = arith.constant 0 : index
    %c0_7 = arith.constant 0 : index
    %5 = vector.load %arg3[%c1, %c0_6, %c0_7] : memref<4x8x256xbf16, #tpu.memory_space<vmem>>, vector<1x8x256xbf16>
    %6 = vector.shape_cast %5 : vector<1x8x256xbf16> to vector<8x256xbf16>
    %c0_8 = arith.constant 0 : index
    %c1_9 = arith.constant 1 : index
    %c0_10 = arith.constant 0 : index
    %c0_11 = arith.constant 0 : index
    %7 = vector.load %arg4[%c0_8, %c1_9, %c0_10, %c0_11] : memref<1x4x256x128xbf16, #tpu.memory_space<vmem>>, vector<1x1x256x128xbf16>
    %8 = vector.shape_cast %7 : vector<1x1x256x128xbf16> to vector<256x128xbf16>
    %cst_12 = arith.constant dense<0.000000e+00> : vector<8x128xf32>
    %9 = tpu.matmul %6, %8, %cst_12 {dimension_numbers = #tpu.dot_dimension_numbers<[1], [0], [0], [1], [0, 0, 1, 1], [], []>} : vector<8x256xbf16>, vector<256x128xbf16>, vector<8x128xf32> -> vector<8x128xf32>
    %10 = arith.addf %4, %9 : vector<8x128xf32>
    %c2 = arith.constant 2 : index
    %c0_13 = arith.constant 0 : index
    %c0_14 = arith.constant 0 : index
    %11 = vector.load %arg3[%c2, %c0_13, %c0_14] : memref<4x8x256xbf16, #tpu.memory_space<vmem>>, vector<1x8x256xbf16>
    %12 = vector.shape_cast %11 : vector<1x8x256xbf16> to vector<8x256xbf16>
    %c0_15 = arith.constant 0 : index
    %c2_16 = arith.constant 2 : index
    %c0_17 = arith.constant 0 : index
    %c0_18 = arith.constant 0 : index
    %13 = vector.load %arg4[%c0_15, %c2_16, %c0_17, %c0_18] : memref<1x4x256x128xbf16, #tpu.memory_space<vmem>>, vector<1x1x256x128xbf16>
    %14 = vector.shape_cast %13 : vector<1x1x256x128xbf16> to vector<256x128xbf16>
    %cst_19 = arith.constant dense<0.000000e+00> : vector<8x128xf32>
    %15 = tpu.matmul %12, %14, %cst_19 {dimension_numbers = #tpu.dot_dimension_numbers<[1], [0], [0], [1], [0, 0, 1, 1], [], []>} : vector<8x256xbf16>, vector<256x128xbf16>, vector<8x128xf32> -> vector<8x128xf32>
    %16 = arith.addf %10, %15 : vector<8x128xf32>
    %c3 = arith.constant 3 : index
    %c0_20 = arith.constant 0 : index
    %c0_21 = arith.constant 0 : index
    %17 = vector.load %arg3[%c3, %c0_20, %c0_21] : memref<4x8x256xbf16, #tpu.memory_space<vmem>>, vector<1x8x256xbf16>
    %18 = vector.shape_cast %17 : vector<1x8x256xbf16> to vector<8x256xbf16>
    %c0_22 = arith.constant 0 : index
    %c3_23 = arith.constant 3 : index
    %c0_24 = arith.constant 0 : index
    %c0_25 = arith.constant 0 : index
    %19 = vector.load %arg4[%c0_22, %c3_23, %c0_24, %c0_25] : memref<1x4x256x128xbf16, #tpu.memory_space<vmem>>, vector<1x1x256x128xbf16>
    %20 = vector.shape_cast %19 : vector<1x1x256x128xbf16> to vector<256x128xbf16>
    %cst_26 = arith.constant dense<0.000000e+00> : vector<8x128xf32>
    %21 = tpu.matmul %18, %20, %cst_26 {dimension_numbers = #tpu.dot_dimension_numbers<[1], [0], [0], [1], [0, 0, 1, 1], [], []>} : vector<8x256xbf16>, vector<256x128xbf16>, vector<8x128xf32> -> vector<8x128xf32>
    %22 = arith.addf %16, %21 : vector<8x128xf32>
    %c0_27 = arith.constant 0 : index
    %c0_28 = arith.constant 0 : index
    %23 = vector.load %arg5[%c0_27, %c0_28] : memref<1x128xf32, #tpu.memory_space<vmem>>, vector<1x128xf32>
    %24 = vector.broadcast %23 : vector<1x128xf32> to vector<8x128xf32>
    %25 = arith.addf %22, %24 : vector<8x128xf32>
    %cst_29 = arith.constant 0.000000e+00 : f32
    %26 = vector.broadcast %cst_29 : f32 to vector<8x128xf32>
    %27 = arith.maximumf %25, %26 : vector<8x128xf32>
    %28 = arith.truncf %27 : vector<8x128xf32> to vector<8x128xbf16>
    %c0_30 = arith.constant 0 : index
    %c0_31 = arith.constant 0 : index
    %c0_32 = arith.constant 0 : index
    %29 = vector.load %arg6[%c0_30, %c0_31, %c0_32] : memref<1x8x128xbf16, #tpu.memory_space<vmem>>, vector<1x8x128xbf16>
    %30 = vector.shape_cast %29 : vector<1x8x128xbf16> to vector<8x128xbf16>
    %31 = vector.shape_cast %28 : vector<8x128xbf16> to vector<1x8x128xbf16>
    tpu.vector_store %arg6[%c0_30, %c0_31, %c0_32], %31 {strides = array<i32>} : memref<1x8x128xbf16, #tpu.memory_space<vmem>>, vector<1x8x128xbf16>,
    return
  }
  func.func @transform_0(%arg0: i32, %arg1: i32, %arg2: i32) -> (i32, i32, i32) {
    %c0_i32 = arith.constant 0 : i32
    %c0_i32_0 = arith.constant 0 : i32
    return %arg0, %arg1, %c0_i32 : i32, i32, i32
  }
  func.func @transform_1(%arg0: i32, %arg1: i32, %arg2: i32) -> (i32, i32, i32, i32) {
    %c0_i32 = arith.constant 0 : i32
    %c0_i32_0 = arith.constant 0 : i32
    %c0_i32_1 = arith.constant 0 : i32
    return %arg0, %c0_i32, %c0_i32_0, %arg2 : i32, i32, i32, i32
  }
  func.func @transform_2(%arg0: i32, %arg1: i32, %arg2: i32) -> (i32, i32) {
    %c0_i32 = arith.constant 0 : i32
    %c0_i32_0 = arith.constant 0 : i32
    return %c0_i32, %arg2 : i32, i32
  }
  func.func @transform_3(%arg0: i32, %arg1: i32, %arg2: i32) -> (i32, i32, i32) {
    %c0_i32 = arith.constant 0 : i32
    return %arg0, %arg1, %arg2 : i32, i32, i32
  }
}

module attributes {stable_mosaic.version = 11 : i64} {
  func.func @_tap_matmul_kernel(%arg0: i32, %arg1: i32, %arg2: i32, %arg3: memref<4x8x128xbf16, #tpu.memory_space<vmem>>, %arg4: memref<1x4x128x128xbf16, #tpu.memory_space<vmem>>, %arg5: memref<1x128xf32, #tpu.memory_space<vmem>>, %arg6: memref<1x8x128xbf16, #tpu.memory_space<vmem>>) attributes {dimension_semantics = [#tpu.dimension_semantics<parallel>, #tpu.dimension_semantics<parallel>, #tpu.dimension_semantics<parallel>], iteration_bounds = array<i64: 4, 1, 1>, scalar_prefetch = 0 : i64, scratch_operands = 0 : i64, tpu.core_type = #tpu.core_type<tc>, window_params = [{transform_indices = @transform_0, window_bounds = array<i64: 4, 8, 128>}, {transform_indices = @transform_1, window_bounds = array<i64: 1, 4, 128, 128>}, {transform_indices = @transform_2, window_bounds = array<i64: 1, 128>}, {transform_indices = @transform_3, window_bounds = array<i64: 1, 8, 128>}]} {
    %c0 = arith.constant 0 : index
    %c0_0 = arith.constant 0 : index
    %c0_1 = arith.constant 0 : index
    %0 = vector.load %arg3[%c0, %c0_0, %c0_1] : memref<4x8x128xbf16, #tpu.memory_space<vmem>>, vector<1x8x128xbf16>
    %1 = vector.shape_cast %0 : vector<1x8x128xbf16> to vector<8x128xbf16>
    %c0_2 = arith.constant 0 : index
    %c0_3 = arith.constant 0 : index
    %c0_4 = arith.constant 0 : index
    %c0_5 = arith.constant 0 : index
    %2 = vector.load %arg4[%c0_2, %c0_3, %c0_4, %c0_5] : memref<1x4x128x128xbf16, #tpu.memory_space<vmem>>, vector<1x1x128x128xbf16>
    %3 = vector.shape_cast %2 : vector<1x1x128x128xbf16> to vector<128x128xbf16>
    %cst = arith.constant dense<0.000000e+00> : vector<8x128xf32>
    %4 = tpu.matmul %1, %3, %cst {dimension_numbers = #tpu.dot_dimension_numbers<[1], [0], [0], [1], [0, 0, 1, 1], [], []>} : vector<8x128xbf16>, vector<128x128xbf16>, vector<8x128xf32> -> vector<8x128xf32>
    %c1 = arith.constant 1 : index
    %c0_6 = arith.constant 0 : index
    %c0_7 = arith.constant 0 : index
    %5 = vector.load %arg3[%c1, %c0_6, %c0_7] : memref<4x8x128xbf16, #tpu.memory_space<vmem>>, vector<1x8x128xbf16>
    %6 = vector.shape_cast %5 : vector<1x8x128xbf16> to vector<8x128xbf16>
    %c0_8 = arith.constant 0 : index
    %c1_9 = arith.constant 1 : index
    %c0_10 = arith.constant 0 : index
    %c0_11 = arith.constant 0 : index
    %7 = vector.load %arg4[%c0_8, %c1_9, %c0_10, %c0_11] : memref<1x4x128x128xbf16, #tpu.memory_space<vmem>>, vector<1x1x128x128xbf16>
    %8 = vector.shape_cast %7 : vector<1x1x128x128xbf16> to vector<128x128xbf16>
    %cst_12 = arith.constant dense<0.000000e+00> : vector<8x128xf32>
    %9 = tpu.matmul %6, %8, %cst_12 {dimension_numbers = #tpu.dot_dimension_numbers<[1], [0], [0], [1], [0, 0, 1, 1], [], []>} : vector<8x128xbf16>, vector<128x128xbf16>, vector<8x128xf32> -> vector<8x128xf32>
    %10 = arith.addf %4, %9 : vector<8x128xf32>
    %c2 = arith.constant 2 : index
    %c0_13 = arith.constant 0 : index
    %c0_14 = arith.constant 0 : index
    %11 = vector.load %arg3[%c2, %c0_13, %c0_14] : memref<4x8x128xbf16, #tpu.memory_space<vmem>>, vector<1x8x128xbf16>
    %12 = vector.shape_cast %11 : vector<1x8x128xbf16> to vector<8x128xbf16>
    %c0_15 = arith.constant 0 : index
    %c2_16 = arith.constant 2 : index
    %c0_17 = arith.constant 0 : index
    %c0_18 = arith.constant 0 : index
    %13 = vector.load %arg4[%c0_15, %c2_16, %c0_17, %c0_18] : memref<1x4x128x128xbf16, #tpu.memory_space<vmem>>, vector<1x1x128x128xbf16>
    %14 = vector.shape_cast %13 : vector<1x1x128x128xbf16> to vector<128x128xbf16>
    %cst_19 = arith.constant dense<0.000000e+00> : vector<8x128xf32>
    %15 = tpu.matmul %12, %14, %cst_19 {dimension_numbers = #tpu.dot_dimension_numbers<[1], [0], [0], [1], [0, 0, 1, 1], [], []>} : vector<8x128xbf16>, vector<128x128xbf16>, vector<8x128xf32> -> vector<8x128xf32>
    %16 = arith.addf %10, %15 : vector<8x128xf32>
    %c3 = arith.constant 3 : index
    %c0_20 = arith.constant 0 : index
    %c0_21 = arith.constant 0 : index
    %17 = vector.load %arg3[%c3, %c0_20, %c0_21] : memref<4x8x128xbf16, #tpu.memory_space<vmem>>, vector<1x8x128xbf16>
    %18 = vector.shape_cast %17 : vector<1x8x128xbf16> to vector<8x128xbf16>
    %c0_22 = arith.constant 0 : index
    %c3_23 = arith.constant 3 : index
    %c0_24 = arith.constant 0 : index
    %c0_25 = arith.constant 0 : index
    %19 = vector.load %arg4[%c0_22, %c3_23, %c0_24, %c0_25] : memref<1x4x128x128xbf16, #tpu.memory_space<vmem>>, vector<1x1x128x128xbf16>
    %20 = vector.shape_cast %19 : vector<1x1x128x128xbf16> to vector<128x128xbf16>
    %cst_26 = arith.constant dense<0.000000e+00> : vector<8x128xf32>
    %21 = tpu.matmul %18, %20, %cst_26 {dimension_numbers = #tpu.dot_dimension_numbers<[1], [0], [0], [1], [0, 0, 1, 1], [], []>} : vector<8x128xbf16>, vector<128x128xbf16>, vector<8x128xf32> -> vector<8x128xf32>
    %22 = arith.addf %16, %21 : vector<8x128xf32>
    %c0_27 = arith.constant 0 : index
    %c0_28 = arith.constant 0 : index
    %23 = vector.load %arg5[%c0_27, %c0_28] : memref<1x128xf32, #tpu.memory_space<vmem>>, vector<1x128xf32>
    %24 = vector.broadcast %23 : vector<1x128xf32> to vector<8x128xf32>
    %25 = arith.addf %22, %24 : vector<8x128xf32>
    %cst_29 = arith.constant 0.000000e+00 : f32
    %26 = vector.broadcast %cst_29 : f32 to vector<8x128xf32>
    %27 = arith.maximumf %25, %26 : vector<8x128xf32>
    %28 = arith.truncf %27 : vector<8x128xf32> to vector<8x128xbf16>
    %c0_30 = arith.constant 0 : index
    %c0_31 = arith.constant 0 : index
    %c0_32 = arith.constant 0 : index
    %29 = vector.load %arg6[%c0_30, %c0_31, %c0_32] : memref<1x8x128xbf16, #tpu.memory_space<vmem>>, vector<1x8x128xbf16>
    %30 = vector.shape_cast %29 : vector<1x8x128xbf16> to vector<8x128xbf16>
    %31 = vector.shape_cast %28 : vector<8x128xbf16> to vector<1x8x128xbf16>
    tpu.vector_store %arg6[%c0_30, %c0_31, %c0_32], %31 {strides = array<i32>} : memref<1x8x128xbf16, #tpu.memory_space<vmem>>, vector<1x8x128xbf16>,
    return
  }
  func.func @transform_0(%arg0: i32, %arg1: i32, %arg2: i32) -> (i32, i32, i32) {
    %c0_i32 = arith.constant 0 : i32
    %c0_i32_0 = arith.constant 0 : i32
    return %arg0, %arg1, %c0_i32 : i32, i32, i32
  }
  func.func @transform_1(%arg0: i32, %arg1: i32, %arg2: i32) -> (i32, i32, i32, i32) {
    %c0_i32 = arith.constant 0 : i32
    %c0_i32_0 = arith.constant 0 : i32
    %c0_i32_1 = arith.constant 0 : i32
    return %arg0, %c0_i32, %c0_i32_0, %arg2 : i32, i32, i32, i32
  }
  func.func @transform_2(%arg0: i32, %arg1: i32, %arg2: i32) -> (i32, i32) {
    %c0_i32 = arith.constant 0 : i32
    %c0_i32_0 = arith.constant 0 : i32
    return %c0_i32, %arg2 : i32, i32
  }
  func.func @transform_3(%arg0: i32, %arg1: i32, %arg2: i32) -> (i32, i32, i32) {
    %c0_i32 = arith.constant 0 : i32
    return %arg0, %arg1, %arg2 : i32, i32, i32
  }
}

module attributes {stable_mosaic.version = 11 : i64} {
  func.func @_tap_matmul_kernel(%arg0: i32, %arg1: i32, %arg2: i32, %arg3: memref<4x32x64xbf16, #tpu.memory_space<vmem>>, %arg4: memref<1x4x64x128xbf16, #tpu.memory_space<vmem>>, %arg5: memref<1x128xf32, #tpu.memory_space<vmem>>, %arg6: memref<1x32x128xbf16, #tpu.memory_space<vmem>>) attributes {dimension_semantics = [#tpu.dimension_semantics<parallel>, #tpu.dimension_semantics<parallel>, #tpu.dimension_semantics<parallel>], iteration_bounds = array<i64: 4, 1, 1>, scalar_prefetch = 0 : i64, scratch_operands = 0 : i64, tpu.core_type = #tpu.core_type<tc>, window_params = [{transform_indices = @transform_0, window_bounds = array<i64: 4, 32, 64>}, {transform_indices = @transform_1, window_bounds = array<i64: 1, 4, 64, 128>}, {transform_indices = @transform_2, window_bounds = array<i64: 1, 128>}, {transform_indices = @transform_3, window_bounds = array<i64: 1, 32, 128>}]} {
    %c0 = arith.constant 0 : index
    %c0_0 = arith.constant 0 : index
    %c0_1 = arith.constant 0 : index
    %0 = vector.load %arg3[%c0, %c0_0, %c0_1] : memref<4x32x64xbf16, #tpu.memory_space<vmem>>, vector<1x32x64xbf16>
    %1 = vector.shape_cast %0 : vector<1x32x64xbf16> to vector<32x64xbf16>
    %c0_2 = arith.constant 0 : index
    %c0_3 = arith.constant 0 : index
    %c0_4 = arith.constant 0 : index
    %c0_5 = arith.constant 0 : index
    %2 = vector.load %arg4[%c0_2, %c0_3, %c0_4, %c0_5] : memref<1x4x64x128xbf16, #tpu.memory_space<vmem>>, vector<1x1x64x128xbf16>
    %3 = vector.shape_cast %2 : vector<1x1x64x128xbf16> to vector<64x128xbf16>
    %cst = arith.constant dense<0.000000e+00> : vector<32x128xf32>
    %4 = tpu.matmul %1, %3, %cst {dimension_numbers = #tpu.dot_dimension_numbers<[1], [0], [0], [1], [0, 0, 1, 1], [], []>} : vector<32x64xbf16>, vector<64x128xbf16>, vector<32x128xf32> -> vector<32x128xf32>
    %c1 = arith.constant 1 : index
    %c0_6 = arith.constant 0 : index
    %c0_7 = arith.constant 0 : index
    %5 = vector.load %arg3[%c1, %c0_6, %c0_7] : memref<4x32x64xbf16, #tpu.memory_space<vmem>>, vector<1x32x64xbf16>
    %6 = vector.shape_cast %5 : vector<1x32x64xbf16> to vector<32x64xbf16>
    %c0_8 = arith.constant 0 : index
    %c1_9 = arith.constant 1 : index
    %c0_10 = arith.constant 0 : index
    %c0_11 = arith.constant 0 : index
    %7 = vector.load %arg4[%c0_8, %c1_9, %c0_10, %c0_11] : memref<1x4x64x128xbf16, #tpu.memory_space<vmem>>, vector<1x1x64x128xbf16>
    %8 = vector.shape_cast %7 : vector<1x1x64x128xbf16> to vector<64x128xbf16>
    %cst_12 = arith.constant dense<0.000000e+00> : vector<32x128xf32>
    %9 = tpu.matmul %6, %8, %cst_12 {dimension_numbers = #tpu.dot_dimension_numbers<[1], [0], [0], [1], [0, 0, 1, 1], [], []>} : vector<32x64xbf16>, vector<64x128xbf16>, vector<32x128xf32> -> vector<32x128xf32>
    %10 = arith.addf %4, %9 : vector<32x128xf32>
    %c2 = arith.constant 2 : index
    %c0_13 = arith.constant 0 : index
    %c0_14 = arith.constant 0 : index
    %11 = vector.load %arg3[%c2, %c0_13, %c0_14] : memref<4x32x64xbf16, #tpu.memory_space<vmem>>, vector<1x32x64xbf16>
    %12 = vector.shape_cast %11 : vector<1x32x64xbf16> to vector<32x64xbf16>
    %c0_15 = arith.constant 0 : index
    %c2_16 = arith.constant 2 : index
    %c0_17 = arith.constant 0 : index
    %c0_18 = arith.constant 0 : index
    %13 = vector.load %arg4[%c0_15, %c2_16, %c0_17, %c0_18] : memref<1x4x64x128xbf16, #tpu.memory_space<vmem>>, vector<1x1x64x128xbf16>
    %14 = vector.shape_cast %13 : vector<1x1x64x128xbf16> to vector<64x128xbf16>
    %cst_19 = arith.constant dense<0.000000e+00> : vector<32x128xf32>
    %15 = tpu.matmul %12, %14, %cst_19 {dimension_numbers = #tpu.dot_dimension_numbers<[1], [0], [0], [1], [0, 0, 1, 1], [], []>} : vector<32x64xbf16>, vector<64x128xbf16>, vector<32x128xf32> -> vector<32x128xf32>
    %16 = arith.addf %10, %15 : vector<32x128xf32>
    %c3 = arith.constant 3 : index
    %c0_20 = arith.constant 0 : index
    %c0_21 = arith.constant 0 : index
    %17 = vector.load %arg3[%c3, %c0_20, %c0_21] : memref<4x32x64xbf16, #tpu.memory_space<vmem>>, vector<1x32x64xbf16>
    %18 = vector.shape_cast %17 : vector<1x32x64xbf16> to vector<32x64xbf16>
    %c0_22 = arith.constant 0 : index
    %c3_23 = arith.constant 3 : index
    %c0_24 = arith.constant 0 : index
    %c0_25 = arith.constant 0 : index
    %19 = vector.load %arg4[%c0_22, %c3_23, %c0_24, %c0_25] : memref<1x4x64x128xbf16, #tpu.memory_space<vmem>>, vector<1x1x64x128xbf16>
    %20 = vector.shape_cast %19 : vector<1x1x64x128xbf16> to vector<64x128xbf16>
    %cst_26 = arith.constant dense<0.000000e+00> : vector<32x128xf32>
    %21 = tpu.matmul %18, %20, %cst_26 {dimension_numbers = #tpu.dot_dimension_numbers<[1], [0], [0], [1], [0, 0, 1, 1], [], []>} : vector<32x64xbf16>, vector<64x128xbf16>, vector<32x128xf32> -> vector<32x128xf32>
    %22 = arith.addf %16, %21 : vector<32x128xf32>
    %c0_27 = arith.constant 0 : index
    %c0_28 = arith.constant 0 : index
    %23 = vector.load %arg5[%c0_27, %c0_28] : memref<1x128xf32, #tpu.memory_space<vmem>>, vector<1x128xf32>
    %24 = vector.broadcast %23 : vector<1x128xf32> to vector<32x128xf32>
    %25 = arith.addf %22, %24 : vector<32x128xf32>
    %cst_29 = arith.constant 0.000000e+00 : f32
    %26 = vector.broadcast %cst_29 : f32 to vector<32x128xf32>
    %27 = arith.maximumf %25, %26 : vector<32x128xf32>
    %28 = arith.truncf %27 : vector<32x128xf32> to vector<32x128xbf16>
    %c0_30 = arith.constant 0 : index
    %c0_31 = arith.constant 0 : index
    %c0_32 = arith.constant 0 : index
    %29 = vector.load %arg6[%c0_30, %c0_31, %c0_32] : memref<1x32x128xbf16, #tpu.memory_space<vmem>>, vector<1x32x128xbf16>
    %30 = vector.shape_cast %29 : vector<1x32x128xbf16> to vector<32x128xbf16>
    %31 = vector.shape_cast %28 : vector<32x128xbf16> to vector<1x32x128xbf16>
    tpu.vector_store %arg6[%c0_30, %c0_31, %c0_32], %31 {strides = array<i32>} : memref<1x32x128xbf16, #tpu.memory_space<vmem>>, vector<1x32x128xbf16>,
    return
  }
  func.func @transform_0(%arg0: i32, %arg1: i32, %arg2: i32) -> (i32, i32, i32) {
    %c0_i32 = arith.constant 0 : i32
    %c0_i32_0 = arith.constant 0 : i32
    return %arg0, %arg1, %c0_i32 : i32, i32, i32
  }
  func.func @transform_1(%arg0: i32, %arg1: i32, %arg2: i32) -> (i32, i32, i32, i32) {
    %c0_i32 = arith.constant 0 : i32
    %c0_i32_0 = arith.constant 0 : i32
    %c0_i32_1 = arith.constant 0 : i32
    return %arg0, %c0_i32, %c0_i32_0, %arg2 : i32, i32, i32, i32
  }
  func.func @transform_2(%arg0: i32, %arg1: i32, %arg2: i32) -> (i32, i32) {
    %c0_i32 = arith.constant 0 : i32
    %c0_i32_0 = arith.constant 0 : i32
    return %c0_i32, %arg2 : i32, i32
  }
  func.func @transform_3(%arg0: i32, %arg1: i32, %arg2: i32) -> (i32, i32, i32) {
    %c0_i32 = arith.constant 0 : i32
    return %arg0, %arg1, %arg2 : i32, i32, i32
  }
}

module attributes {stable_mosaic.version = 11 : i64} {
  func.func @_tap_matmul_kernel(%arg0: i32, %arg1: i32, %arg2: i32, %arg3: memref<4x128x32xbf16, #tpu.memory_space<vmem>>, %arg4: memref<1x4x32x128xbf16, #tpu.memory_space<vmem>>, %arg5: memref<1x128xf32, #tpu.memory_space<vmem>>, %arg6: memref<1x128x128xf32, #tpu.memory_space<vmem>>) attributes {dimension_semantics = [#tpu.dimension_semantics<parallel>, #tpu.dimension_semantics<parallel>, #tpu.dimension_semantics<parallel>], iteration_bounds = array<i64: 4, 1, 1>, scalar_prefetch = 0 : i64, scratch_operands = 0 : i64, tpu.core_type = #tpu.core_type<tc>, window_params = [{transform_indices = @transform_0, window_bounds = array<i64: 4, 128, 32>}, {transform_indices = @transform_1, window_bounds = array<i64: 1, 4, 32, 128>}, {transform_indices = @transform_2, window_bounds = array<i64: 1, 128>}, {transform_indices = @transform_3, window_bounds = array<i64: 1, 128, 128>}]} {
    %c0 = arith.constant 0 : index
    %c0_0 = arith.constant 0 : index
    %c0_1 = arith.constant 0 : index
    %0 = vector.load %arg3[%c0, %c0_0, %c0_1] : memref<4x128x32xbf16, #tpu.memory_space<vmem>>, vector<1x128x32xbf16>
    %1 = vector.shape_cast %0 : vector<1x128x32xbf16> to vector<128x32xbf16>
    %c0_2 = arith.constant 0 : index
    %c0_3 = arith.constant 0 : index
    %c0_4 = arith.constant 0 : index
    %c0_5 = arith.constant 0 : index
    %2 = vector.load %arg4[%c0_2, %c0_3, %c0_4, %c0_5] : memref<1x4x32x128xbf16, #tpu.memory_space<vmem>>, vector<1x1x32x128xbf16>
    %3 = vector.shape_cast %2 : vector<1x1x32x128xbf16> to vector<32x128xbf16>
    %cst = arith.constant dense<0.000000e+00> : vector<128x128xf32>
    %4 = tpu.matmul %1, %3, %cst {dimension_numbers = #tpu.dot_dimension_numbers<[1], [0], [0], [1], [0, 0, 1, 1], [], []>} : vector<128x32xbf16>, vector<32x128xbf16>, vector<128x128xf32> -> vector<128x128xf32>
    %c1 = arith.constant 1 : index
    %c0_6 = arith.constant 0 : index
    %c0_7 = arith.constant 0 : index
    %5 = vector.load %arg3[%c1, %c0_6, %c0_7] : memref<4x128x32xbf16, #tpu.memory_space<vmem>>, vector<1x128x32xbf16>
    %6 = vector.shape_cast %5 : vector<1x128x32xbf16> to vector<128x32xbf16>
    %c0_8 = arith.constant 0 : index
    %c1_9 = arith.constant 1 : index
    %c0_10 = arith.constant 0 : index
    %c0_11 = arith.constant 0 : index
    %7 = vector.load %arg4[%c0_8, %c1_9, %c0_10, %c0_11] : memref<1x4x32x128xbf16, #tpu.memory_space<vmem>>, vector<1x1x32x128xbf16>
    %8 = vector.shape_cast %7 : vector<1x1x32x128xbf16> to vector<32x128xbf16>
    %cst_12 = arith.constant dense<0.000000e+00> : vector<128x128xf32>
    %9 = tpu.matmul %6, %8, %cst_12 {dimension_numbers = #tpu.dot_dimension_numbers<[1], [0], [0], [1], [0, 0, 1, 1], [], []>} : vector<128x32xbf16>, vector<32x128xbf16>, vector<128x128xf32> -> vector<128x128xf32>
    %10 = arith.addf %4, %9 : vector<128x128xf32>
    %c2 = arith.constant 2 : index
    %c0_13 = arith.constant 0 : index
    %c0_14 = arith.constant 0 : index
    %11 = vector.load %arg3[%c2, %c0_13, %c0_14] : memref<4x128x32xbf16, #tpu.memory_space<vmem>>, vector<1x128x32xbf16>
    %12 = vector.shape_cast %11 : vector<1x128x32xbf16> to vector<128x32xbf16>
    %c0_15 = arith.constant 0 : index
    %c2_16 = arith.constant 2 : index
    %c0_17 = arith.constant 0 : index
    %c0_18 = arith.constant 0 : index
    %13 = vector.load %arg4[%c0_15, %c2_16, %c0_17, %c0_18] : memref<1x4x32x128xbf16, #tpu.memory_space<vmem>>, vector<1x1x32x128xbf16>
    %14 = vector.shape_cast %13 : vector<1x1x32x128xbf16> to vector<32x128xbf16>
    %cst_19 = arith.constant dense<0.000000e+00> : vector<128x128xf32>
    %15 = tpu.matmul %12, %14, %cst_19 {dimension_numbers = #tpu.dot_dimension_numbers<[1], [0], [0], [1], [0, 0, 1, 1], [], []>} : vector<128x32xbf16>, vector<32x128xbf16>, vector<128x128xf32> -> vector<128x128xf32>
    %16 = arith.addf %10, %15 : vector<128x128xf32>
    %c3 = arith.constant 3 : index
    %c0_20 = arith.constant 0 : index
    %c0_21 = arith.constant 0 : index
    %17 = vector.load %arg3[%c3, %c0_20, %c0_21] : memref<4x128x32xbf16, #tpu.memory_space<vmem>>, vector<1x128x32xbf16>
    %18 = vector.shape_cast %17 : vector<1x128x32xbf16> to vector<128x32xbf16>
    %c0_22 = arith.constant 0 : index
    %c3_23 = arith.constant 3 : index
    %c0_24 = arith.constant 0 : index
    %c0_25 = arith.constant 0 : index
    %19 = vector.load %arg4[%c0_22, %c3_23, %c0_24, %c0_25] : memref<1x4x32x128xbf16, #tpu.memory_space<vmem>>, vector<1x1x32x128xbf16>
    %20 = vector.shape_cast %19 : vector<1x1x32x128xbf16> to vector<32x128xbf16>
    %cst_26 = arith.constant dense<0.000000e+00> : vector<128x128xf32>
    %21 = tpu.matmul %18, %20, %cst_26 {dimension_numbers = #tpu.dot_dimension_numbers<[1], [0], [0], [1], [0, 0, 1, 1], [], []>} : vector<128x32xbf16>, vector<32x128xbf16>, vector<128x128xf32> -> vector<128x128xf32>
    %22 = arith.addf %16, %21 : vector<128x128xf32>
    %c0_27 = arith.constant 0 : index
    %c0_28 = arith.constant 0 : index
    %23 = vector.load %arg5[%c0_27, %c0_28] : memref<1x128xf32, #tpu.memory_space<vmem>>, vector<1x128xf32>
    %24 = vector.broadcast %23 : vector<1x128xf32> to vector<128x128xf32>
    %25 = arith.addf %22, %24 : vector<128x128xf32>
    %26 = arith.negf %25 : vector<128x128xf32>
    %27 = math.exp %26 : vector<128x128xf32>
    %cst_29 = arith.constant 1.000000e+00 : f32
    %28 = vector.broadcast %cst_29 : f32 to vector<128x128xf32>
    %29 = arith.addf %28, %27 : vector<128x128xf32>
    %30 = arith.divf %28, %29 : vector<128x128xf32>
    %c0_30 = arith.constant 0 : index
    %c0_31 = arith.constant 0 : index
    %c0_32 = arith.constant 0 : index
    %31 = vector.load %arg6[%c0_30, %c0_31, %c0_32] : memref<1x128x128xf32, #tpu.memory_space<vmem>>, vector<1x128x128xf32>
    %32 = vector.shape_cast %31 : vector<1x128x128xf32> to vector<128x128xf32>
    %33 = vector.shape_cast %30 : vector<128x128xf32> to vector<1x128x128xf32>
    tpu.vector_store %arg6[%c0_30, %c0_31, %c0_32], %33 {strides = array<i32>} : memref<1x128x128xf32, #tpu.memory_space<vmem>>, vector<1x128x128xf32>,
    return
  }
  func.func @transform_0(%arg0: i32, %arg1: i32, %arg2: i32) -> (i32, i32, i32) {
    %c0_i32 = arith.constant 0 : i32
    %c0_i32_0 = arith.constant 0 : i32
    return %arg0, %arg1, %c0_i32 : i32, i32, i32
  }
  func.func @transform_1(%arg0: i32, %arg1: i32, %arg2: i32) -> (i32, i32, i32, i32) {
    %c0_i32 = arith.constant 0 : i32
    %c0_i32_0 = arith.constant 0 : i32
    %c0_i32_1 = arith.constant 0 : i32
    return %arg0, %c0_i32, %c0_i32_0, %arg2 : i32, i32, i32, i32
  }
  func.func @transform_2(%arg0: i32, %arg1: i32, %arg2: i32) -> (i32, i32) {
    %c0_i32 = arith.constant 0 : i32
    %c0_i32_0 = arith.constant 0 : i32
    return %c0_i32, %arg2 : i32, i32
  }
  func.func @transform_3(%arg0: i32, %arg1: i32, %arg2: i32) -> (i32, i32, i32) {
    %c0_i32 = arith.constant 0 : i32
    return %arg0, %arg1, %arg2 : i32, i32, i32
  }
}

</mosaic_0001>

<bundles_post_ra>
// kernel: squeeze.5
= control target key start
LH: loop header
LB: loop body
LE: loop exit
PB: predicated region body
PF: predicated region fallthrough
CT: control target
= control target key end

     0   :  { %s77_s0 = inlined_call_operand.vmem [shape: bf16[1,8,128], index: 0, kind: input, shape index: {}]   ;;  %s78_s1 = inlined_call_operand.vmem [shape: bf16[2,512], index: 1, kind: output, shape index: {}]  }
   0x1   :  { %v13_v0 = vld [vmem:[%s77_s0] sm:$0xf] }
   0x2   :  { %v14_v1 = vunpack.c.l.bf16 %v13_v0 }
   0x4   :  { %18 = vst [vmem:[#allocation0] ss:$8 sm:$0xf] %v14_v1  }
   0x5   :  { %20 = vst [vmem:[#allocation0 - $0x1f] ss:$8 sm:$0xf0] %v14_v1  }
   0xc   :  { %v23_v2 = vld [vmem:[#allocation0] sm:$0x3]  ;;  %v29_v3 = vld [vmem:[#allocation0 + $0x8] sm:$0x3]  ;;  %v36_v4 = vld [vmem:[#allocation0 + $0x10] sm:$0x3] }
   0xd   :  { %v24_v5 = vpack.c.bf16 0.0, %v23_v2  ;;  %v30_v6 = vpack.c.bf16 0.0, %v29_v3  ;;  %v37_v7 = vpack.c.bf16 0.0, %v36_v4  ;;  %v43_v8 = vld [vmem:[#allocation0 + $0x18] sm:$0x3] }
   0xe   :  { %v44_v9 = vpack.c.bf16 0.0, %v43_v8 }
   0xf   :  { %27 = vst [vmem:[%s78_s1] sm:$0x1] %v24_v5 }
  0x10   :  { %49 = vst [vmem:[%s78_s1 + $0x1] sm:$0x1] %v30_v6 }
  0x11   :  { %50 = vst [vmem:[%s78_s1 + $0x2] sm:$0x1] %v37_v7 }
  0x12   :  { %51 = vst [vmem:[%s78_s1 + $0x3] sm:$0x1] %v44_v9 }

// kernel: _lambda_.7
= control target key start
LH: loop header
LB: loop body
LE: loop exit
PB: predicated region body
PF: predicated region fallthrough
CT: control target
= control target key end

     0   :  { %s1277_s12 = smov 0   ;;  %s1279_s13 = smov 0   ;;  %s1437_s0 = inlined_call_operand.vmem [shape: bf16[4,128,32], index: 0, kind: input, shape index: {}]   ;;  %s1438_s1 = inlined_call_operand.vmem [shape: bf16[1,4,32,128], index: 1, kind: input, shape index: {}]   ;;  %s1439_s2 = inlined_call_operand.vmem [shape: f32[1,128], index: 2, kind: input, shape index: {}]   ;;  %s1440_s3 = inlined_call_operand.vmem [shape: bf16[1,128,128], index: 3, kind: output, shape index: {}]  }
   0x1   :  { %s1281_s14 = smov 0   ;;  %s1283_s15 = smov 0  }
   0x2   :  { %s1285_s16 = smov 0  }
   0x3 LB: > { %s28_s17 = sadd.s32 1, %s1251_s15  ;;  %p48_p1 = scmp.ne.s32.totalorder %s1243_s13, %s1239_s12  ;;  %s1255_s16 = sphi %s1285_s16, %s13_s16   ;;  %s1251_s15 = sphi %s1283_s15, %s1444_s15   ;;  %s1247_s14 = sphi %s1281_s14, %s1443_s14   ;;  %s1243_s13 = sphi %s1279_s13, %s1442_s13   ;;  %s1239_s12 = sphi %s1277_s12, %s1441_s12  }
   0x4   : > { %p30_p0 = scmp.ge.s32.totalorder %s28_s17, 2  ;;  %p49_p2 = scmp.eq.s32.totalorder %s1255_s16, 0 }
   0x5   : > { %s41_s19 = sadd.s32 1, %s1243_s13  ;;  %p970_p5 = scmp.ge.s32.totalorder %s1255_s16, 2 }
   0x6   : > { %s1446_s17 = smov (%p30_p0, %s28_s17), 0  ;;  %p50_p3 = por %p49_p2, %p48_p1 }
   0x7   : > { %s37_s18 = ssub.s32 %s1251_s15, %s1446_s17  ;;  %175 = sbr.rel (%p970_p5) target bundleno = 32 (0x20), region = 24 }
   0x8   : > { %p39_p4 = scmp.eq.s32.totalorder %s37_s18, 0 }
   0xa   : > { %s1312_s20 = scalar_select %p39_p4, %s1243_s13, %s41_s19  }
   0xc   : > { %178 = sbr.rel (!%p50_p3) target bundleno = 32 (0x20), region = 28  ;;  %s180_s21 = sand.u32 (%p50_p3), 1, %s1243_s13  }
   0xd   : > { %s1128_s22 = sshll.u32 (%p50_p3), %s1251_s15, 5  ;;  %s971_s23 = sshll.u32 (%p50_p3), %s180_s21, 7 }
   0xe   : > { %s1320_s26 = scalar_lea.vmem (%p50_p3), %s1437_s0, %s1128_s22  ;;  %s182_s27 = scalar_lea.vmem (%p50_p3), [#allocation2], %s971_s23 }
   0xf   : > { %v205_v0 = vld [vmem:[%s1320_s26] sm:$0xff] (%p50_p3)   ;;  %v209_v1 = vld [vmem:[%s1320_s26 + $0x8] sm:$0xff] (%p50_p3)   ;;  %v213_v2 = vld [vmem:[%s1320_s26 + $0x10] sm:$0xff] (%p50_p3)  }
  0x10   : > { %206 = vst [vmem:[%s182_s27] sm:$0xff] (%p50_p3), %v205_v0   ;;  %v217_v3 = vld [vmem:[%s1320_s26 + $0x18] sm:$0xff] (%p50_p3)   ;;  %v221_v4 = vld [vmem:[%s1320_s26 + $0x40] sm:$0xff] (%p50_p3)   ;;  %v225_v5 = vld [vmem:[%s1320_s26 + $0x48] sm:$0xff] (%p50_p3)  }
  0x11   : > { %210 = vst [vmem:[%s182_s27 + $0x8] sm:$0xff] %v209_v1   ;;  %v229_v6 = vld [vmem:[%s1320_s26 + $0x50] sm:$0xff]   ;;  %v233_v7 = vld [vmem:[%s1320_s26 + $0x58] sm:$0xff]   ;;  %v237_v8 = vld [vmem:[%s1320_s26 + $0x80] sm:$0xff]  }
  0x12   : > { %214 = vst [vmem:[%s182_s27 + $0x10] sm:$0xff] %v213_v2   ;;  %v241_v9 = vld [vmem:[%s1320_s26 + $0x88] sm:$0xff]   ;;  %v245_v10 = vld [vmem:[%s1320_s26 + $0x90] sm:$0xff]   ;;  %v249_v11 = vld [vmem:[%s1320_s26 + $0x98] sm:$0xff]  }
  0x13   : > { %218 = vst [vmem:[%s182_s27 + $0x18] sm:$0xff] %v217_v3   ;;  %v253_v12 = vld [vmem:[%s1320_s26 + $0xc0] sm:$0xff]   ;;  %v257_v13 = vld [vmem:[%s1320_s26 + $0xc8] sm:$0xff]   ;;  %v261_v14 = vld [vmem:[%s1320_s26 + $0xd0] sm:$0xff]  }
  0x14   : > { %222 = vst [vmem:[%s182_s27 + $0x20] sm:$0xff] %v221_v4   ;;  %v265_v15 = vld [vmem:[%s1320_s26 + $0xd8] sm:$0xff]  }
  0x15   : > { %226 = vst [vmem:[%s182_s27 + $0x28] sm:$0xff] %v225_v5  }
  0x16   : > { %230 = vst [vmem:[%s182_s27 + $0x30] sm:$0xff] %v229_v6  }
  0x17   : > { %234 = vst [vmem:[%s182_s27 + $0x38] sm:$0xff] %v233_v7  }
  0x18   : > { %238 = vst [vmem:[%s182_s27 + $0x40] sm:$0xff] %v237_v8  }
  0x19   : > { %242 = vst [vmem:[%s182_s27 + $0x48] sm:$0xff] %v241_v9  }
  0x1a   : > { %246 = vst [vmem:[%s182_s27 + $0x50] sm:$0xff] %v245_v10  }
  0x1b   : > { %250 = vst [vmem:[%s182_s27 + $0x58] sm:$0xff] %v249_v11  }
  0x1c   : > { %254 = vst [vmem:[%s182_s27 + $0x60] sm:$0xff] %v253_v12  }
  0x1d   : > { %258 = vst [vmem:[%s182_s27 + $0x68] sm:$0xff] %v257_v13  }
  0x1e   : > { %262 = vst [vmem:[%s182_s27 + $0x70] sm:$0xff] %v261_v14  }
  0x1f   : > { %266 = vst [vmem:[%s182_s27 + $0x78] sm:$0xff] %v265_v15  }
  0x20 PF: > { %p974_p6 = scmp.ge.s32.totalorder %s1255_s16, 1  ;;  %p355_p7 = scmp.lt.s32.totalorder %s1255_s16, 3 }
  0x22   : > { %p356_p8 = pnand %p974_p6, %p355_p7 }
  0x23   : > { %s362_s7 = sand.u32 (!%p356_p8), 1, %s1239_s12   ;;  %s976_s26 = sshll.u32 (!%p356_p8), %s1247_s14, 3 }
  0x24   : > { %359 = sbr.rel (%p356_p8) target bundleno = 249 (0xf9), region = 69  ;;  %s975_s10 = sshll.u32 (!%p356_p8), %s362_s7, 7 }
  0x25   : > { %s1365_s25 = scalar_lea.vmem (!%p356_p8), [#allocation2], %s975_s10  ;;  %p419_p9 = scmp.lt.s32.totalorder (!%p356_p8), %s976_s26, 15 }
  0x29   : > { %v1140_v16 = vld [vmem:[%s1438_s1 + $0x18] sm:$0xff]  ;;  %v1134_v17 = vld [vmem:[%s1438_s1 + $0x8] sm:$0xff]  ;;  %v1139_v20 = vld [vmem:[%s1438_s1 + $0x10] sm:$0xff]  ;;  %vm488_vm0 = vcmask 261120   ;;  %s1448_s26 = smov (!%p419_p9, %s976_s26), 15 }
  0x2a   : > { %v1146_v18 = vld [vmem:[%s1438_s1 + $0x28] sm:$0xff]  ;;  %v1152_v19 = vld [vmem:[%s1438_s1 + $0x38] sm:$0xff]  ;;  %507 = vmatpush.bf16.msra.mxu0 %v1140_v16  ;;  %580 = vmatpush.bf16.msra.mxu1 %v1134_v17  ;;  %v1133_v21 = vld [vmem:[%s1438_s1] sm:$0xff]  ;;  %s977_s29 = sshll.u32 %s1448_s26, 2 }
  0x2b   : > { %667 = vmatpush.bf16.msra.mxu2 %v1146_v18  ;;  %762 = vmatpush.bf16.msra.mxu3 %v1152_v19  ;;  %v1145_v22 = vld [vmem:[%s1438_s1 + $0x20] sm:$0xff]  ;;  %v1151_v23 = vld [vmem:[%s1438_s1 + $0x30] sm:$0xff]  ;;  %v1136_v28 = vld [vmem:[%s1365_s25 + $0x28] sm:$0xff]  ;;  %s1410_s4 = scalar_lea.vmem %s1440_s3, %s977_s29 }
  0x2c   : > { %v1135_v24 = vld [vmem:[%s1365_s25 + $0x20] sm:$0xff]  ;;  %v1130_v29 = vld [vmem:[%s1365_s25 + $0x8] sm:$0xff]  ;;  %v1137_v32 = vld [vmem:[%s1365_s25 + $0x30] sm:$0xff] }
  0x2d   : > { %v1129_v25 = vld [vmem:[%s1365_s25] sm:$0xff]  ;;  %v1142_v30 = vld [vmem:[%s1365_s25 + $0x48] sm:$0xff]  ;;  %v1131_v33 = vld [vmem:[%s1365_s25 + $0x10] sm:$0xff] }
  0x2e   : > { %508 = vmatpush.bf16.msra.mxu0 %v1139_v20  ;;  %581 = vmatpush.bf16.msra.mxu1 %v1133_v21  ;;  %v1141_v26 = vld [vmem:[%s1365_s25 + $0x40] sm:$0xff]  ;;  %v1148_v31 = vld [vmem:[%s1365_s25 + $0x68] sm:$0xff]  ;;  %v1143_v34 = vld [vmem:[%s1365_s25 + $0x50] sm:$0xff] }
  0x2f   : > { %v1147_v27 = vld [vmem:[%s1365_s25 + $0x60] sm:$0xff]  ;;  %668 = vmatpush.bf16.msra.mxu2 %v1145_v22  ;;  %763 = vmatpush.bf16.msra.mxu3 %v1151_v23  ;;  %v1149_v35 = vld [vmem:[%s1365_s25 + $0x70] sm:$0xff]  ;;  %v1138_v36 = vld [vmem:[%s1365_s25 + $0x38] sm:$0xff] }
  0x30   : > { %v1132_v37 = vld [vmem:[%s1365_s25 + $0x18] sm:$0xff]  ;;  %v1403_v49 = vld [vmem:[%s1439_s2] ss:$0 sm:$0xff] }
  0x31   : > { %1014 = vmatmul.msk.bf16.vlgmr.msra.gmra.mxu0 %vm488_vm0, %v1135_v24  ;;  %1042 = vmatmul.msk.bf16.vlgmr.msra.gmra.mxu1 %vm488_vm0, %v1129_v25  ;;  %v1144_v38 = vld [vmem:[%s1365_s25 + $0x58] sm:$0xff] }
  0x32   : > { %1082 = vmatmul.msk.bf16.vlgmr.msra.gmra.mxu2 %vm488_vm0, %v1141_v26  ;;  %1122 = vmatmul.msk.bf16.vlgmr.msra.gmra.mxu3 %vm488_vm0, %v1147_v27  ;;  %v1150_v39 = vld [vmem:[%s1365_s25 + $0x78] sm:$0xff] }
  0x41   : > { %1015 = vmatmul.msk.bf16.gmra.mxu0 %vm488_vm0, %v1136_v28  ;;  %1043 = vmatmul.msk.bf16.gmra.mxu1 %vm488_vm0, %v1130_v29 }
  0x42   : > { %1083 = vmatmul.msk.bf16.gmra.mxu2 %vm488_vm0, %v1142_v30  ;;  %1123 = vmatmul.msk.bf16.gmra.mxu3 %vm488_vm0, %v1148_v31 }
  0x51   : > { %1016 = vmatmul.msk.bf16.gmra.mxu0 %vm488_vm0, %v1137_v32  ;;  %1044 = vmatmul.msk.bf16.gmra.mxu1 %vm488_vm0, %v1131_v33 }
  0x52   : > { %1084 = vmatmul.msk.bf16.gmra.mxu2 %vm488_vm0, %v1143_v34  ;;  %1124 = vmatmul.msk.bf16.gmra.mxu3 %vm488_vm0, %v1149_v35 }
  0x61   : > { %1017 = vmatmul.msk.bf16.gmra.mxu0 %vm488_vm0, %v1138_v36  ;;  %1045 = vmatmul.msk.bf16.gmra.mxu1 %vm488_vm0, %v1132_v37 }
  0x62   : > { %1085 = vmatmul.msk.bf16.gmra.mxu2 %vm488_vm0, %v1144_v38  ;;  %1125 = vmatmul.msk.bf16.gmra.mxu3 %vm488_vm0, %v1150_v39 }
  0xae   : > { %v510_v40 = vpop.f32.mrf.mxu0  ;;  %v583_v41 = vpop.f32.mrf.mxu1 }
  0xaf   : > { %v584_v42 = vadd.f32 %v583_v41, %v510_v40 }
  0xb5   : > { %v670_v43 = vpop.f32.mrf.mxu2  ;;  %v765_v44 = vpop.f32.mrf.mxu3 }
  0xb6   : > { %v512_v45 = vpop.f32.mrf.mxu0  ;;  %v585_v46 = vpop.f32.mrf.mxu1  ;;  %v690_v47 = vadd.f32 %v670_v43, %v584_v42 }
  0xb7   : > { %v586_v50 = vadd.f32 %v585_v46, %v512_v45 }
  0xb8   : > { %v785_v48 = vadd.f32 %v765_v44, %v690_v47 }
  0xba   : > { %v797_v56 = vadd.f32 %v1403_v49, %v785_v48 }
  0xbc   : > { %v805_v59 = vmax.f32 %v797_v56, 0.0 }
  0xbd   : > { %v672_v51 = vpop.f32.mrf.mxu2  ;;  %v767_v52 = vpop.f32.mrf.mxu3 }
  0xbe   : > { %v691_v53 = vadd.f32 %v672_v51, %v586_v50  ;;  %v515_v54 = vpop.f32.mrf.mxu0  ;;  %v588_v55 = vpop.f32.mrf.mxu1 }
  0xbf   : > { %v589_v61 = vadd.f32 %v588_v55, %v515_v54 }
  0xc0   : > { %v786_v57 = vadd.f32 %v767_v52, %v691_v53 }
  0xc2   : > { %v798_v58 = vadd.f32 %v1403_v49, %v786_v57 }
  0xc4   : > { %v806_v60 = vmax.f32 %v798_v58, 0.0 }
  0xc5   : > { %v675_v62 = vpop.f32.mrf.mxu2  ;;  %v770_v63 = vpop.f32.mrf.mxu3 }
  0xc6   : > { %v1156_v0 = vpack.c.bf16 %v806_v60, %v805_v59  ;;  %v517_v1 = vpop.f32.mrf.mxu0  ;;  %v590_v2 = vpop.f32.mrf.mxu1  ;;  %v692_v3 = vadd.f32 %v675_v62, %v589_v61 }
  0xc7   : > { %v591_v5 = vadd.f32 %v590_v2, %v517_v1 }
  0xc8   : > { %1157 = vst [vmem:[%s1410_s4] sm:$0xff] %v1156_v0   ;;  %v787_v4 = vadd.f32 %v770_v63, %v692_v3 }
  0xca   : > { %v799_v11 = vadd.f32 %v1403_v49, %v787_v4 }
  0xcc   : > { %v807_v14 = vmax.f32 %v799_v11, 0.0 }
  0xcd   : > { %v677_v6 = vpop.f32.mrf.mxu2  ;;  %v772_v7 = vpop.f32.mrf.mxu3 }
  0xce   : > { %v693_v8 = vadd.f32 %v677_v6, %v591_v5  ;;  %v520_v9 = vpop.f32.mrf.mxu0  ;;  %v593_v10 = vpop.f32.mrf.mxu1 }
  0xcf   : > { %v594_v16 = vadd.f32 %v593_v10, %v520_v9 }
  0xd0   : > { %v788_v12 = vadd.f32 %v772_v7, %v693_v8 }
  0xd2   : > { %v800_v13 = vadd.f32 %v1403_v49, %v788_v12 }
  0xd4   : > { %v808_v15 = vmax.f32 %v800_v13, 0.0 }
  0xd5   : > { %v680_v17 = vpop.f32.mrf.mxu2  ;;  %v775_v18 = vpop.f32.mrf.mxu3 }
  0xd6   : > { %v1161_v19 = vpack.c.bf16 %v808_v15, %v807_v14  ;;  %v522_v20 = vpop.f32.mrf.mxu0  ;;  %v595_v21 = vpop.f32.mrf.mxu1  ;;  %v694_v22 = vadd.f32 %v680_v17, %v594_v16 }
  0xd7   : > { %v596_v24 = vadd.f32 %v595_v21, %v522_v20 }
  0xd8   : > { %1173 = vst [vmem:[%s1410_s4 + $0x8] sm:$0xff] %v1161_v19   ;;  %v789_v23 = vadd.f32 %v775_v18, %v694_v22 }
  0xda   : > { %v801_v30 = vadd.f32 %v1403_v49, %v789_v23 }
  0xdc   : > { %v809_v33 = vmax.f32 %v801_v30, 0.0 }
  0xdd   : > { %v682_v25 = vpop.f32.mrf.mxu2  ;;  %v777_v26 = vpop.f32.mrf.mxu3 }
  0xde   : > { %v695_v27 = vadd.f32 %v682_v25, %v596_v24  ;;  %v525_v28 = vpop.f32.mrf.mxu0  ;;  %v598_v29 = vpop.f32.mrf.mxu1 }
  0xdf   : > { %v599_v35 = vadd.f32 %v598_v29, %v525_v28 }
  0xe0   : > { %v790_v31 = vadd.f32 %v777_v26, %v695_v27 }
  0xe2   : > { %v802_v32 = vadd.f32 %v1403_v49, %v790_v31 }
  0xe4   : > { %v810_v34 = vmax.f32 %v802_v32, 0.0 }
  0xe5   : > { %v685_v36 = vpop.f32.mrf.mxu2  ;;  %v780_v37 = vpop.f32.mrf.mxu3 }
  0xe6   : > { %v1166_v38 = vpack.c.bf16 %v810_v34, %v809_v33  ;;  %v696_v39 = vadd.f32 %v685_v36, %v599_v35  ;;  %v527_v40 = vpop.f32.mrf.mxu0  ;;  %v600_v41 = vpop.f32.mrf.mxu1 }
  0xe7   : > { %v601_v43 = vadd.f32 %v600_v41, %v527_v40 }
  0xe8   : > { %1174 = vst [vmem:[%s1410_s4 + $0x10] sm:$0xff] %v1166_v38   ;;  %v791_v42 = vadd.f32 %v780_v37, %v696_v39 }
  0xea   : > { %v803_v47 = vadd.f32 %v1403_v49, %v791_v42 }
  0xec   : > { %v811_v51 = vmax.f32 %v803_v47, 0.0 }
  0xed   : > { %v687_v44 = vpop.f32.mrf.mxu2  ;;  %v782_v46 = vpop.f32.mrf.mxu3 }
  0xee   : > { %v697_v45 = vadd.f32 %v687_v44, %v601_v43 }
  0xf0   : > { %v792_v48 = vadd.f32 %v782_v46, %v697_v45 }
  0xf2   : > { %v804_v50 = vadd.f32 %v1403_v49, %v792_v48 }
  0xf4   : > { %v812_v52 = vmax.f32 %v804_v50, 0.0 }
  0xf6   : > { %v1171_v53 = vpack.c.bf16 %v812_v52, %v811_v51 }
  0xf8   : > { %1175 = vst [vmem:[%s1410_s4 + $0x18] sm:$0xff] %v1171_v53  }
  0xf9 PF: > { %s13_s16 = sadd.s32 1, %s1255_s16   ;;  %s1441_s12 = smov %s1243_s13 }
  0xfa   : > { %p10_p10 = scmp.ge.s32.totalorder %s13_s16, 4   ;;  %s1442_s13 = smov %s1312_s20 }
  0xfb   : > { %s1443_s14 = smov %s1251_s15  ;;  %s1444_s15 = smov %s1446_s17 }
  0xfc   :  { %12 = sbr.rel (!%p10_p10) target bundleno = 3 (0x3), region = 120 }

// kernel: _lambda_.8
= control target key start
LH: loop header
LB: loop body
LE: loop exit
PB: predicated region body
PF: predicated region fallthrough
CT: control target
= control target key end

     0   :  { %s1191_s12 = smov 0   ;;  %s1193_s13 = smov 0   ;;  %s1355_s0 = inlined_call_operand.vmem [shape: bf16[4,32,128], index: 0, kind: input, shape index: {}]   ;;  %s1356_s1 = inlined_call_operand.vmem [shape: bf16[1,4,128,128], index: 1, kind: input, shape index: {}]   ;;  %s1357_s2 = inlined_call_operand.vmem [shape: f32[1,128], index: 2, kind: input, shape index: {}]   ;;  %s1358_s3 = inlined_call_operand.vmem [shape: bf16[1,32,128], index: 3, kind: output, shape index: {}]  }
   0x1   :  { %s1195_s14 = smov 0   ;;  %s1197_s15 = smov 0  }
   0x2   :  { %s1199_s16 = smov 0  }
   0x3 LB: > { %s28_s17 = sadd.s32 1, %s1165_s15  ;;  %p48_p1 = scmp.ne.s32.totalorder %s1157_s13, %s1153_s12  ;;  %s1169_s16 = sphi %s1199_s16, %s13_s16   ;;  %s1165_s15 = sphi %s1197_s15, %s1362_s15   ;;  %s1161_s14 = sphi %s1195_s14, %s1361_s14   ;;  %s1157_s13 = sphi %s1193_s13, %s1360_s13   ;;  %s1153_s12 = sphi %s1191_s12, %s1359_s12  }
   0x4   : > { %p30_p0 = scmp.ge.s32.totalorder %s28_s17, 2  ;;  %p49_p2 = scmp.eq.s32.totalorder %s1169_s16, 0 }
   0x5   : > { %s41_s19 = sadd.s32 1, %s1157_s13  ;;  %p840_p5 = scmp.ge.s32.totalorder %s1169_s16, 2 }
   0x6   : > { %s1364_s17 = smov (%p30_p0, %s28_s17), 0  ;;  %p50_p3 = por %p49_p2, %p48_p1 }
   0x7   : > { %s37_s18 = ssub.s32 %s1165_s15, %s1364_s17  ;;  %175 = sbr.rel (%p840_p5) target bundleno = 20 (0x14), region = 24 }
   0x8   : > { %p39_p4 = scmp.eq.s32.totalorder %s37_s18, 0 }
   0xa   : > { %s1226_s20 = scalar_select %p39_p4, %s1157_s13, %s41_s19  }
   0xc   : > { %178 = sbr.rel (!%p50_p3) target bundleno = 20 (0x14), region = 28  ;;  %s180_s21 = sand.u32 (%p50_p3), 1, %s1157_s13  }
   0xd   : > { %s1048_s22 = sshll.u32 (%p50_p3), %s1165_s15, 3  ;;  %s841_s23 = sshll.u32 (%p50_p3), %s180_s21, 5 }
   0xe   : > { %s188_s26 = scalar_lea.vmem (%p50_p3), %s1355_s0, %s1048_s22  ;;  %s182_s27 = scalar_lea.vmem (%p50_p3), [#allocation2], %s841_s23 }
   0xf   : > { %v205_v0 = vld [vmem:[%s188_s26] sm:$0xff] (%p50_p3)   ;;  %v209_v1 = vld [vmem:[%s188_s26 + $0x10] sm:$0xff] (%p50_p3)  }
  0x10   : > { %v213_v2 = vld [vmem:[%s188_s26 + $0x20] sm:$0xff] (%p50_p3)   ;;  %206 = vst [vmem:[%s182_s27] sm:$0xff] (%p50_p3), %v205_v0   ;;  %v217_v3 = vld [vmem:[%s188_s26 + $0x30] sm:$0xff] (%p50_p3)  }
  0x11   : > { %210 = vst [vmem:[%s182_s27 + $0x8] sm:$0xff] %v209_v1  }
  0x12   : > { %214 = vst [vmem:[%s182_s27 + $0x10] sm:$0xff] %v213_v2  }
  0x13   : > { %218 = vst [vmem:[%s182_s27 + $0x18] sm:$0xff] %v217_v3  }
  0x14 PF: > { %p844_p6 = scmp.ge.s32.totalorder %s1169_s16, 1  ;;  %p259_p7 = scmp.lt.s32.totalorder %s1169_s16, 3 }
  0x16   : > { %p260_p8 = pnand %p844_p6, %p259_p7 }
  0x17   : > { %s266_s9 = sand.u32 (!%p260_p8), 1, %s1153_s12   ;;  %s846_s7 = sshll.u32 (!%p260_p8), %s1161_s14, 1 }
  0x18   : > { %263 = sbr.rel (%p260_p8) target bundleno = 214 (0xd6), region = 69  ;;  %s845_s12 = sshll.u32 (!%p260_p8), %s266_s9, 5 }
  0x19   : > { %s268_s6 = scalar_lea.vmem (!%p260_p8), [#allocation2], %s845_s12  ;;  %p323_p9 = scmp.lt.s32.totalorder (!%p260_p8), %s846_s7, 3 }
  0x1d   : > { %v1066_v4 = vld [vmem:[%s1356_s1 + $0x78] sm:$0xff]  ;;  %v1065_v8 = vld [vmem:[%s1356_s1 + $0x70] sm:$0xff]  ;;  %v1064_v12 = vld [vmem:[%s1356_s1 + $0x68] sm:$0xff]  ;;  %s1366_s7 = smov (!%p323_p9, %s846_s7), 3 }
  0x1e   : > { %v1057_v5 = vld [vmem:[%s1356_s1 + $0x38] sm:$0xff]  ;;  %425 = vmatpush.bf16.msra.mxu0 %v1066_v4  ;;  %v1056_v9 = vld [vmem:[%s1356_s1 + $0x30] sm:$0xff]  ;;  %v1055_v13 = vld [vmem:[%s1356_s1 + $0x28] sm:$0xff]  ;;  %s847_s10 = sshll.u32 %s1366_s7, 2 }
  0x1f   : > { %v1075_v6 = vld [vmem:[%s1356_s1 + $0xb8] sm:$0xff]  ;;  %493 = vmatpush.bf16.msra.mxu1 %v1057_v5  ;;  %v1074_v10 = vld [vmem:[%s1356_s1 + $0xb0] sm:$0xff]  ;;  %v1073_v14 = vld [vmem:[%s1356_s1 + $0xa8] sm:$0xff]  ;;  %s331_s18 = scalar_lea.vmem %s1358_s3, %s847_s10 }
  0x20   : > { %v1084_v7 = vld [vmem:[%s1356_s1 + $0xf8] sm:$0xff]  ;;  %581 = vmatpush.bf16.msra.mxu2 %v1075_v6  ;;  %v1083_v11 = vld [vmem:[%s1356_s1 + $0xf0] sm:$0xff]  ;;  %v1082_v15 = vld [vmem:[%s1356_s1 + $0xe8] sm:$0xff] }
  0x21   : > { %671 = vmatpush.bf16.msra.mxu3 %v1084_v7  ;;  %v1063_v16 = vld [vmem:[%s1356_s1 + $0x60] sm:$0xff]  ;;  %v1062_v20 = vld [vmem:[%s1356_s1 + $0x58] sm:$0xff]  ;;  %v1061_v24 = vld [vmem:[%s1356_s1 + $0x50] sm:$0xff] }
  0x22   : > { %426 = vmatpush.bf16.msra.mxu0 %v1065_v8  ;;  %v1054_v17 = vld [vmem:[%s1356_s1 + $0x20] sm:$0xff]  ;;  %v1053_v21 = vld [vmem:[%s1356_s1 + $0x18] sm:$0xff]  ;;  %v1052_v25 = vld [vmem:[%s1356_s1 + $0x10] sm:$0xff] }
  0x23   : > { %494 = vmatpush.bf16.msra.mxu1 %v1056_v9  ;;  %v1072_v18 = vld [vmem:[%s1356_s1 + $0xa0] sm:$0xff]  ;;  %v1071_v22 = vld [vmem:[%s1356_s1 + $0x98] sm:$0xff]  ;;  %v1070_v26 = vld [vmem:[%s1356_s1 + $0x90] sm:$0xff] }
  0x24   : > { %582 = vmatpush.bf16.msra.mxu2 %v1074_v10  ;;  %v1081_v19 = vld [vmem:[%s1356_s1 + $0xe0] sm:$0xff]  ;;  %v1080_v23 = vld [vmem:[%s1356_s1 + $0xd8] sm:$0xff]  ;;  %v1079_v27 = vld [vmem:[%s1356_s1 + $0xd0] sm:$0xff] }
  0x25   : > { %672 = vmatpush.bf16.msra.mxu3 %v1083_v11  ;;  %v1060_v28 = vld [vmem:[%s1356_s1 + $0x48] sm:$0xff]  ;;  %v1059_v32 = vld [vmem:[%s1356_s1 + $0x40] sm:$0xff]  ;;  %v1067_v38 = vld [vmem:[%s268_s6 + $0x10] sm:$0xff] }
  0x26   : > { %427 = vmatpush.bf16.msra.mxu0 %v1064_v12  ;;  %v1051_v29 = vld [vmem:[%s1356_s1 + $0x8] sm:$0xff]  ;;  %v1050_v33 = vld [vmem:[%s1356_s1] sm:$0xff]  ;;  %v1076_v39 = vld [vmem:[%s268_s6 + $0x18] sm:$0xff] }
  0x27   : > { %495 = vmatpush.bf16.msra.mxu1 %v1055_v13  ;;  %v1069_v30 = vld [vmem:[%s1356_s1 + $0x88] sm:$0xff]  ;;  %v1068_v34 = vld [vmem:[%s1356_s1 + $0x80] sm:$0xff] }
  0x28   : > { %583 = vmatpush.bf16.msra.mxu2 %v1073_v14  ;;  %v1078_v31 = vld [vmem:[%s1356_s1 + $0xc8] sm:$0xff]  ;;  %v1077_v35 = vld [vmem:[%s1356_s1 + $0xc0] sm:$0xff] }
  0x29   : > { %673 = vmatpush.bf16.msra.mxu3 %v1082_v15  ;;  %v1058_v36 = vld [vmem:[%s268_s6 + $0x8] sm:$0xff]  ;;  %v1049_v37 = vld [vmem:[%s268_s6] sm:$0xff] }
  0x2a   : > { %428 = vmatpush.bf16.msra.mxu0 %v1063_v16  ;;  %v1130_v49 = vld [vmem:[%s1357_s2] ss:$0 sm:$0xff] }
  0x2b   : > { %496 = vmatpush.bf16.msra.mxu1 %v1054_v17 }
  0x2c   : > { %584 = vmatpush.bf16.msra.mxu2 %v1072_v18 }
  0x2d   : > { %674 = vmatpush.bf16.msra.mxu3 %v1081_v19 }
  0x2e   : > { %429 = vmatpush.bf16.msra.mxu0 %v1062_v20 }
  0x2f   : > { %497 = vmatpush.bf16.msra.mxu1 %v1053_v21 }
  0x30   : > { %585 = vmatpush.bf16.msra.mxu2 %v1071_v22 }
  0x31   : > { %675 = vmatpush.bf16.msra.mxu3 %v1080_v23 }
  0x32   : > { %430 = vmatpush.bf16.msra.mxu0 %v1061_v24 }
  0x33   : > { %498 = vmatpush.bf16.msra.mxu1 %v1052_v25 }
  0x34   : > { %586 = vmatpush.bf16.msra.mxu2 %v1070_v26 }
  0x35   : > { %676 = vmatpush.bf16.msra.mxu3 %v1079_v27 }
  0x36   : > { %431 = vmatpush.bf16.msra.mxu0 %v1060_v28 }
  0x37   : > { %499 = vmatpush.bf16.msra.mxu1 %v1051_v29 }
  0x38   : > { %587 = vmatpush.bf16.msra.mxu2 %v1069_v30 }
  0x39   : > { %677 = vmatpush.bf16.msra.mxu3 %v1078_v31 }
  0x3a   : > { %432 = vmatpush.bf16.msra.mxu0 %v1059_v32 }
  0x3b   : > { %500 = vmatpush.bf16.msra.mxu1 %v1050_v33 }
  0x3c   : > { %588 = vmatpush.bf16.msra.mxu2 %v1068_v34 }
  0x3d   : > { %678 = vmatpush.bf16.msra.mxu3 %v1077_v35  ;;  %433 = vmatmul.bf16.vlgmr.msra.gmra.mxu0 %v1058_v36 }
  0x3e   : > { %501 = vmatmul.bf16.vlgmr.msra.gmra.mxu1 %v1049_v37 }
  0x3f   : > { %589 = vmatmul.bf16.vlgmr.msra.gmra.mxu2 %v1067_v38 }
  0x40   : > { %679 = vmatmul.bf16.vlgmr.msra.gmra.mxu3 %v1076_v39 }
  0xba   : > { %v434_v40 = vpop.f32.mrf.mxu0 }
  0xbb   : > { %v502_v41 = vpop.f32.mrf.mxu1 }
  0xbc   : > { %v503_v42 = vadd.f32 %v502_v41, %v434_v40 }
  0xc2   : > { %v590_v43 = vpop.f32.mrf.mxu2  ;;  %v436_v46 = vpop.f32.mrf.mxu0 }
  0xc3   : > { %v680_v44 = vpop.f32.mrf.mxu3  ;;  %v595_v45 = vadd.f32 %v590_v43, %v503_v42  ;;  %v504_v47 = vpop.f32.mrf.mxu1 }
  0xc4   : > { %v505_v50 = vadd.f32 %v504_v47, %v436_v46 }
  0xc5   : > { %v685_v48 = vadd.f32 %v680_v44, %v595_v45 }
  0xc7   : > { %v691_v54 = vadd.f32 %v1130_v49, %v685_v48 }
  0xc9   : > { %v693_v57 = vmax.f32 %v691_v54, 0.0 }
  0xca   : > { %v592_v51 = vpop.f32.mrf.mxu2 }
  0xcb   : > { %v596_v52 = vadd.f32 %v592_v51, %v505_v50  ;;  %v682_v53 = vpop.f32.mrf.mxu3 }
  0xcd   : > { %v686_v55 = vadd.f32 %v682_v53, %v596_v52 }
  0xcf   : > { %v692_v56 = vadd.f32 %v1130_v49, %v686_v55 }
  0xd1   : > { %v694_v58 = vmax.f32 %v692_v56, 0.0 }
  0xd3   : > { %v1088_v59 = vpack.c.bf16 %v694_v58, %v693_v57 }
  0xd5   : > { %1089 = vst [vmem:[%s331_s18] sm:$0xff] %v1088_v59  }
  0xd6 PF: > { %s13_s16 = sadd.s32 1, %s1169_s16   ;;  %s1359_s12 = smov %s1157_s13 }
  0xd7   : > { %p10_p10 = scmp.ge.s32.totalorder %s13_s16, 4   ;;  %s1360_s13 = smov %s1226_s20 }
  0xd8   : > { %s1361_s14 = smov %s1165_s15  ;;  %s1362_s15 = smov %s1364_s17 }
  0xd9   :  { %12 = sbr.rel (!%p10_p10) target bundleno = 3 (0x3), region = 120 }

// kernel: _lambda_.9
= control target key start
LH: loop header
LB: loop body
LE: loop exit
PB: predicated region body
PF: predicated region fallthrough
CT: control target
= control target key end

     0   :  { %s1332_s1 = inlined_call_operand.vmem [shape: bf16[1,4,256,128], index: 1, kind: input, shape index: {}]   ;;  %s1333_s0 = inlined_call_operand.vmem [shape: bf16[4,8,256], index: 0, kind: input, shape index: {}]   ;;  %s1334_s2 = inlined_call_operand.vmem [shape: f32[1,128], index: 2, kind: input, shape index: {}]   ;;  %s1335_s3 = inlined_call_operand.vmem [shape: bf16[1,8,128], index: 3, kind: output, shape index: {}]  }
   0x1   :  { %v1060_v0 = vld [vmem:[%s1332_s1 + $0xb8] sm:$0xff]  ;;  %v1059_v4 = vld [vmem:[%s1332_s1 + $0xb0] sm:$0xff]  ;;  %v1058_v8 = vld [vmem:[%s1332_s1 + $0xa8] sm:$0xff] }
   0x2   :  { %v1068_v1 = vld [vmem:[%s1332_s1 + $0xf8] sm:$0xff]  ;;  %185 = vmatpush.bf16.msra.mxu0 %v1060_v0  ;;  %v1067_v5 = vld [vmem:[%s1332_s1 + $0xf0] sm:$0xff]  ;;  %v1066_v9 = vld [vmem:[%s1332_s1 + $0xe8] sm:$0xff] }
   0x3   :  { %v1044_v2 = vld [vmem:[%s1332_s1 + $0x38] sm:$0xff]  ;;  %198 = vmatpush.bf16.msra.mxu1 %v1068_v1  ;;  %v1043_v6 = vld [vmem:[%s1332_s1 + $0x30] sm:$0xff]  ;;  %v1042_v10 = vld [vmem:[%s1332_s1 + $0x28] sm:$0xff] }
   0x4   :  { %v1052_v3 = vld [vmem:[%s1332_s1 + $0x78] sm:$0xff]  ;;  %314 = vmatpush.bf16.msra.mxu2 %v1044_v2  ;;  %v1051_v7 = vld [vmem:[%s1332_s1 + $0x70] sm:$0xff]  ;;  %v1050_v11 = vld [vmem:[%s1332_s1 + $0x68] sm:$0xff] }
   0x5   :  { %327 = vmatpush.bf16.msra.mxu3 %v1052_v3  ;;  %v1057_v12 = vld [vmem:[%s1332_s1 + $0xa0] sm:$0xff]  ;;  %v1056_v16 = vld [vmem:[%s1332_s1 + $0x98] sm:$0xff]  ;;  %v1055_v20 = vld [vmem:[%s1332_s1 + $0x90] sm:$0xff] }
   0x6   :  { %186 = vmatpush.bf16.msra.mxu0 %v1059_v4  ;;  %v1065_v13 = vld [vmem:[%s1332_s1 + $0xe0] sm:$0xff]  ;;  %v1064_v17 = vld [vmem:[%s1332_s1 + $0xd8] sm:$0xff]  ;;  %v1063_v21 = vld [vmem:[%s1332_s1 + $0xd0] sm:$0xff] }
   0x7   :  { %199 = vmatpush.bf16.msra.mxu1 %v1067_v5  ;;  %v1041_v14 = vld [vmem:[%s1332_s1 + $0x20] sm:$0xff]  ;;  %v1040_v18 = vld [vmem:[%s1332_s1 + $0x18] sm:$0xff]  ;;  %v1039_v22 = vld [vmem:[%s1332_s1 + $0x10] sm:$0xff] }
   0x8   :  { %315 = vmatpush.bf16.msra.mxu2 %v1043_v6  ;;  %v1049_v15 = vld [vmem:[%s1332_s1 + $0x60] sm:$0xff]  ;;  %v1048_v19 = vld [vmem:[%s1332_s1 + $0x58] sm:$0xff]  ;;  %v1047_v23 = vld [vmem:[%s1332_s1 + $0x50] sm:$0xff] }
   0x9   :  { %328 = vmatpush.bf16.msra.mxu3 %v1051_v7  ;;  %v1054_v24 = vld [vmem:[%s1332_s1 + $0x88] sm:$0xff]  ;;  %v14_v28 = vld [vmem:[%s1333_s0] sm:$0xff]  ;;  %v1076_v38 = vld [vmem:[%s1332_s1 + $0x138] sm:$0xff] }
   0xa   :  { %187 = vmatpush.bf16.msra.mxu0 %v1058_v8  ;;  %v1062_v25 = vld [vmem:[%s1332_s1 + $0xc8] sm:$0xff]  ;;  %v1053_v30 = vld [vmem:[%s1332_s1 + $0x80] sm:$0xff]  ;;  %v212_v32 = vunpack.c.l.b16 %v14_v28  ;;  %v213_v33 = vunpack.c.h.b16 %v14_v28  ;;  %v1084_v39 = vld [vmem:[%s1332_s1 + $0x178] sm:$0xff] }
   0xb   :  { %200 = vmatpush.bf16.msra.mxu1 %v1066_v9  ;;  %v1038_v26 = vld [vmem:[%s1332_s1 + $0x8] sm:$0xff]  ;;  %v1061_v31 = vld [vmem:[%s1332_s1 + $0xc0] sm:$0xff]  ;;  %v1092_v40 = vld [vmem:[%s1332_s1 + $0x1b8] sm:$0xff] }
   0xc   :  { %316 = vmatpush.bf16.msra.mxu2 %v1042_v10  ;;  %v1046_v27 = vld [vmem:[%s1332_s1 + $0x48] sm:$0xff]  ;;  %v1037_v34 = vld [vmem:[%s1332_s1] sm:$0xff]  ;;  %v1100_v41 = vld [vmem:[%s1332_s1 + $0x1f8] sm:$0xff]  ;;  %v214_v42 = vpack.c.b16 %v212_v32, %v212_v32  ;;  %v215_v43 = vpack.c.b16 %v213_v33, %v213_v33 }
   0xd   :  { %329 = vmatpush.bf16.msra.mxu3 %v1050_v11  ;;  %v682_v29 = vld [vmem:[%s1333_s0 + $0x8] sm:$0xff]  ;;  %v1045_v35 = vld [vmem:[%s1332_s1 + $0x40] sm:$0xff]  ;;  %v1075_v46 = vld [vmem:[%s1332_s1 + $0x130] sm:$0xff] }
   0xe   :  { %188 = vmatpush.bf16.msra.mxu0 %v1057_v12  ;;  %v83_v36 = vunpack.c.l.b16 %v682_v29  ;;  %v84_v37 = vunpack.c.h.b16 %v682_v29  ;;  %v1083_v47 = vld [vmem:[%s1332_s1 + $0x170] sm:$0xff]  ;;  %v1074_v50 = vld [vmem:[%s1332_s1 + $0x128] sm:$0xff]  ;;  %v1073_v54 = vld [vmem:[%s1332_s1 + $0x120] sm:$0xff] }
   0xf   :  { %201 = vmatpush.bf16.msra.mxu1 %v1065_v13  ;;  %v1091_v48 = vld [vmem:[%s1332_s1 + $0x1b0] sm:$0xff]  ;;  %v1082_v51 = vld [vmem:[%s1332_s1 + $0x168] sm:$0xff]  ;;  %v1081_v55 = vld [vmem:[%s1332_s1 + $0x160] sm:$0xff] }
  0x10   :  { %317 = vmatpush.bf16.msra.mxu2 %v1041_v14  ;;  %v85_v44 = vpack.c.b16 %v83_v36, %v83_v36  ;;  %v86_v45 = vpack.c.b16 %v84_v37, %v84_v37  ;;  %v1099_v49 = vld [vmem:[%s1332_s1 + $0x1f0] sm:$0xff]  ;;  %v1090_v52 = vld [vmem:[%s1332_s1 + $0x1a8] sm:$0xff]  ;;  %v1089_v56 = vld [vmem:[%s1332_s1 + $0x1a0] sm:$0xff] }
  0x11   :  { %330 = vmatpush.bf16.msra.mxu3 %v1049_v15  ;;  %v1098_v53 = vld [vmem:[%s1332_s1 + $0x1e8] sm:$0xff]  ;;  %v1097_v57 = vld [vmem:[%s1332_s1 + $0x1e0] sm:$0xff]  ;;  %v1072_v58 = vld [vmem:[%s1332_s1 + $0x118] sm:$0xff] }
  0x12   :  { %189 = vmatpush.bf16.msra.mxu0 %v1056_v16  ;;  %v1080_v59 = vld [vmem:[%s1332_s1 + $0x158] sm:$0xff]  ;;  %v1071_v62 = vld [vmem:[%s1332_s1 + $0x110] sm:$0xff]  ;;  %v1070_v2 = vld [vmem:[%s1332_s1 + $0x108] sm:$0xff] }
  0x13   :  { %202 = vmatpush.bf16.msra.mxu1 %v1064_v17  ;;  %v1088_v60 = vld [vmem:[%s1332_s1 + $0x198] sm:$0xff]  ;;  %v1079_v63 = vld [vmem:[%s1332_s1 + $0x150] sm:$0xff]  ;;  %v1078_v3 = vld [vmem:[%s1332_s1 + $0x148] sm:$0xff] }
  0x14   :  { %318 = vmatpush.bf16.msra.mxu2 %v1040_v18  ;;  %v1096_v61 = vld [vmem:[%s1332_s1 + $0x1d8] sm:$0xff]  ;;  %v1087_v0 = vld [vmem:[%s1332_s1 + $0x190] sm:$0xff]  ;;  %v1086_v5 = vld [vmem:[%s1332_s1 + $0x188] sm:$0xff] }
  0x15   :  { %331 = vmatpush.bf16.msra.mxu3 %v1048_v19  ;;  %v1095_v1 = vld [vmem:[%s1332_s1 + $0x1d0] sm:$0xff]  ;;  %v1094_v6 = vld [vmem:[%s1332_s1 + $0x1c8] sm:$0xff]  ;;  %v940_v7 = vld [vmem:[%s1333_s0 + $0x18] sm:$0xff] }
  0x16   :  { %190 = vmatpush.bf16.msra.mxu0 %v1055_v20  ;;  %v843_v4 = vld [vmem:[%s1333_s0 + $0x10] sm:$0xff]  ;;  %v1069_v10 = vld [vmem:[%s1332_s1 + $0x100] sm:$0xff]  ;;  %v541_v12 = vunpack.c.l.b16 %v940_v7  ;;  %v542_v13 = vunpack.c.h.b16 %v940_v7 }
  0x17   :  { %203 = vmatpush.bf16.msra.mxu1 %v1063_v21  ;;  %v376_v8 = vunpack.c.l.b16 %v843_v4  ;;  %v377_v9 = vunpack.c.h.b16 %v843_v4  ;;  %v1077_v11 = vld [vmem:[%s1332_s1 + $0x140] sm:$0xff] }
  0x18   :  { %319 = vmatpush.bf16.msra.mxu2 %v1039_v22  ;;  %v1085_v14 = vld [vmem:[%s1332_s1 + $0x180] sm:$0xff]  ;;  %v543_v18 = vpack.c.b16 %v541_v12, %v541_v12  ;;  %v544_v19 = vpack.c.b16 %v542_v13, %v542_v13 }
  0x19   :  { %332 = vmatpush.bf16.msra.mxu3 %v1047_v23  ;;  %v1093_v15 = vld [vmem:[%s1332_s1 + $0x1c0] sm:$0xff]  ;;  %v378_v16 = vpack.c.b16 %v376_v8, %v376_v8  ;;  %v379_v17 = vpack.c.b16 %v377_v9, %v377_v9 }
  0x1a   :  { %191 = vmatpush.bf16.msra.mxu0 %v1054_v24 }
  0x1b   :  { %204 = vmatpush.bf16.msra.mxu1 %v1062_v25 }
  0x1c   :  { %320 = vmatpush.bf16.msra.mxu2 %v1038_v26 }
  0x1d   :  { %333 = vmatpush.bf16.msra.mxu3 %v1046_v27 }
  0x1e   :  { %192 = vmatpush.bf16.msra.mxu0 %v1053_v30 }
  0x1f   :  { %205 = vmatpush.bf16.msra.mxu1 %v1061_v31 }
  0x20   :  { %321 = vmatpush.bf16.msra.mxu2 %v1037_v34 }
  0x21   :  { %334 = vmatpush.bf16.msra.mxu3 %v1045_v35  ;;  %193 = vmatmul.bf16.vlgmr.msra.gmra.mxu0 %v85_v44 }
  0x22   :  { %478 = vmatpush.bf16.msrb.mxu0 %v1076_v38  ;;  %206 = vmatmul.bf16.vlgmr.msra.gmra.mxu1 %v86_v45  ;;  %v1101_v38 = vld [vmem:[%s1334_s2] ss:$0 sm:$0xff] }
  0x23   :  { %491 = vmatpush.bf16.msrb.mxu1 %v1084_v39  ;;  %322 = vmatmul.bf16.vlgmr.msra.gmra.mxu2 %v214_v42 }
  0x24   :  { %643 = vmatpush.bf16.msrb.mxu2 %v1092_v40  ;;  %335 = vmatmul.bf16.vlgmr.msra.gmra.mxu3 %v215_v43 }
  0x25   :  { %656 = vmatpush.bf16.msrb.mxu3 %v1100_v41 }
  0x26   :  { %479 = vmatpush.bf16.msrb.mxu0 %v1075_v46 }
  0x27   :  { %492 = vmatpush.bf16.msrb.mxu1 %v1083_v47 }
  0x28   :  { %644 = vmatpush.bf16.msrb.mxu2 %v1091_v48 }
  0x29   :  { %657 = vmatpush.bf16.msrb.mxu3 %v1099_v49 }
  0x2a   :  { %480 = vmatpush.bf16.msrb.mxu0 %v1074_v50 }
  0x2b   :  { %493 = vmatpush.bf16.msrb.mxu1 %v1082_v51 }
  0x2c   :  { %645 = vmatpush.bf16.msrb.mxu2 %v1090_v52 }
  0x2d   :  { %658 = vmatpush.bf16.msrb.mxu3 %v1098_v53 }
  0x2e   :  { %481 = vmatpush.bf16.msrb.mxu0 %v1073_v54 }
  0x2f   :  { %494 = vmatpush.bf16.msrb.mxu1 %v1081_v55 }
  0x30   :  { %646 = vmatpush.bf16.msrb.mxu2 %v1089_v56 }
  0x31   :  { %659 = vmatpush.bf16.msrb.mxu3 %v1097_v57 }
  0x32   :  { %482 = vmatpush.bf16.msrb.mxu0 %v1072_v58 }
  0x33   :  { %495 = vmatpush.bf16.msrb.mxu1 %v1080_v59 }
  0x34   :  { %647 = vmatpush.bf16.msrb.mxu2 %v1088_v60 }
  0x35   :  { %660 = vmatpush.bf16.msrb.mxu3 %v1096_v61 }
  0x36   :  { %483 = vmatpush.bf16.msrb.mxu0 %v1071_v62 }
  0x37   :  { %496 = vmatpush.bf16.msrb.mxu1 %v1079_v63 }
  0x38   :  { %648 = vmatpush.bf16.msrb.mxu2 %v1087_v0 }
  0x39   :  { %661 = vmatpush.bf16.msrb.mxu3 %v1095_v1 }
  0x3a   :  { %484 = vmatpush.bf16.msrb.mxu0 %v1070_v2 }
  0x3b   :  { %497 = vmatpush.bf16.msrb.mxu1 %v1078_v3 }
  0x3c   :  { %649 = vmatpush.bf16.msrb.mxu2 %v1086_v5 }
  0x3d   :  { %662 = vmatpush.bf16.msrb.mxu3 %v1094_v6 }
  0x3e   :  { %485 = vmatpush.bf16.msrb.mxu0 %v1069_v10 }
  0x3f   :  { %498 = vmatpush.bf16.msrb.mxu1 %v1077_v11 }
  0x40   :  { %650 = vmatpush.bf16.msrb.mxu2 %v1085_v14 }
  0x41   :  { %663 = vmatpush.bf16.msrb.mxu3 %v1093_v15  ;;  %486 = vmatmul.bf16.vlgmr.msrb.gmra.mxu0 %v378_v16 }
  0x42   :  { %499 = vmatmul.bf16.vlgmr.msrb.gmra.mxu1 %v379_v17 }
  0x43   :  { %651 = vmatmul.bf16.vlgmr.msrb.gmra.mxu2 %v543_v18 }
  0x44   :  { %664 = vmatmul.bf16.vlgmr.msrb.gmra.mxu3 %v544_v19 }
  0x9e   :  { %v194_v20 = vpop.f32.mrf.mxu0 }
  0x9f   :  { %v207_v21 = vpop.f32.mrf.mxu1 }
  0xa0   :  { %v208_v28 = vadd.f32 %v207_v21, %v194_v20 }
  0xa6   :  { %v323_v22 = vpop.f32.mrf.mxu2  ;;  %v196_v24 = vpop.f32.mrf.mxu0 }
  0xa7   :  { %v336_v23 = vpop.f32.mrf.mxu3  ;;  %v209_v25 = vpop.f32.mrf.mxu1  ;;  %v324_v31 = vadd.f32 %v323_v22, %v208_v28 }
  0xa9   :  { %v337_v33 = vadd.f32 %v336_v23, %v324_v31 }
  0xae   :  { %v325_v26 = vpop.f32.mrf.mxu2 }
  0xaf   :  { %v338_v27 = vpop.f32.mrf.mxu3 }
  0xbe   :  { %v487_v29 = vpop.f32.mrf.mxu0 }
  0xbf   :  { %v500_v30 = vpop.f32.mrf.mxu1 }
  0xc0   :  { %v501_v32 = vadd.f32 %v500_v30, %v487_v29 }
  0xc2   :  { %v504_v36 = vadd.f32 %v501_v32, %v337_v33 }
  0xc6   :  { %v652_v34 = vpop.f32.mrf.mxu2  ;;  %v489_v39 = vpop.f32.mrf.mxu0 }
  0xc7   :  { %v665_v35 = vpop.f32.mrf.mxu3  ;;  %v502_v40 = vpop.f32.mrf.mxu1 }
  0xc8   :  { %v666_v37 = vadd.f32 %v665_v35, %v652_v34 }
  0xca   :  { %v669_v41 = vadd.f32 %v666_v37, %v504_v36 }
  0xcc   :  { %v674_v42 = vadd.f32 %v1101_v38, %v669_v41 }
  0xce   :  { %v675_v43 = vmax.f32 %v674_v42, 0.0  ;;  %v654_v44 = vpop.f32.mrf.mxu2 }
  0xcf   :  { %v667_v45 = vpop.f32.mrf.mxu3 }
  0xd0   :  { %v676_v46 = vpack.c.bf16 %v675_v43, %v675_v43 }
  0xd2   :  { %677 = vst [vmem:[%s1335_s3] sm:$0xf] %v676_v46 }

// kernel: _lambda_.10
= control target key start
LH: loop header
LB: loop body
LE: loop exit
PB: predicated region body
PF: predicated region fallthrough
CT: control target
= control target key end

     0   :  { %s3830_s0 = inlined_call_operand.vmem [shape: bf16[2,512], index: 0, kind: input, shape index: {}]   ;;  %s3831_s1 = inlined_call_operand.vmem [shape: f32[2,128], index: 1, kind: input, shape index: {}]   ;;  %s3832_s2 = inlined_call_operand.vmem [shape: bf16[512,256], index: 2, kind: input, shape index: {}]   ;;  %s3833_s3 = inlined_call_operand.vmem [shape: f32[1,256], index: 3, kind: input, shape index: {}, may-alias: {3,13}]   ;;  %s3834_s4 = inlined_call_operand.vmem [shape: bf16[256,128], index: 4, kind: input, shape index: {}]   ;;  %s3835_s5 = inlined_call_operand.vmem [shape: f32[1,128], index: 5, kind: input, shape index: {}, may-alias: {5,7,9,11}]   ;;  %s3836_s6 = inlined_call_operand.vmem [shape: bf16[128,128], index: 6, kind: input, shape index: {}]   ;;  %s3837_s7 = inlined_call_operand.vmem [shape: f32[1,128], index: 7, kind: input, shape index: {}, may-alias: {5,7,9,11}]   ;;  %s3838_s8 = inlined_call_operand.vmem [shape: bf16[128,128], index: 8, kind: input, shape index: {}]   ;;  %s3839_s9 = inlined_call_operand.vmem [shape: f32[1,128], index: 9, kind: input, shape index: {}, may-alias: {5,7,9,11}]   ;;  %s3840_s10 = inlined_call_operand.vmem [shape: bf16[128,128], index: 10, kind: input, shape index: {}]   ;;  %s3841_s11 = inlined_call_operand.vmem [shape: f32[1,128], index: 11, kind: input, shape index: {}, may-alias: {5,7,9,11}]   ;;  %s3842_s12 = inlined_call_operand.vmem [shape: bf16[128,256], index: 12, kind: input, shape index: {}]   ;;  %s3843_s13 = inlined_call_operand.vmem [shape: f32[1,256], index: 13, kind: input, shape index: {}, may-alias: {3,13}]   ;;  %s3844_s14 = inlined_call_operand.vmem [shape: bf16[256,512], index: 14, kind: input, shape index: {}]   ;;  %s3845_s15 = inlined_call_operand.vmem [shape: f32[1,512], index: 15, kind: input, shape index: {}]   ;;  %s3846_s16 = inlined_call_operand.vmem [shape: bf16[2,512], index: 16, kind: output, shape index: {0}]   ;;  %s3847_s17 = inlined_call_operand.hbm [shape: f32[2,128], index: 17, kind: output, shape index: {1}]   ;;  %s3848_s18 = inlined_call_operand.hbm [shape: f32[2,128], index: 18, kind: output, shape index: {2}]   ;;  %s3849_s19 = inlined_call_operand.hbm [shape: f32[2,128], index: 19, kind: output, shape index: {3}]  }
   0x1   :  { %3851 = sst [smem:[#allocation9_spill]] %s3830_s0 }
   0x2   :  { %3852 = sst [smem:[#allocation10_spill]] %s3831_s1 }
   0x3   :  { %3853 = sst [smem:[#allocation11_spill]] %s3832_s2 }
   0x4   :  { %3854 = sst [smem:[#allocation12_spill]] %s3833_s3 }
   0x5   :  { %25 = vsyncpa [#allocation3], 0  ;;  %s3855_s20 = sld [smem:[#allocation11_spill]] }
   0x6   :  { %s3856_s28 = sld [smem:[#allocation9_spill]] }
   0xb   :  { %v1741_v0 = vld [vmem:[%s3855_s20 + $0x70] sm:$0xf]  ;;  %v2434_v1 = vld [vmem:[%s3855_s20 + $0x74] sm:$0xf0]  ;;  %v1733_v11 = vld [vmem:[%s3855_s20 + $0x60] sm:$0xf] }
   0xc   :  { %v1805_v2 = vld [vmem:[%s3855_s20 + $0xf0] sm:$0xf]  ;;  %v1742_v3 = vor.u32 %v2434_v1, %v1741_v0  ;;  %v2450_v4 = vld [vmem:[%s3855_s20 + $0xf4] sm:$0xf0]  ;;  %v2432_v13 = vld [vmem:[%s3855_s20 + $0x64] sm:$0xf0] }
   0xd   :  { %v1869_v5 = vld [vmem:[%s3855_s20 + $0x170] sm:$0xf]  ;;  %v2466_v6 = vld [vmem:[%s3855_s20 + $0x174] sm:$0xf0]  ;;  %v1806_v7 = vor.u32 %v2450_v4, %v1805_v2  ;;  %v1797_v14 = vld [vmem:[%s3855_s20 + $0xe0] sm:$0xf]  ;;  %v1734_v16 = vor.u32 %v2432_v13, %v1733_v11 }
   0xe   :  { %v1870_v8 = vor.u32 %v2466_v6, %v1869_v5  ;;  %v1933_v9 = vld [vmem:[%s3855_s20 + $0x1f0] sm:$0xf]  ;;  %v2482_v10 = vld [vmem:[%s3855_s20 + $0x1f4] sm:$0xf0]  ;;  %460 = vmatpush.bf16.msra.mxu0 %v1742_v3  ;;  %v2448_v15 = vld [vmem:[%s3855_s20 + $0xe4] sm:$0xf0] }
   0xf   :  { %v1934_v12 = vor.u32 %v2482_v10, %v1933_v9  ;;  %473 = vmatpush.bf16.msra.mxu1 %v1806_v7  ;;  %v1798_v17 = vor.u32 %v2448_v15, %v1797_v14  ;;  %v1861_v18 = vld [vmem:[%s3855_s20 + $0x160] sm:$0xf]  ;;  %v2464_v19 = vld [vmem:[%s3855_s20 + $0x164] sm:$0xf0]  ;;  %v1725_v23 = vld [vmem:[%s3855_s20 + $0x50] sm:$0xf] }
  0x10   :  { %486 = vmatpush.bf16.msra.mxu2 %v1870_v8  ;;  %v1925_v20 = vld [vmem:[%s3855_s20 + $0x1e0] sm:$0xf]  ;;  %v1862_v21 = vor.u32 %v2464_v19, %v1861_v18  ;;  %v2480_v22 = vld [vmem:[%s3855_s20 + $0x1e4] sm:$0xf0]  ;;  %v2430_v24 = vld [vmem:[%s3855_s20 + $0x54] sm:$0xf0] }
  0x11   :  { %499 = vmatpush.bf16.msra.mxu3 %v1934_v12  ;;  %v1926_v25 = vor.u32 %v2480_v22, %v1925_v20  ;;  %v1789_v26 = vld [vmem:[%s3855_s20 + $0xd0] sm:$0xf]  ;;  %v2446_v27 = vld [vmem:[%s3855_s20 + $0xd4] sm:$0xf0]  ;;  %v1726_v29 = vor.u32 %v2430_v24, %v1725_v23  ;;  %v1717_v35 = vld [vmem:[%s3855_s20 + $0x40] sm:$0xf] }
  0x12   :  { %v1853_v28 = vld [vmem:[%s3855_s20 + $0x150] sm:$0xf]  ;;  %461 = vmatpush.bf16.msra.mxu0 %v1734_v16  ;;  %v2462_v30 = vld [vmem:[%s3855_s20 + $0x154] sm:$0xf0]  ;;  %v1790_v33 = vor.u32 %v2446_v27, %v1789_v26  ;;  %v2428_v36 = vld [vmem:[%s3855_s20 + $0x44] sm:$0xf0] }
  0x13   :  { %v1917_v31 = vld [vmem:[%s3855_s20 + $0x1d0] sm:$0xf]  ;;  %v2478_v32 = vld [vmem:[%s3855_s20 + $0x1d4] sm:$0xf0]  ;;  %474 = vmatpush.bf16.msra.mxu1 %v1798_v17  ;;  %v1854_v34 = vor.u32 %v2462_v30, %v1853_v28  ;;  %v1781_v37 = vld [vmem:[%s3855_s20 + $0xc0] sm:$0xf]  ;;  %v1718_v44 = vor.u32 %v2428_v36, %v1717_v35 }
  0x14   :  { %487 = vmatpush.bf16.msra.mxu2 %v1862_v21  ;;  %v1918_v38 = vor.u32 %v2478_v32, %v1917_v31  ;;  %v2444_v39 = vld [vmem:[%s3855_s20 + $0xc4] sm:$0xf0]  ;;  %v1845_v40 = vld [vmem:[%s3855_s20 + $0x140] sm:$0xf]  ;;  %v1709_v47 = vld [vmem:[%s3855_s20 + $0x30] sm:$0xf] }
  0x15   :  { %500 = vmatpush.bf16.msra.mxu3 %v1926_v25  ;;  %v2460_v41 = vld [vmem:[%s3855_s20 + $0x144] sm:$0xf0]  ;;  %v1909_v42 = vld [vmem:[%s3855_s20 + $0x1c0] sm:$0xf]  ;;  %v1782_v45 = vor.u32 %v2444_v39, %v1781_v37  ;;  %v2426_v48 = vld [vmem:[%s3855_s20 + $0x34] sm:$0xf0] }
  0x16   :  { %v2476_v43 = vld [vmem:[%s3855_s20 + $0x1c4] sm:$0xf0]  ;;  %462 = vmatpush.bf16.msra.mxu0 %v1726_v29  ;;  %v1846_v46 = vor.u32 %v2460_v41, %v1845_v40  ;;  %v1773_v49 = vld [vmem:[%s3855_s20 + $0xb0] sm:$0xf]  ;;  %v2442_v51 = vld [vmem:[%s3855_s20 + $0xb4] sm:$0xf0]  ;;  %v1710_v56 = vor.u32 %v2426_v48, %v1709_v47 }
  0x17   :  { %475 = vmatpush.bf16.msra.mxu1 %v1790_v33  ;;  %v1910_v50 = vor.u32 %v2476_v43, %v1909_v42  ;;  %v1837_v52 = vld [vmem:[%s3855_s20 + $0x130] sm:$0xf]  ;;  %v2458_v53 = vld [vmem:[%s3855_s20 + $0x134] sm:$0xf0]  ;;  %v1774_v57 = vor.u32 %v2442_v51, %v1773_v49  ;;  %v1701_v59 = vld [vmem:[%s3855_s20 + $0x20] sm:$0xf] }
  0x18   :  { %488 = vmatpush.bf16.msra.mxu2 %v1854_v34  ;;  %v1901_v54 = vld [vmem:[%s3855_s20 + $0x1b0] sm:$0xf]  ;;  %v2474_v55 = vld [vmem:[%s3855_s20 + $0x1b4] sm:$0xf0]  ;;  %v1838_v58 = vor.u32 %v2458_v53, %v1837_v52  ;;  %v2424_v60 = vld [vmem:[%s3855_s20 + $0x24] sm:$0xf0] }
  0x19   :  { %501 = vmatpush.bf16.msra.mxu3 %v1918_v38  ;;  %v1765_v61 = vld [vmem:[%s3855_s20 + $0xa0] sm:$0xf]  ;;  %v1902_v62 = vor.u32 %v2474_v55, %v1901_v54  ;;  %v2440_v63 = vld [vmem:[%s3855_s20 + $0xa4] sm:$0xf0]  ;;  %v1702_v4 = vor.u32 %v2424_v60, %v1701_v59  ;;  %v1693_v7 = vld [vmem:[%s3855_s20 + $0x10] sm:$0xf] }
  0x1a   :  { %463 = vmatpush.bf16.msra.mxu0 %v1718_v44  ;;  %v1829_v0 = vld [vmem:[%s3855_s20 + $0x120] sm:$0xf]  ;;  %v2456_v1 = vld [vmem:[%s3855_s20 + $0x124] sm:$0xf0]  ;;  %v1766_v5 = vor.u32 %v2440_v63, %v1765_v61  ;;  %v2422_v8 = vld [vmem:[%s3855_s20 + $0x14] sm:$0xf0] }
  0x1b   :  { %476 = vmatpush.bf16.msra.mxu1 %v1782_v45  ;;  %v1893_v2 = vld [vmem:[%s3855_s20 + $0x1a0] sm:$0xf]  ;;  %v2472_v3 = vld [vmem:[%s3855_s20 + $0x1a4] sm:$0xf0]  ;;  %v1830_v6 = vor.u32 %v2456_v1, %v1829_v0  ;;  %v1757_v9 = vld [vmem:[%s3855_s20 + $0x90] sm:$0xf]  ;;  %v1694_v17 = vor.u32 %v2422_v8, %v1693_v7 }
  0x1c   :  { %489 = vmatpush.bf16.msra.mxu2 %v1846_v46  ;;  %v1894_v10 = vor.u32 %v2472_v3, %v1893_v2  ;;  %v2438_v11 = vld [vmem:[%s3855_s20 + $0x94] sm:$0xf0]  ;;  %v1821_v12 = vld [vmem:[%s3855_s20 + $0x110] sm:$0xf]  ;;  %v1685_v16 = vld [vmem:[%s3855_s20] sm:$0xf] }
  0x1d   :  { %502 = vmatpush.bf16.msra.mxu3 %v1910_v50  ;;  %v2454_v13 = vld [vmem:[%s3855_s20 + $0x114] sm:$0xf0]  ;;  %v1885_v14 = vld [vmem:[%s3855_s20 + $0x190] sm:$0xf]  ;;  %v2420_v18 = vld [vmem:[%s3855_s20 + $0x4] sm:$0xf0]  ;;  %v1758_v21 = vor.u32 %v2438_v11, %v1757_v9 }
  0x1e   :  { %464 = vmatpush.bf16.msra.mxu0 %v1710_v56  ;;  %v2470_v15 = vld [vmem:[%s3855_s20 + $0x194] sm:$0xf0]  ;;  %v1749_v19 = vld [vmem:[%s3855_s20 + $0x80] sm:$0xf]  ;;  %v2436_v20 = vld [vmem:[%s3855_s20 + $0x84] sm:$0xf0]  ;;  %v1822_v22 = vor.u32 %v2454_v13, %v1821_v12  ;;  %v1686_v33 = vor.u32 %v2420_v18, %v1685_v16 }
  0x1f   :  { %477 = vmatpush.bf16.msra.mxu1 %v1774_v57  ;;  %v1813_v23 = vld [vmem:[%s3855_s20 + $0x100] sm:$0xf]  ;;  %v2452_v24 = vld [vmem:[%s3855_s20 + $0x104] sm:$0xf0]  ;;  %v1886_v26 = vor.u32 %v2470_v15, %v1885_v14  ;;  %v2433_v28 = vld [vmem:[%s3855_s20 + $0x74] sm:$0xf]  ;;  %v1750_v36 = vor.u32 %v2436_v20, %v1749_v19 }
  0x20   :  { %490 = vmatpush.bf16.msra.mxu2 %v1838_v58  ;;  %v1877_v25 = vld [vmem:[%s3855_s20 + $0x180] sm:$0xf]  ;;  %v2468_v27 = vld [vmem:[%s3855_s20 + $0x184] sm:$0xf0]  ;;  %v1743_v29 = vld [vmem:[%s3855_s20 + $0x78] sm:$0xf0]  ;;  %v1814_v37 = vor.u32 %v2452_v24, %v1813_v23 }
  0x21   :  { %503 = vmatpush.bf16.msra.mxu3 %v1902_v62  ;;  %v2449_v30 = vld [vmem:[%s3855_s20 + $0xf4] sm:$0xf]  ;;  %v1807_v31 = vld [vmem:[%s3855_s20 + $0xf8] sm:$0xf0]  ;;  %v59_v32 = vld [vmem:[%s3856_s28] sm:$0xf]  ;;  %v1878_v40 = vor.u32 %v2468_v27, %v1877_v25  ;;  %v1746_v41 = vor.u32 %v2433_v28, %v1743_v29 }
  0x22   :  { %465 = vmatpush.bf16.msra.mxu0 %v1702_v4  ;;  %v2465_v34 = vld [vmem:[%s3855_s20 + $0x174] sm:$0xf]  ;;  %v1871_v35 = vld [vmem:[%s3855_s20 + $0x178] sm:$0xf0]  ;;  %131 = vst [vmem:[#allocation1] ss:$9 sm:$0xff] %v59_v32  ;;  %v1810_v42 = vor.u32 %v2449_v30, %v1807_v31 }
  0x23   :  { %478 = vmatpush.bf16.msra.mxu1 %v1766_v5  ;;  %v2481_v38 = vld [vmem:[%s3855_s20 + $0x1f4] sm:$0xf]  ;;  %v1935_v39 = vld [vmem:[%s3855_s20 + $0x1f8] sm:$0xf0]  ;;  %v1874_v43 = vor.u32 %v2465_v34, %v1871_v35  ;;  %v2431_v44 = vld [vmem:[%s3855_s20 + $0x64] sm:$0xf] }
  0x24   :  { %491 = vmatpush.bf16.msra.mxu2 %v1830_v6  ;;  %v1735_v45 = vld [vmem:[%s3855_s20 + $0x68] sm:$0xf0]  ;;  %v2447_v46 = vld [vmem:[%s3855_s20 + $0xe4] sm:$0xf]  ;;  %v1938_v47 = vor.u32 %v2481_v38, %v1935_v39  ;;  %v2429_v53 = vld [vmem:[%s3855_s20 + $0x54] sm:$0xf] }
  0x25   :  { %504 = vmatpush.bf16.msra.mxu3 %v1894_v10  ;;  %v1799_v48 = vld [vmem:[%s3855_s20 + $0xe8] sm:$0xf0]  ;;  %v2463_v49 = vld [vmem:[%s3855_s20 + $0x164] sm:$0xf]  ;;  %v1738_v54 = vor.u32 %v2431_v44, %v1735_v45  ;;  %v1727_v55 = vld [vmem:[%s3855_s20 + $0x58] sm:$0xf0] }
  0x26   :  { %466 = vmatpush.bf16.msra.mxu0 %v1694_v17  ;;  %v1863_v50 = vld [vmem:[%s3855_s20 + $0x168] sm:$0xf0]  ;;  %v2479_v51 = vld [vmem:[%s3855_s20 + $0x1e4] sm:$0xf]  ;;  %v2445_v56 = vld [vmem:[%s3855_s20 + $0xd4] sm:$0xf]  ;;  %v1802_v58 = vor.u32 %v2447_v46, %v1799_v48  ;;  %v1730_v5 = vor.u32 %v2429_v53, %v1727_v55 }
  0x27   :  { %479 = vmatpush.bf16.msra.mxu1 %v1758_v21  ;;  %v1927_v52 = vld [vmem:[%s3855_s20 + $0x1e8] sm:$0xf0]  ;;  %v1791_v57 = vld [vmem:[%s3855_s20 + $0xd8] sm:$0xf0]  ;;  %v1866_v59 = vor.u32 %v2463_v49, %v1863_v50  ;;  %v2461_v0 = vld [vmem:[%s3855_s20 + $0x154] sm:$0xf] }
  0x28   :  { %492 = vmatpush.bf16.msra.mxu2 %v1822_v22  ;;  %v1930_v63 = vor.u32 %v2479_v51, %v1927_v52  ;;  %v1855_v1 = vld [vmem:[%s3855_s20 + $0x158] sm:$0xf0]  ;;  %v2477_v3 = vld [vmem:[%s3855_s20 + $0x1d4] sm:$0xf]  ;;  %v1794_v6 = vor.u32 %v2445_v56, %v1791_v57  ;;  %v2427_v8 = vld [vmem:[%s3855_s20 + $0x44] sm:$0xf] }
  0x29   :  { %505 = vmatpush.bf16.msra.mxu3 %v1886_v26  ;;  %v3046_v60 = vld [vmem:[#allocation1 + $0x12] sm:$0xff]  ;;  %v3048_v61 = vld [vmem:[#allocation1] sm:$0xff]  ;;  %v3059_v2 = vld [vmem:[#allocation1 + $0x9] sm:$0xff]  ;;  %v1858_v7 = vor.u32 %v2461_v0, %v1855_v1 }
  0x2a   :  { %467 = vmatpush.bf16.msra.mxu0 %v1686_v33  ;;  %v3050_v62 = vld [vmem:[#allocation1 + $0x1b] sm:$0xff]  ;;  %v1719_v9 = vld [vmem:[%s3855_s20 + $0x48] sm:$0xf0]  ;;  %v2443_v10 = vld [vmem:[%s3855_s20 + $0xc4] sm:$0xf] }
  0x2b   :  { %480 = vmatpush.bf16.msra.mxu1 %v1750_v36  ;;  %v1919_v4 = vld [vmem:[%s3855_s20 + $0x1d8] sm:$0xf0]  ;;  %v1783_v12 = vld [vmem:[%s3855_s20 + $0xc8] sm:$0xf0]  ;;  %v2459_v13 = vld [vmem:[%s3855_s20 + $0x144] sm:$0xf]  ;;  %v1722_v17 = vor.u32 %v2427_v8, %v1719_v9 }
  0x2c   :  { %493 = vmatpush.bf16.msra.mxu2 %v1814_v37  ;;  %v1922_v11 = vor.u32 %v2477_v3, %v1919_v4  ;;  %v1847_v14 = vld [vmem:[%s3855_s20 + $0x148] sm:$0xf0]  ;;  %v2475_v15 = vld [vmem:[%s3855_s20 + $0x1c4] sm:$0xf]  ;;  %v1786_v18 = vor.u32 %v2443_v10, %v1783_v12  ;;  %v2425_v20 = vld [vmem:[%s3855_s20 + $0x34] sm:$0xf] }
  0x2d   :  { %506 = vmatpush.bf16.msra.mxu3 %v1878_v40  ;;  %468 = vmatmul.bf16.vlgmr.msra.gmra.mxu0 %v3048_v61  ;;  %v1911_v16 = vld [vmem:[%s3855_s20 + $0x1c8] sm:$0xf0]  ;;  %v1850_v19 = vor.u32 %v2459_v13, %v1847_v14  ;;  %v1711_v21 = vld [vmem:[%s3855_s20 + $0x38] sm:$0xf0]  ;;  %v2441_v22 = vld [vmem:[%s3855_s20 + $0xb4] sm:$0xf] }
  0x2e   :  { %512 = vmatpush.bf16.msrb.mxu0 %v1746_v41  ;;  %481 = vmatmul.bf16.vlgmr.msra.gmra.mxu1 %v3059_v2  ;;  %v1914_v23 = vor.u32 %v2475_v15, %v1911_v16  ;;  %v1775_v24 = vld [vmem:[%s3855_s20 + $0xb8] sm:$0xf0]  ;;  %v2457_v25 = vld [vmem:[%s3855_s20 + $0x134] sm:$0xf]  ;;  %v2423_v29 = vld [vmem:[%s3855_s20 + $0x24] sm:$0xf]  ;;  %v1714_v30 = vor.u32 %v2425_v20, %v1711_v21 }
  0x2f   :  { %525 = vmatpush.bf16.msrb.mxu1 %v1810_v42  ;;  %494 = vmatmul.bf16.vlgmr.msra.gmra.mxu2 %v3046_v60  ;;  %v1839_v26 = vld [vmem:[%s3855_s20 + $0x138] sm:$0xf0]  ;;  %v2473_v27 = vld [vmem:[%s3855_s20 + $0x1b4] sm:$0xf]  ;;  %v1703_v31 = vld [vmem:[%s3855_s20 + $0x28] sm:$0xf0]  ;;  %v1778_v34 = vor.u32 %v2441_v22, %v1775_v24 }
  0x30   :  { %538 = vmatpush.bf16.msrb.mxu2 %v1874_v43  ;;  %507 = vmatmul.bf16.vlgmr.msra.gmra.mxu3 %v3050_v62  ;;  %v1903_v28 = vld [vmem:[%s3855_s20 + $0x1b8] sm:$0xf0]  ;;  %v2439_v32 = vld [vmem:[%s3855_s20 + $0xa4] sm:$0xf]  ;;  %v1767_v33 = vld [vmem:[%s3855_s20 + $0xa8] sm:$0xf0]  ;;  %v1842_v35 = vor.u32 %v2457_v25, %v1839_v26 }
  0x31   :  { %551 = vmatpush.bf16.msrb.mxu3 %v1938_v47  ;;  %v2455_v36 = vld [vmem:[%s3855_s20 + $0x124] sm:$0xf]  ;;  %v1906_v37 = vor.u32 %v2473_v27, %v1903_v28  ;;  %v1831_v38 = vld [vmem:[%s3855_s20 + $0x128] sm:$0xf0] }
  0x32   :  { %513 = vmatpush.bf16.msrb.mxu0 %v1738_v54  ;;  %v2471_v39 = vld [vmem:[%s3855_s20 + $0x1a4] sm:$0xf]  ;;  %v1895_v40 = vld [vmem:[%s3855_s20 + $0x1a8] sm:$0xf0] }
  0x33   :  { %526 = vmatpush.bf16.msrb.mxu1 %v1802_v58 }
  0x34   :  { %539 = vmatpush.bf16.msrb.mxu2 %v1866_v59 }
  0x35   :  { %552 = vmatpush.bf16.msrb.mxu3 %v1930_v63 }
  0x36   :  { %514 = vmatpush.bf16.msrb.mxu0 %v1730_v5 }
  0x37   :  { %527 = vmatpush.bf16.msrb.mxu1 %v1794_v6 }
  0x38   :  { %540 = vmatpush.bf16.msrb.mxu2 %v1858_v7 }
  0x39   :  { %553 = vmatpush.bf16.msrb.mxu3 %v1922_v11 }
  0x3a   :  { %515 = vmatpush.bf16.msrb.mxu0 %v1722_v17 }
  0x3b   :  { %528 = vmatpush.bf16.msrb.mxu1 %v1786_v18 }
  0x3c   :  { %541 = vmatpush.bf16.msrb.mxu2 %v1850_v19 }
  0x3d   :  { %554 = vmatpush.bf16.msrb.mxu3 %v1914_v23 }
  0x3e   :  { %26 = vsyncpa [#allocation5], 0  ;;  %516 = vmatpush.bf16.msrb.mxu0 %v1714_v30  ;;  %v1706_v41 = vor.u32 %v2423_v29, %v1703_v31  ;;  %v1770_v42 = vor.u32 %v2439_v32, %v1767_v33  ;;  %v1834_v43 = vor.u32 %v2455_v36, %v1831_v38  ;;  %v2421_v44 = vld [vmem:[%s3855_s20 + $0x14] sm:$0xf]  ;;  %v1695_v45 = vld [vmem:[%s3855_s20 + $0x18] sm:$0xf0]  ;;  %v1898_v47 = vor.u32 %v2471_v39, %v1895_v40 }
  0x3f   :  { %529 = vmatpush.bf16.msrb.mxu1 %v1778_v34  ;;  %v2437_v46 = vld [vmem:[%s3855_s20 + $0x94] sm:$0xf]  ;;  %v1759_v48 = vld [vmem:[%s3855_s20 + $0x98] sm:$0xf0]  ;;  %v1698_v53 = vor.u32 %v2421_v44, %v1695_v45  ;;  %v2419_v56 = vld [vmem:[%s3855_s20 + $0x4] sm:$0xf] }
  0x40   :  { %542 = vmatpush.bf16.msrb.mxu2 %v1842_v35  ;;  %v2453_v49 = vld [vmem:[%s3855_s20 + $0x114] sm:$0xf]  ;;  %v1823_v50 = vld [vmem:[%s3855_s20 + $0x118] sm:$0xf0]  ;;  %v1762_v54 = vor.u32 %v2437_v46, %v1759_v48  ;;  %v1687_v57 = vld [vmem:[%s3855_s20 + $0x8] sm:$0xf0] }
  0x41   :  { %555 = vmatpush.bf16.msrb.mxu3 %v1906_v37  ;;  %v2469_v51 = vld [vmem:[%s3855_s20 + $0x194] sm:$0xf]  ;;  %v1887_v52 = vld [vmem:[%s3855_s20 + $0x198] sm:$0xf0]  ;;  %v1826_v55 = vor.u32 %v2453_v49, %v1823_v50  ;;  %v2435_v58 = vld [vmem:[%s3855_s20 + $0x84] sm:$0xf]  ;;  %v1690_v5 = vor.u32 %v2419_v56, %v1687_v57 }
  0x42   :  { %517 = vmatpush.bf16.msrb.mxu0 %v1706_v41  ;;  %v1890_v59 = vor.u32 %v2469_v51, %v1887_v52  ;;  %v1751_v63 = vld [vmem:[%s3855_s20 + $0x88] sm:$0xf0]  ;;  %v2451_v0 = vld [vmem:[%s3855_s20 + $0x104] sm:$0xf]  ;;  %v2490_v9 = vld [vmem:[%s3834_s4 + $0x38] sm:$0xff]  ;;  %s3857_s1 = sld [smem:[#allocation12_spill]] }
  0x43   :  { %530 = vmatpush.bf16.msrb.mxu1 %v1770_v42  ;;  %v1815_v1 = vld [vmem:[%s3855_s20 + $0x108] sm:$0xf0]  ;;  %v2467_v3 = vld [vmem:[%s3855_s20 + $0x184] sm:$0xf]  ;;  %v1754_v6 = vor.u32 %v2435_v58, %v1751_v63  ;;  %v2489_v10 = vld [vmem:[%s3834_s4 + $0x30] sm:$0xff]  ;;  %s3858_s3 = sld [smem:[#allocation10_spill]] }
  0x44   :  { %543 = vmatpush.bf16.msrb.mxu2 %v1834_v43  ;;  %v1879_v4 = vld [vmem:[%s3855_s20 + $0x188] sm:$0xf0]  ;;  %v1818_v7 = vor.u32 %v2451_v0, %v1815_v1  ;;  %v2487_v12 = vld [vmem:[%s3834_s4 + $0x20] sm:$0xff]  ;;  %v2497_v14 = vld [vmem:[%s3834_s4 + $0x70] sm:$0xff]  ;;  %s1641_s22 = sshll.u32 %s3847_s17, 4  ;;  %s2689_s2 = smov [#allocation2]   ;;  %s1642_s22 = int_to_ptr.hbm [resolvable:$true] %s1641_s22 }
  0x45   :  { %556 = vmatpush.bf16.msrb.mxu3 %v1898_v47  ;;  %v1882_v8 = vor.u32 %v2467_v3, %v1879_v4  ;;  %v2488_v11 = vld [vmem:[%s3834_s4 + $0x28] sm:$0xff]  ;;  %v2483_v13 = vld [vmem:[%s3834_s4] sm:$0xff]  ;;  %v2494_v18 = vld [vmem:[%s3834_s4 + $0x58] sm:$0xff]  ;;  %s1639_s23 = sshll.u32 %s2689_s2, 4  ;;  %s1663_s25 = sshll.u32 %s3849_s19, 4  ;;  %vm1617_vm0 = vcmask 1040384   ;;  %s1640_s23 = int_to_ptr.vmem [resolvable:$true] %s1639_s23  ;;  %s1664_s25 = int_to_ptr.hbm [resolvable:$true] %s1663_s25 }
  0x46   :  { %518 = vmatpush.bf16.msrb.mxu0 %v1698_v53  ;;  %v2496_v15 = vld [vmem:[%s3834_s4 + $0x68] sm:$0xff]  ;;  %v2495_v16 = vld [vmem:[%s3834_s4 + $0x60] sm:$0xff]  ;;  %v2493_v20 = vld [vmem:[%s3834_s4 + $0x50] sm:$0xff]  ;;  %vm1621_vm1 = vcmask 1042434   ;;  %vm1625_vm2 = vcmask 1041408  }
  0x47   :  { %531 = vmatpush.bf16.msrb.mxu1 %v1762_v54  ;;  %v2492_v25 = vld [vmem:[%s3834_s4 + $0x48] sm:$0xff]  ;;  %v2491_v31 = vld [vmem:[%s3834_s4 + $0x40] sm:$0xff]  ;;  %v2506_v35 = vld [vmem:[%s3836_s6 + $0x38] sm:$0xff] }
  0x48   :  { %544 = vmatpush.bf16.msrb.mxu2 %v1826_v55  ;;  %v124_v17 = vld [vmem:[%s3857_s1] sm:$0x3]  ;;  %v2514_v36 = vld [vmem:[%s3838_s8 + $0x38] sm:$0xff]  ;;  %v2505_v54 = vld [vmem:[%s3836_s6 + $0x30] sm:$0xff] }
  0x49   :  { %557 = vmatpush.bf16.msrb.mxu3 %v1890_v59  ;;  %v126_v19 = vperm.slane %v124_v17, 0  ;;  %v127_v39 = vperm.slane %v124_v17, 1  ;;  %v2513_v55 = vld [vmem:[%s3838_s8 + $0x30] sm:$0xff]  ;;  %v2504_v56 = vld [vmem:[%s3836_s6 + $0x28] sm:$0xff]  ;;  %v2503_v58 = vld [vmem:[%s3836_s6 + $0x20] sm:$0xff] }
  0x4a   :  { %519 = vmatpush.bf16.msrb.mxu0 %v1690_v5  ;;  %v2512_v57 = vld [vmem:[%s3838_s8 + $0x28] sm:$0xff]  ;;  %v2511_v59 = vld [vmem:[%s3838_s8 + $0x20] sm:$0xff]  ;;  %v2502_v63 = vld [vmem:[%s3836_s6 + $0x18] sm:$0xff] }
  0x4b   :  { %532 = vmatpush.bf16.msrb.mxu1 %v1754_v6  ;;  %v2510_v0 = vld [vmem:[%s3838_s8 + $0x18] sm:$0xff]  ;;  %v2501_v1 = vld [vmem:[%s3836_s6 + $0x10] sm:$0xff]  ;;  %v2500_v4 = vld [vmem:[%s3836_s6 + $0x8] sm:$0xff] }
  0x4c   :  { %545 = vmatpush.bf16.msrb.mxu2 %v1818_v7  ;;  %v2509_v3 = vld [vmem:[%s3838_s8 + $0x10] sm:$0xff]  ;;  %v2508_v5 = vld [vmem:[%s3838_s8 + $0x8] sm:$0xff]  ;;  %v2499_v6 = vld [vmem:[%s3836_s6] sm:$0xff] }
  0x4d   :  { %558 = vmatpush.bf16.msrb.mxu3 %v1882_v8  ;;  %520 = vmatmul.bf16.vlgmr.msrb.gmra.mxu0 %v3048_v61  ;;  %v2486_v61 = vld [vmem:[%s3834_s4 + $0x18] sm:$0xff]  ;;  %v2507_v7 = vld [vmem:[%s3838_s8] sm:$0xff]  ;;  %v2517_v17 = vld [vmem:[%s3840_s10 + $0x10] sm:$0xff] }
  0x4e   :  { %700 = vmatpush.bf16.msra.mxu0 %v2490_v9  ;;  %533 = vmatmul.bf16.vlgmr.msrb.gmra.mxu1 %v3059_v2  ;;  %v2498_v2 = vld [vmem:[%s3834_s4 + $0x78] sm:$0xff] }
  0x4f   :  { %546 = vmatmul.bf16.vlgmr.msrb.gmra.mxu2 %v3046_v60  ;;  %v2485_v60 = vld [vmem:[%s3834_s4 + $0x10] sm:$0xff]  ;;  %713 = vmatpush.bf16.msra.mxu1 %v2498_v2  ;;  %v2522_v9 = vld [vmem:[%s3840_s10 + $0x38] sm:$0xff] }
  0x50   :  { %559 = vmatmul.bf16.vlgmr.msrb.gmra.mxu3 %v3050_v62  ;;  %v2484_v62 = vld [vmem:[%s3834_s4 + $0x8] sm:$0xff]  ;;  %847 = vmatpush.bf16.msra.mxu2 %v2506_v35  ;;  %v2143_v35 = vld [vmem:[%s3842_s12 + $0x58] sm:$0xf0] }
  0x51   :  { %911 = vmatpush.bf16.msra.mxu3 %v2514_v36 }
  0x52   :  { %701 = vmatpush.bf16.msra.mxu0 %v2489_v10 }
  0x53   :  { %714 = vmatpush.bf16.msra.mxu1 %v2497_v14 }
  0x54   :  { %848 = vmatpush.bf16.msra.mxu2 %v2505_v54 }
  0x55   :  { %912 = vmatpush.bf16.msra.mxu3 %v2513_v55 }
  0x56   :  { %702 = vmatpush.bf16.msra.mxu0 %v2488_v11  ;;  %v2521_v11 = vld [vmem:[%s3840_s10 + $0x30] sm:$0xff] }
  0x57   :  { %715 = vmatpush.bf16.msra.mxu1 %v2496_v15  ;;  %v2519_v15 = vld [vmem:[%s3840_s10 + $0x20] sm:$0xff] }
  0x58   :  { %849 = vmatpush.bf16.msra.mxu2 %v2504_v56 }
  0x59   :  { %913 = vmatpush.bf16.msra.mxu3 %v2512_v57  ;;  %v2117_v57 = vld [vmem:[%s3842_s12 + $0x20] sm:$0xf] }
  0x5a   :  { %703 = vmatpush.bf16.msra.mxu0 %v2487_v12  ;;  %v2520_v12 = vld [vmem:[%s3840_s10 + $0x28] sm:$0xff] }
  0x5b   :  { %716 = vmatpush.bf16.msra.mxu1 %v2495_v16  ;;  %v2518_v16 = vld [vmem:[%s3840_s10 + $0x18] sm:$0xff] }
  0x5c   :  { %850 = vmatpush.bf16.msra.mxu2 %v2503_v58  ;;  %v2528_v58 = vld [vmem:[%s3842_s12 + $0x24] sm:$0xf0] }
  0x5d   :  { %914 = vmatpush.bf16.msra.mxu3 %v2511_v59 }
  0x5e   :  { %704 = vmatpush.bf16.msra.mxu0 %v2486_v61  ;;  %v2606_v61 = vld [vmem:[%s3835_s5] ss:$0 sm:$0xff] }
  0x5f   :  { %717 = vmatpush.bf16.msra.mxu1 %v2494_v18  ;;  %v2516_v18 = vld [vmem:[%s3840_s10 + $0x8] sm:$0xff] }
  0x60   :  { %851 = vmatpush.bf16.msra.mxu2 %v2502_v63  ;;  %v2527_v63 = vld [vmem:[%s3842_s12 + $0x24] sm:$0xf] }
  0x61   :  { %915 = vmatpush.bf16.msra.mxu3 %v2510_v0  ;;  %v2119_v0 = vld [vmem:[%s3842_s12 + $0x28] sm:$0xf0] }
  0x62   :  { %705 = vmatpush.bf16.msra.mxu0 %v2485_v60 }
  0x63   :  { %718 = vmatpush.bf16.msra.mxu1 %v2493_v20  ;;  %v2157_v20 = vld [vmem:[%s3842_s12 + $0x70] sm:$0xf] }
  0x64   :  { %852 = vmatpush.bf16.msra.mxu2 %v2501_v1  ;;  %v2118_v1 = vor.u32 %v2528_v58, %v2117_v57 }
  0x65   :  { %916 = vmatpush.bf16.msra.mxu3 %v2509_v3 }
  0x66   :  { %706 = vmatpush.bf16.msra.mxu0 %v2484_v62 }
  0x67   :  { %719 = vmatpush.bf16.msra.mxu1 %v2492_v25  ;;  %v2149_v25 = vld [vmem:[%s3842_s12 + $0x60] sm:$0xf] }
  0x68   :  { %853 = vmatpush.bf16.msra.mxu2 %v2500_v4 }
  0x69   :  { %917 = vmatpush.bf16.msra.mxu3 %v2508_v5  ;;  %v2122_v5 = vor.u32 %v2527_v63, %v2119_v0  ;;  %v2589_v0 = vld [vmem:[%s3844_s14 + $0x18c] sm:$0xf0] }
  0x6a   :  { %707 = vmatpush.bf16.msra.mxu0 %v2483_v13 }
  0x6b   :  { %720 = vmatpush.bf16.msra.mxu1 %v2491_v31 }
  0x6c   :  { %854 = vmatpush.bf16.msra.mxu2 %v2499_v6  ;;  %v2109_v6 = vld [vmem:[%s3842_s12 + $0x10] sm:$0xf] }
  0x6d   :  { %918 = vmatpush.bf16.msra.mxu3 %v2507_v7  ;;  %v2526_v7 = vld [vmem:[%s3842_s12 + $0x14] sm:$0xf0] }
  0x6e   :  { %981 = vmatpush.bf16.msrb.mxu0 %v2522_v9  ;;  %v2111_v9 = vld [vmem:[%s3842_s12 + $0x18] sm:$0xf0] }
  0x72   :  { %982 = vmatpush.bf16.msrb.mxu0 %v2521_v11  ;;  %v2110_v11 = vor.u32 %v2526_v7, %v2109_v6  ;;  %v2553_v6 = vld [vmem:[%s3844_s14 + $0x6c] sm:$0xf0]  ;;  %v2551_v7 = vld [vmem:[%s3844_s14 + $0x64] sm:$0xf] }
  0x76   :  { %983 = vmatpush.bf16.msrb.mxu0 %v2520_v12 }
  0x7a   :  { %984 = vmatpush.bf16.msrb.mxu0 %v2519_v15  ;;  %v2523_v15 = vld [vmem:[%s3842_s12 + $0x4] sm:$0xf] }
  0x7e   :  { %985 = vmatpush.bf16.msrb.mxu0 %v2518_v16 }
  0x82   :  { %986 = vmatpush.bf16.msrb.mxu0 %v2517_v17  ;;  %v2103_v17 = vld [vmem:[%s3842_s12 + $0x8] sm:$0xf0] }
  0x86   :  { %987 = vmatpush.bf16.msrb.mxu0 %v2516_v18  ;;  %v2106_v18 = vor.u32 %v2523_v15, %v2103_v17  ;;  %v2547_v15 = vld [vmem:[%s3844_s14 + $0x44] sm:$0xf] }
  0xaa   :  { %v469_v21 = vpop.f32.mrf.mxu0 }
  0xab   :  { %v470_v22 = vadd.f32 %v469_v21, %v126_v19  ;;  %v482_v23 = vpop.f32.mrf.mxu1  ;;  %v2515_v19 = vld [vmem:[%s3840_s10] sm:$0xff]  ;;  %v2538_v21 = vld [vmem:[%s3842_s12 + $0x74] sm:$0xf0]  ;;  %s1652_s10 = sshll.u32 %s3848_s18, 4  ;;  %s1653_s10 = int_to_ptr.hbm [resolvable:$true] %s1652_s10 }
  0xac   :  { %988 = vmatpush.bf16.msrb.mxu0 %v2515_v19  ;;  %v2277_v19 = vld [vmem:[%s3844_s14 + $0xe0] sm:$0xf] }
  0xad   :  { %v483_v24 = vadd.f32 %v482_v23, %v470_v22  ;;  %v2537_v22 = vld [vmem:[%s3842_s12 + $0x74] sm:$0xf]  ;;  %v2158_v23 = vor.u32 %v2538_v21, %v2157_v20  ;;  %v2569_v20 = vld [vmem:[%s3844_s14 + $0xec] sm:$0xf0]  ;;  %v2567_v21 = vld [vmem:[%s3844_s14 + $0xe4] sm:$0xf] }
  0xaf   :  { %1080 = vmatpush.bf16.msrb.mxu1 %v2158_v23  ;;  %v2279_v23 = vld [vmem:[%s3844_s14 + $0xf0] sm:$0xf0] }
  0xb2   :  { %v495_v26 = vpop.f32.mrf.mxu2  ;;  %v471_v30 = vpop.f32.mrf.mxu0 }
  0xb3   :  { %v496_v27 = vadd.f32 %v495_v26, %v483_v24  ;;  %v508_v28 = vpop.f32.mrf.mxu3  ;;  %v484_v32 = vpop.f32.mrf.mxu1  ;;  %v2159_v24 = vld [vmem:[%s3842_s12 + $0x78] sm:$0xf0]  ;;  %v2536_v26 = vld [vmem:[%s3842_s12 + $0x64] sm:$0xf0] }
  0xb4   :  { %v2150_v30 = vor.u32 %v2536_v26, %v2149_v25  ;;  %v2141_v32 = vld [vmem:[%s3842_s12 + $0x50] sm:$0xf]  ;;  %v2282_v26 = vor.u32 %v2567_v21, %v2279_v23  ;;  %v2327_v23 = vld [vmem:[%s3844_s14 + $0x150] sm:$0xf0] }
  0xb5   :  { %v509_v29 = vadd.f32 %v508_v28, %v496_v27  ;;  %v2162_v27 = vor.u32 %v2537_v22, %v2159_v24  ;;  %v2535_v28 = vld [vmem:[%s3842_s12 + $0x64] sm:$0xf]  ;;  %v2278_v22 = vor.u32 %v2569_v20, %v2277_v19  ;;  %v2261_v24 = vld [vmem:[%s3844_s14 + $0xc0] sm:$0xf]  ;;  %v2565_v25 = vld [vmem:[%s3844_s14 + $0xcc] sm:$0xf0] }
  0xb6   :  { %1081 = vmatpush.bf16.msrb.mxu1 %v2150_v30  ;;  %v2262_v30 = vor.u32 %v2565_v25, %v2261_v24  ;;  %v2325_v19 = vld [vmem:[%s3844_s14 + $0x140] sm:$0xf]  ;;  %v2581_v21 = vld [vmem:[%s3844_s14 + $0x14c] sm:$0xf0] }
  0xb7   :  { %v564_v33 = vmax.f32 %v509_v29, 0.0  ;;  %v2151_v29 = vld [vmem:[%s3842_s12 + $0x68] sm:$0xf0]  ;;  %1093 = vmatpush.bf16.msrb.mxu2 %v2162_v27  ;;  %v2563_v27 = vld [vmem:[%s3844_s14 + $0xc4] sm:$0xf]  ;;  %1502 = vmatpush.bf16.msrb.mxu3 %v2278_v22 }
  0xb8   :  { %v2154_v31 = vor.u32 %v2535_v28, %v2151_v29  ;;  %v2263_v28 = vld [vmem:[%s3844_s14 + $0xd0] sm:$0xf0]  ;;  %v2405_v29 = vld [vmem:[%s3844_s14 + $0x1e0] sm:$0xf]  ;;  %v2579_v22 = vld [vmem:[%s3844_s14 + $0x144] sm:$0xf] }
  0xb9   :  { %v566_v34 = vpack.c.bf16 %v564_v33, %v564_v33  ;;  %v2534_v33 = vld [vmem:[%s3842_s12 + $0x54] sm:$0xf0]  ;;  %v2181_v25 = vld [vmem:[%s3844_s14 + $0x20] sm:$0xf] }
  0xba   :  { %v497_v37 = vpop.f32.mrf.mxu2  ;;  %v2142_v36 = vor.u32 %v2534_v33, %v2141_v32  ;;  %v2599_v32 = vld [vmem:[%s3844_s14 + $0x1e4] sm:$0xf]  ;;  %v2407_v33 = vld [vmem:[%s3844_s14 + $0x1f0] sm:$0xf0] }
  0xbb   :  { %708 = vmatmul.bf16.vlgmr.msra.gmra.mxu0 %v566_v34  ;;  %v510_v38 = vpop.f32.mrf.mxu3  ;;  %v2533_v34 = vld [vmem:[%s3842_s12 + $0x54] sm:$0xf]  ;;  %v2607_v37 = vld [vmem:[%s3837_s7] ss:$0 sm:$0xff]  ;;  %1094 = vmatpush.bf16.msrb.mxu2 %v2154_v31  ;;  %v2601_v31 = vld [vmem:[%s3844_s14 + $0x1ec] sm:$0xf0] }
  0xbc   :  { %v2146_v38 = vor.u32 %v2533_v34, %v2143_v35  ;;  %1082 = vmatpush.bf16.msrb.mxu1 %v2142_v36  ;;  %v2266_v34 = vor.u32 %v2563_v27, %v2263_v28  ;;  %v2406_v35 = vor.u32 %v2601_v31, %v2405_v29  ;;  %v2410_v36 = vor.u32 %v2599_v32, %v2407_v33  ;;  %v2609_v27 = vld [vmem:[%s3841_s11] ss:$0 sm:$0xff]  ;;  %v2543_v28 = vld [vmem:[%s3844_s14 + $0x24] sm:$0xf]  ;;  %v2183_v29 = vld [vmem:[%s3844_s14 + $0x30] sm:$0xf0] }
  0xbd   :  { %1503 = vmatpush.bf16.msrb.mxu3 %v2262_v30  ;;  %v2326_v30 = vor.u32 %v2581_v21, %v2325_v19  ;;  %v2330_v31 = vor.u32 %v2579_v22, %v2327_v23  ;;  %v2165_v32 = vld [vmem:[%s3844_s14] sm:$0xf]  ;;  %v2237_v22 = vld [vmem:[%s3844_s14 + $0x88] sm:$0xf]  ;;  %v2558_v23 = vld [vmem:[%s3844_s14 + $0x94] sm:$0xf0] }
  0xbe   :  { %1515 = vmatpush.bf16.msra.mxu0 %v2406_v35  ;;  %v2309_v33 = vld [vmem:[%s3844_s14 + $0x120] sm:$0xf]  ;;  %v2577_v35 = vld [vmem:[%s3844_s14 + $0x12c] sm:$0xf0] }
  0xbf   :  { %1095 = vmatpush.bf16.msrb.mxu2 %v2146_v38  ;;  %v2561_v38 = vld [vmem:[%s3844_s14 + $0xac] sm:$0xf0] }
  0xca   :  { %v521_v40 = vpop.f32.mrf.mxu0 }
  0xcb   :  { %v522_v41 = vadd.f32 %v521_v40, %v127_v39  ;;  %v534_v42 = vpop.f32.mrf.mxu1  ;;  %v2133_v39 = vld [vmem:[%s3842_s12 + $0x40] sm:$0xf]  ;;  %v2532_v40 = vld [vmem:[%s3842_s12 + $0x44] sm:$0xf0] }
  0xcd   :  { %v535_v43 = vadd.f32 %v534_v42, %v522_v41  ;;  %v2608_v41 = vld [vmem:[%s3839_s9] ss:$0 sm:$0xff]  ;;  %v2531_v42 = vld [vmem:[%s3842_s12 + $0x44] sm:$0xf] }
  0xd2   :  { %v547_v44 = vpop.f32.mrf.mxu2  ;;  %v523_v47 = vpop.f32.mrf.mxu0 }
  0xd3   :  { %v548_v45 = vadd.f32 %v547_v44, %v535_v43  ;;  %v560_v46 = vpop.f32.mrf.mxu3  ;;  %v536_v48 = vpop.f32.mrf.mxu1  ;;  %v2135_v43 = vld [vmem:[%s3842_s12 + $0x48] sm:$0xf0]  ;;  %v2134_v44 = vor.u32 %v2532_v40, %v2133_v39  ;;  %v2559_v39 = vld [vmem:[%s3844_s14 + $0xa4] sm:$0xf]  ;;  %v2247_v40 = vld [vmem:[%s3844_s14 + $0xb0] sm:$0xf0] }
  0xd4   :  { %v2138_v47 = vor.u32 %v2531_v42, %v2135_v43  ;;  %v2125_v48 = vld [vmem:[%s3842_s12 + $0x30] sm:$0xf] }
  0xd5   :  { %v561_v49 = vadd.f32 %v560_v46, %v548_v45  ;;  %1083 = vmatpush.bf16.msrb.mxu1 %v2134_v44  ;;  %v2597_v42 = vld [vmem:[%s3844_s14 + $0x1cc] sm:$0xf0]  ;;  %v2595_v44 = vld [vmem:[%s3844_s14 + $0x1c4] sm:$0xf] }
  0xd6   :  { %1096 = vmatpush.bf16.msrb.mxu2 %v2138_v47 }
  0xd7   :  { %v565_v50 = vmax.f32 %v561_v49, 0.0  ;;  %v2530_v49 = vld [vmem:[%s3842_s12 + $0x34] sm:$0xf0] }
  0xd8   :  { %v2126_v55 = vor.u32 %v2530_v49, %v2125_v48  ;;  %v2229_v48 = vld [vmem:[%s3844_s14 + $0x80] sm:$0xf]  ;;  %v2557_v49 = vld [vmem:[%s3844_s14 + $0x8c] sm:$0xf0] }
  0xd9   :  { %v567_v51 = vpack.c.bf16 %v565_v50, %v565_v50  ;;  %v2230_v63 = vor.u32 %v2557_v49, %v2229_v48  ;;  %v2310_v48 = vor.u32 %v2577_v35, %v2309_v33  ;;  %v2554_v35 = vld [vmem:[%s3844_s14 + $0x74] sm:$0xf0] }
  0xda   :  { %v549_v52 = vpop.f32.mrf.mxu2  ;;  %1084 = vmatpush.bf16.msrb.mxu1 %v2126_v55  ;;  %v2231_v55 = vld [vmem:[%s3844_s14 + $0x90] sm:$0xf0] }
  0xdb   :  { %v562_v53 = vpop.f32.mrf.mxu3  ;;  %721 = vmatmul.bf16.vlgmr.msra.gmra.mxu1 %v567_v51  ;;  %v2529_v52 = vld [vmem:[%s3842_s12 + $0x34] sm:$0xf] }
  0xdc   :  { %v2127_v53 = vld [vmem:[%s3842_s12 + $0x38] sm:$0xf0] }
  0xdd   :  { %v2130_v56 = vor.u32 %v2529_v52, %v2127_v53  ;;  %v2593_v52 = vld [vmem:[%s3844_s14 + $0x1ac] sm:$0xf0]  ;;  %v2591_v53 = vld [vmem:[%s3844_s14 + $0x1a4] sm:$0xf] }
  0xde   :  { %1085 = vmatpush.bf16.msrb.mxu1 %v2118_v1  ;;  %v2587_v1 = vld [vmem:[%s3844_s14 + $0x184] sm:$0xf] }
  0xdf   :  { %1097 = vmatpush.bf16.msrb.mxu2 %v2130_v56  ;;  %v2375_v56 = vld [vmem:[%s3844_s14 + $0x1b0] sm:$0xf0] }
  0xe0   :  { %v2378_v58 = vor.u32 %v2591_v53, %v2375_v56  ;;  %v2413_v56 = vld [vmem:[%s3844_s14 + $0x1e8] sm:$0xf] }
  0xe2   :  { %1086 = vmatpush.bf16.msrb.mxu1 %v2110_v11  ;;  %v2341_v11 = vld [vmem:[%s3844_s14 + $0x160] sm:$0xf] }
  0xe3   :  { %1098 = vmatpush.bf16.msrb.mxu2 %v2122_v5  ;;  %v2213_v5 = vld [vmem:[%s3844_s14 + $0x60] sm:$0xf] }
 0x138   :  { %v709_v8 = vpop.f32.mrf.mxu0 }
 0x139   :  { %v710_v60 = vadd.f32 %v2606_v61, %v709_v8  ;;  %v2525_v8 = vld [vmem:[%s3842_s12 + $0x14] sm:$0xf] }
 0x13a   :  { %v2114_v12 = vor.u32 %v2525_v8, %v2111_v9  ;;  %v2215_v8 = vld [vmem:[%s3844_s14 + $0x70] sm:$0xf0] }
 0x13c   :  { %1099 = vmatpush.bf16.msrb.mxu2 %v2114_v12  ;;  %v2214_v12 = vor.u32 %v2553_v6, %v2213_v5  ;;  %v2564_v5 = vld [vmem:[%s3844_s14 + $0xcc] sm:$0xf]  ;;  %v2271_v6 = vld [vmem:[%s3844_s14 + $0xd8] sm:$0xf0] }
 0x140   :  { %v711_v10 = vpop.f32.mrf.mxu0  ;;  %1100 = vmatpush.bf16.msrb.mxu2 %v2106_v18 }
 0x141   :  { %v726_v10 = vld [vmem:[%s3858_s3] sm:$0x3] }
 0x158   :  { %v722_v62 = vpop.f32.mrf.mxu1 }
 0x159   :  { %v723_v2 = vadd.f32 %v722_v62, %v710_v60 }
 0x15b   :  { %v795_v13 = vpack.c.bf16 %v723_v2, %v723_v2 }
 0x15d   :  { %855 = vmatmul.bf16.vlgmr.msra.gmra.mxu2 %v795_v13  ;;  %919 = vmatmul.bf16.vlgmr.msra.gmra.mxu3 %v795_v13  ;;  %v2101_v13 = vld [vmem:[%s3842_s12] sm:$0xf] }
 0x15e   :  { %1541 = vmatpush.bf16.msra.mxu2 %v2410_v36  ;;  %v2575_v36 = vld [vmem:[%s3844_s14 + $0x124] sm:$0xf] }
 0x160   :  { %v724_v14 = vpop.f32.mrf.mxu1 }
 0x161   :  { %v2524_v14 = vld [vmem:[%s3842_s12 + $0x4] sm:$0xf0]  ;;  %s2690_s12 = smov [#allocation6]  }
 0x162   :  { %v2102_v16 = vor.u32 %v2524_v14, %v2101_v13  ;;  %v2197_v13 = vld [vmem:[%s3844_s14 + $0x40] sm:$0xf]  ;;  %v2549_v14 = vld [vmem:[%s3844_s14 + $0x4c] sm:$0xf0]  ;;  %s1661_s7 = sshll.u32 %s2690_s12, 4  ;;  %s1662_s7 = int_to_ptr.vmem [resolvable:$true] %s1661_s7 }
 0x163   :  { %v2198_v20 = vor.u32 %v2549_v14, %v2197_v13  ;;  %v2255_v13 = vld [vmem:[%s3844_s14 + $0xb8] sm:$0xf0] }
 0x164   :  { %1087 = vmatpush.bf16.msrb.mxu1 %v2102_v16  ;;  %v2199_v16 = vld [vmem:[%s3844_s14 + $0x50] sm:$0xf0] }
 0x165   :  { %v2202_v24 = vor.u32 %v2547_v15, %v2199_v16  ;;  %v2397_v16 = vld [vmem:[%s3844_s14 + $0x1c8] sm:$0xf] }
 0x168   :  { %1528 = vmatpush.bf16.msra.mxu1 %v2282_v26  ;;  %v2545_v26 = vld [vmem:[%s3844_s14 + $0x2c] sm:$0xf0] }
 0x16c   :  { %1529 = vmatpush.bf16.msra.mxu1 %v2266_v34  ;;  %v2182_v34 = vor.u32 %v2545_v26, %v2181_v25  ;;  %v2238_v25 = vor.u32 %v2558_v23, %v2237_v22  ;;  %v2239_v26 = vld [vmem:[%s3844_s14 + $0x98] sm:$0xf0] }
 0x16d   :  { %v2303_v22 = vld [vmem:[%s3844_s14 + $0x118] sm:$0xf0] }
 0x1e0   :  { %v856_v45 = vpop.f32.mrf.mxu2  ;;  %v920_v46 = vpop.f32.mrf.mxu3 }
 0x1e1   :  { %v857_v50 = vadd.f32 %v2607_v37, %v856_v45  ;;  %v921_v51 = vadd.f32 %v2608_v41, %v920_v46  ;;  %v2245_v37 = vld [vmem:[%s3844_s14 + $0xa0] sm:$0xf]  ;;  %v2391_v45 = vld [vmem:[%s3844_s14 + $0x1d0] sm:$0xf0] }
 0x1e2   :  { %v2389_v41 = vld [vmem:[%s3844_s14 + $0x1c0] sm:$0xf]  ;;  %v2246_v46 = vor.u32 %v2561_v38, %v2245_v37  ;;  %v2394_v47 = vor.u32 %v2595_v44, %v2391_v45  ;;  %v2311_v37 = vld [vmem:[%s3844_s14 + $0x130] sm:$0xf0]  ;;  %v2285_v44 = vld [vmem:[%s3844_s14 + $0xe8] sm:$0xf] }
 0x1e3   :  { %1629 = vst [vmem:[#allocation2] sm:$0x3] %v857_v50  ;;  %v924_v54 = vmul.f32 0.5, %v921_v51  ;;  %v2390_v43 = vor.u32 %v2597_v42, %v2389_v41  ;;  %v2539_v41 = vld [vmem:[%s3844_s14 + $0x4] sm:$0xf]  ;;  %v2314_v49 = vor.u32 %v2575_v36, %v2311_v37 }
 0x1e4   :  { %1630 = vst [vmem:[#allocation4] sm:$0x3] %v921_v51  ;;  %v2373_v51 = vld [vmem:[%s3844_s14 + $0x1a0] sm:$0xf]  ;;  %1542 = vmatpush.bf16.msra.mxu2 %v2394_v47  ;;  %1504 = vmatpush.bf16.msrb.mxu3 %v2246_v46  ;;  %v2167_v42 = vld [vmem:[%s3844_s14 + $0x10] sm:$0xf0] }
 0x1e5   :  { %v925_v59 = vmul.f32 1.442695, %v924_v54  ;;  %v2555_v54 = vld [vmem:[%s3844_s14 + $0x84] sm:$0xf]  ;;  %1516 = vmatpush.bf16.msra.mxu0 %v2390_v43  ;;  %v2374_v57 = vor.u32 %v2593_v52, %v2373_v51  ;;  %v2570_v45 = vld [vmem:[%s3844_s14 + $0xf4] sm:$0xf0] }
 0x1e6   :  { %v2568_v46 = vld [vmem:[%s3844_s14 + $0xec] sm:$0xf]  ;;  %v2287_v47 = vld [vmem:[%s3844_s14 + $0xf8] sm:$0xf0]  ;;  %v2573_v51 = vld [vmem:[%s3844_s14 + $0x10c] sm:$0xf0] }
 0x1e7   :  { %2610 = vpow2.f32 %v925_v59  ;;  %v2357_v59 = vld [vmem:[%s3844_s14 + $0x180] sm:$0xf]  ;;  %v2552_v36 = vld [vmem:[%s3844_s14 + $0x6c] sm:$0xf]  ;;  %1644 = dma.vmem_to_hbm [thread:$0]  %s1640_s23, 32, %s1642_s22, [#allocation3]  }
 0x1e8   :  { %v858_v3 = vpop.f32.mrf.mxu2  ;;  %v922_v4 = vpop.f32.mrf.mxu3  ;;  %1543 = vmatpush.bf16.msra.mxu2 %v2378_v58  ;;  %v2358_v9 = vor.u32 %v2589_v0, %v2357_v59  ;;  %1505 = vmatpush.bf16.msrb.mxu3 %v2230_v63  ;;  %v2286_v58 = vor.u32 %v2570_v45, %v2285_v44  ;;  %v2602_v59 = vld [vmem:[%s3844_s14 + $0x1f4] sm:$0xf0]  ;;  %v2600_v63 = vld [vmem:[%s3844_s14 + $0x1ec] sm:$0xf]  ;;  %v2415_v0 = vld [vmem:[%s3844_s14 + $0x1f8] sm:$0xf0] }
 0x1e9   :  { %v2359_v3 = vld [vmem:[%s3844_s14 + $0x190] sm:$0xf0]  ;;  %v2234_v4 = vor.u32 %v2555_v54, %v2231_v55  ;;  %1517 = vmatpush.bf16.msra.mxu0 %v2374_v57  ;;  %v2571_v54 = vld [vmem:[%s3844_s14 + $0x104] sm:$0xf]  ;;  %v2170_v57 = vor.u32 %v2539_v41, %v2167_v42  ;;  %v2590_v41 = vld [vmem:[%s3844_s14 + $0x194] sm:$0xf0] }
 0x1ea   :  { %v2295_v55 = vld [vmem:[%s3844_s14 + $0x110] sm:$0xf0]  ;;  %v2588_v42 = vld [vmem:[%s3844_s14 + $0x18c] sm:$0xf]  ;;  %v2367_v44 = vld [vmem:[%s3844_s14 + $0x198] sm:$0xf0] }
 0x1eb   :  { %v2370_v45 = vor.u32 %v2588_v42, %v2367_v44 }
 0x1ec   :  { %1506 = vmatpush.bf16.msrb.mxu3 %v2214_v12 }
 0x1ed   :  { %v2611_v61 = vpop.eup %2610  ;;  %1518 = vmatpush.bf16.msra.mxu0 %v2358_v9  ;;  %v2414_v9 = vor.u32 %v2602_v59, %v2413_v56  ;;  %v2351_v56 = vld [vmem:[%s3844_s14 + $0x178] sm:$0xf0]  ;;  %v2546_v59 = vld [vmem:[%s3844_s14 + $0x34] sm:$0xf0] }
 0x1ee   :  { %v927_v60 = vmul.f32 %v2611_v61, %v726_v10  ;;  %v2362_v10 = vor.u32 %v2587_v1, %v2359_v3  ;;  %v2585_v61 = vld [vmem:[%s3844_s14 + $0x16c] sm:$0xf0]  ;;  %v2290_v1 = vor.u32 %v2568_v46, %v2287_v47  ;;  %v2269_v3 = vld [vmem:[%s3844_s14 + $0xc8] sm:$0xf]  ;;  %v2550_v47 = vld [vmem:[%s3844_s14 + $0x54] sm:$0xf0] }
 0x1ef   :  { %v2342_v17 = vor.u32 %v2585_v61, %v2341_v11  ;;  %v2274_v61 = vor.u32 %v2564_v5, %v2271_v6  ;;  %v2205_v46 = vld [vmem:[%s3844_s14 + $0x48] sm:$0xf]  ;;  %v2582_v5 = vld [vmem:[%s3844_s14 + $0x154] sm:$0xf0]  ;;  %v2580_v6 = vld [vmem:[%s3844_s14 + $0x14c] sm:$0xf] }
 0x1f0   :  { %v928_v62 = vadd.f32 %v927_v60, %v857_v50  ;;  %v2250_v50 = vor.u32 %v2559_v39, %v2247_v40  ;;  %v2583_v60 = vld [vmem:[%s3844_s14 + $0x164] sm:$0xf]  ;;  %1544 = vmatpush.bf16.msra.mxu2 %v2362_v10  ;;  %1507 = vmatpush.bf16.msrb.mxu3 %v2198_v20  ;;  %v2186_v39 = vor.u32 %v2543_v28, %v2183_v29  ;;  %v2541_v40 = vld [vmem:[%s3844_s14 + $0xc] sm:$0xf0]  ;;  %v2399_v20 = vld [vmem:[%s3844_s14 + $0x1d8] sm:$0xf0] }
 0x1f1   :  { %1519 = vmatpush.bf16.msra.mxu0 %v2342_v17  ;;  %v2166_v53 = vor.u32 %v2541_v40, %v2165_v32  ;;  %v2418_v10 = vor.u32 %v2600_v63, %v2415_v0  ;;  %v2598_v17 = vld [vmem:[%s3844_s14 + $0x1d4] sm:$0xf0]  ;;  %v2381_v28 = vld [vmem:[%s3844_s14 + $0x1a8] sm:$0xf]  ;;  %v2383_v32 = vld [vmem:[%s3844_s14 + $0x1b8] sm:$0xf0] }
 0x1f2   :  { %v929_v2 = vpack.c.bf16 %v928_v62, %v928_v62  ;;  %1631 = vst [vmem:[#allocation6] sm:$0x3] %v928_v62  ;;  %1530 = vmatpush.bf16.msra.mxu1 %v2250_v50  ;;  %v2343_v62 = vld [vmem:[%s3844_s14 + $0x170] sm:$0xf0]  ;;  %v2293_v50 = vld [vmem:[%s3844_s14 + $0x100] sm:$0xf]  ;;  %v2398_v19 = vor.u32 %v2598_v17, %v2397_v16 }
 0x1f3   :  { %v2346_v18 = vor.u32 %v2583_v60, %v2343_v62  ;;  %v2253_v60 = vld [vmem:[%s3844_s14 + $0xa8] sm:$0xf]  ;;  %v2562_v62 = vld [vmem:[%s3844_s14 + $0xb4] sm:$0xf0]  ;;  %v2544_v63 = vld [vmem:[%s3844_s14 + $0x2c] sm:$0xf] }
 0x1f4   :  { %989 = vmatmul.bf16.vlgmr.msrb.gmra.mxu0 %v929_v2  ;;  %v2218_v2 = vor.u32 %v2551_v7, %v2215_v8  ;;  %1508 = vmatpush.bf16.msrb.mxu3 %v2182_v34  ;;  %v2294_v7 = vor.u32 %v2573_v51, %v2293_v50  ;;  %v2298_v8 = vor.u32 %v2571_v54, %v2295_v55  ;;  %v2594_v29 = vld [vmem:[%s3844_s14 + $0x1b4] sm:$0xf0]  ;;  %v2221_v34 = vld [vmem:[%s3844_s14 + $0x68] sm:$0xf]  ;;  %v2207_v50 = vld [vmem:[%s3844_s14 + $0x58] sm:$0xf0] }
 0x1f5   :  { %1545 = vmatpush.bf16.msra.mxu2 %v2346_v18  ;;  %1520 = vmatpush.bf16.msra.mxu0 %v2326_v30  ;;  %v2254_v14 = vor.u32 %v2562_v62, %v2253_v60  ;;  %v2596_v18 = vld [vmem:[%s3844_s14 + $0x1cc] sm:$0xf]  ;;  %v2222_v37 = vor.u32 %v2554_v35, %v2221_v34  ;;  %v2365_v40 = vld [vmem:[%s3844_s14 + $0x188] sm:$0xf]  ;;  %v2175_v60 = vld [vmem:[%s3844_s14 + $0x18] sm:$0xf0] }
 0x1f6   :  { %1531 = vmatpush.bf16.msra.mxu1 %v2234_v4  ;;  %v2566_v4 = vld [vmem:[%s3844_s14 + $0xd4] sm:$0xf0]  ;;  %v2402_v21 = vor.u32 %v2596_v18, %v2399_v20  ;;  %v2592_v30 = vld [vmem:[%s3844_s14 + $0x1ac] sm:$0xf]  ;;  %v2317_v62 = vld [vmem:[%s3844_s14 + $0x128] sm:$0xf] }
 0x1f7   :  { %v2270_v12 = vor.u32 %v2566_v4, %v2269_v3  ;;  %v2386_v33 = vor.u32 %v2592_v30, %v2383_v32  ;;  %v2584_v54 = vld [vmem:[%s3844_s14 + $0x16c] sm:$0xf]  ;;  %v2333_v4 = vld [vmem:[%s3844_s14 + $0x148] sm:$0xf] }
 0x1f8   :  { %1509 = vmatpush.bf16.msrb.mxu3 %v2166_v53  ;;  %v2586_v53 = vld [vmem:[%s3844_s14 + $0x174] sm:$0xf0]  ;;  %v2301_v18 = vld [vmem:[%s3844_s14 + $0x108] sm:$0xf]  ;;  %v2572_v20 = vld [vmem:[%s3844_s14 + $0x10c] sm:$0xf] }
 0x1f9   :  { %1546 = vmatpush.bf16.msra.mxu2 %v2330_v31  ;;  %1521 = vmatpush.bf16.msra.mxu0 %v2310_v48  ;;  %v2382_v31 = vor.u32 %v2594_v29, %v2381_v28  ;;  %v2548_v48 = vld [vmem:[%s3844_s14 + $0x4c] sm:$0xf]  ;;  %v2306_v23 = vor.u32 %v2572_v20, %v2303_v22 }
 0x1fa   :  { %1532 = vmatpush.bf16.msra.mxu1 %v2218_v2  ;;  %v2560_v2 = vld [vmem:[%s3844_s14 + $0xac] sm:$0xf]  ;;  %v2210_v51 = vor.u32 %v2548_v48, %v2207_v50 }
 0x1fb   :  { %v2258_v15 = vor.u32 %v2560_v2, %v2255_v13  ;;  %v2578_v13 = vld [vmem:[%s3844_s14 + $0x134] sm:$0xf0] }
 0x1fc   :  { %1554 = vmatpush.bf16.msra.mxu3 %v2286_v58  ;;  %v2189_v58 = vld [vmem:[%s3844_s14 + $0x28] sm:$0xf]  ;;  %v2318_v16 = vor.u32 %v2578_v13, %v2317_v62 }
 0x1fd   :  { %1547 = vmatpush.bf16.msra.mxu2 %v2314_v49  ;;  %1522 = vmatpush.bf16.msra.mxu0 %v2294_v7  ;;  %v2206_v49 = vor.u32 %v2550_v47, %v2205_v46  ;;  %v2190_v0 = vor.u32 %v2546_v59, %v2189_v58  ;;  %v2334_v7 = vor.u32 %v2582_v5, %v2333_v4 }
 0x1fe   :  { %1533 = vmatpush.bf16.msra.mxu1 %v2202_v24  ;;  %v2556_v24 = vld [vmem:[%s3844_s14 + $0x8c] sm:$0xf] }
 0x200   :  { %1555 = vmatpush.bf16.msra.mxu3 %v2270_v12 }
 0x201   :  { %1548 = vmatpush.bf16.msra.mxu2 %v2298_v8  ;;  %1567 = vmatpush.bf16.msrb.mxu0 %v2414_v9  ;;  %v2335_v8 = vld [vmem:[%s3844_s14 + $0x158] sm:$0xf0]  ;;  %v2173_v9 = vld [vmem:[%s3844_s14 + $0x8] sm:$0xf] }
 0x202   :  { %1534 = vmatpush.bf16.msra.mxu1 %v2186_v39 }
 0x204   :  { %1556 = vmatpush.bf16.msra.mxu3 %v2254_v14  ;;  %v2576_v14 = vld [vmem:[%s3844_s14 + $0x12c] sm:$0xf] }
 0x205   :  { %1568 = vmatpush.bf16.msrb.mxu0 %v2398_v19  ;;  %v2574_v19 = vld [vmem:[%s3844_s14 + $0x114] sm:$0xf0] }
 0x206   :  { %1535 = vmatpush.bf16.msra.mxu1 %v2170_v57  ;;  %v2354_v57 = vor.u32 %v2584_v54, %v2351_v56 }
 0x208   :  { %1557 = vmatpush.bf16.msra.mxu3 %v2238_v25 }
 0x209   :  { %1569 = vmatpush.bf16.msrb.mxu0 %v2382_v31 }
 0x20c   :  { %1558 = vmatpush.bf16.msra.mxu3 %v2222_v37 }
 0x210   :  { %1559 = vmatpush.bf16.msra.mxu3 %v2206_v49 }
 0x214   :  { %1560 = vmatpush.bf16.msra.mxu3 %v2190_v0 }
 0x271   :  { %v990_v38 = vpop.f32.mrf.mxu0 }
 0x272   :  { %v991_v43 = vadd.f32 %v2609_v27, %v990_v38  ;;  %v2242_v27 = vor.u32 %v2556_v24, %v2239_v26  ;;  %v2223_v38 = vld [vmem:[%s3844_s14 + $0x78] sm:$0xf0]  ;;  %v794_v24 = vld [vmem:[%s3843_s13] sm:$0x3]  ;;  %s2688_s13 = smov [#allocation4]  }
 0x273   :  { %v2226_v39 = vor.u32 %v2552_v36, %v2223_v38  ;;  %v996_v25 = vperm.slane %v794_v24, 0  ;;  %v997_v29 = vperm.slane %v794_v24, 1 }
 0x274   :  { %v994_v52 = vpack.c.bf16 %v991_v43, %v991_v43  ;;  %v2366_v43 = vor.u32 %v2590_v41, %v2365_v40 }
 0x276   :  { %1088 = vmatmul.bf16.vlgmr.msrb.gmra.mxu1 %v994_v52  ;;  %1101 = vmatmul.bf16.vlgmr.msrb.gmra.mxu2 %v994_v52  ;;  %v2349_v52 = vld [vmem:[%s3844_s14 + $0x168] sm:$0xf] }
 0x277   :  { %1580 = vmatpush.bf16.msrb.mxu1 %v2290_v1  ;;  %1593 = vmatpush.bf16.msrb.mxu2 %v2418_v10  ;;  %v2350_v55 = vor.u32 %v2586_v53, %v2349_v52  ;;  %v2191_v1 = vld [vmem:[%s3844_s14 + $0x38] sm:$0xf0]  ;;  %v2542_v10 = vld [vmem:[%s3844_s14 + $0x14] sm:$0xf0] }
 0x278   :  { %1570 = vmatpush.bf16.msrb.mxu0 %v2366_v43  ;;  %v2194_v3 = vor.u32 %v2544_v63, %v2191_v1  ;;  %v2174_v12 = vor.u32 %v2542_v10, %v2173_v9 }
 0x279   :  { %v992_v11 = vpop.f32.mrf.mxu0 }
 0x27a   :  { %v2338_v11 = vor.u32 %v2580_v6, %v2335_v8  ;;  %1561 = vmatpush.bf16.msra.mxu3 %v2174_v12 }
 0x27b   :  { %1581 = vmatpush.bf16.msrb.mxu1 %v2274_v61  ;;  %1594 = vmatpush.bf16.msrb.mxu2 %v2402_v21  ;;  %v2540_v61 = vld [vmem:[%s3844_s14 + $0xc] sm:$0xf]  ;;  %v2302_v21 = vor.u32 %v2574_v19, %v2301_v18 }
 0x27c   :  { %1571 = vmatpush.bf16.msrb.mxu0 %v2350_v55  ;;  %v2178_v2 = vor.u32 %v2540_v61, %v2175_v60 }
 0x27f   :  { %1582 = vmatpush.bf16.msrb.mxu1 %v2258_v15  ;;  %1595 = vmatpush.bf16.msrb.mxu2 %v2386_v33  ;;  %v2319_v15 = vld [vmem:[%s3844_s14 + $0x138] sm:$0xf0]  ;;  %s1650_s14 = sshll.u32 %s2688_s13, 4  ;;  %s1651_s14 = int_to_ptr.vmem [resolvable:$true] %s1650_s14 }
 0x280   :  { %1572 = vmatpush.bf16.msrb.mxu0 %v2334_v7  ;;  %v2322_v17 = vor.u32 %v2576_v14, %v2319_v15  ;;  %1655 = dma.vmem_to_hbm [thread:$0]  %s1651_s14, 32, %s1653_s10, [#allocation5]  }
 0x281   :  { %1666 = dma.vmem_to_hbm [thread:$0]  %s1662_s7, 32, %s1664_s25, [#allocation5]  }
 0x283   :  { %1583 = vmatpush.bf16.msrb.mxu1 %v2242_v27  ;;  %1596 = vmatpush.bf16.msrb.mxu2 %v2370_v45 }
 0x284   :  { %1573 = vmatpush.bf16.msrb.mxu0 %v2318_v16 }
 0x287   :  { %1584 = vmatpush.bf16.msrb.mxu1 %v2226_v39  ;;  %1597 = vmatpush.bf16.msrb.mxu2 %v2354_v57  ;;  %v1172_v39 = vld [vmem:[%s3845_s15] sm:$0xf] }
 0x288   :  { %1574 = vmatpush.bf16.msrb.mxu0 %v2302_v21  ;;  %v1175_v43 = vperm.slane %v1172_v39, 1  ;;  %v1174_v44 = vperm.slane %v1172_v39, 0  ;;  %v1176_v48 = vperm.slane %v1172_v39, 2  ;;  %v1177_v54 = vperm.slane %v1172_v39, 3 }
 0x28b   :  { %1585 = vmatpush.bf16.msrb.mxu1 %v2210_v51  ;;  %1598 = vmatpush.bf16.msrb.mxu2 %v2338_v11 }
 0x28f   :  { %1586 = vmatpush.bf16.msrb.mxu1 %v2194_v3  ;;  %1599 = vmatpush.bf16.msrb.mxu2 %v2322_v17 }
 0x293   :  { %1587 = vmatpush.bf16.msrb.mxu1 %v2178_v2  ;;  %1600 = vmatpush.bf16.msrb.mxu2 %v2306_v23 }
 0x2f3   :  { %v1089_v26 = vpop.f32.mrf.mxu1 }
 0x2f4   :  { %v1090_v27 = vadd.f32 %v1089_v26, %v996_v25 }
 0x2f6   :  { %v1106_v28 = vpack.c.bf16 %v1090_v27, %v1090_v27 }
 0x2f8   :  { %1510 = vmatmul.bf16.vlgmr.msrb.gmra.mxu3 %v1106_v28  ;;  %1536 = vmatmul.bf16.vlgmr.msra.gmra.mxu1 %v1106_v28 }
 0x2f9   :  { %v1102_v30 = vpop.f32.mrf.mxu2 }
 0x2fa   :  { %v1103_v31 = vadd.f32 %v1102_v30, %v997_v29 }
 0x2fb   :  { %v1091_v32 = vpop.f32.mrf.mxu1 }
 0x2fc   :  { %v1107_v33 = vpack.c.bf16 %v1103_v31, %v1103_v31 }
 0x2fe   :  { %1523 = vmatmul.bf16.vlgmr.msra.gmra.mxu0 %v1107_v33  ;;  %1549 = vmatmul.bf16.vlgmr.msra.gmra.mxu2 %v1107_v33 }
 0x301   :  { %v1104_v34 = vpop.f32.mrf.mxu2 }
 0x308   :  { %1562 = vmatmul.bf16.vlgmr.msra.gmra.mxu3 %v1106_v28  ;;  %1588 = vmatmul.bf16.vlgmr.msrb.gmra.mxu1 %v1106_v28 }
 0x30e   :  { %1575 = vmatmul.bf16.vlgmr.msrb.gmra.mxu0 %v1107_v33  ;;  %1601 = vmatmul.bf16.vlgmr.msrb.gmra.mxu2 %v1107_v33 }
 0x375   :  { %v1537_v35 = vpop.f32.mrf.mxu1 }
 0x376   :  { %v1538_v46 = vadd.f32 %v1537_v35, %v1175_v43 }
 0x37b   :  { %v1511_v36 = vpop.f32.mrf.mxu3  ;;  %v1524_v37 = vpop.f32.mrf.mxu0 }
 0x37c   :  { %v1512_v47 = vadd.f32 %v1511_v36, %v1174_v44 }
 0x37d   :  { %v1539_v38 = vpop.f32.mrf.mxu1 }
 0x37e   :  { %v1525_v53 = vadd.f32 %v1524_v37, %v1512_v47 }
 0x380   :  { %v1606_v58 = vmax.f32 %v1525_v53, 0.0 }
 0x381   :  { %v1550_v40 = vpop.f32.mrf.mxu2 }
 0x382   :  { %v1551_v50 = vadd.f32 %v1550_v40, %v1538_v46 }
 0x383   :  { %v1513_v41 = vpop.f32.mrf.mxu3  ;;  %v1526_v42 = vpop.f32.mrf.mxu0 }
 0x384   :  { %v1607_v57 = vmax.f32 %v1551_v50, 0.0 }
 0x385   :  { %v1589_v45 = vpop.f32.mrf.mxu1 }
 0x386   :  { %v1590_v59 = vadd.f32 %v1589_v45, %v1177_v54  ;;  %v1610_v1 = vpack.c.bf16 %v1607_v57, %v1606_v58 }
 0x388   :  { %v1614_v8 = vrot.slane %v1610_v1, 3 }
 0x389   :  { %v1552_v49 = vpop.f32.mrf.mxu2 }
 0x38a   :  { %v1620_v61 = vsel %vm1617_vm0, %v1610_v1, %v1614_v8 }
 0x38b   :  { %v1563_v51 = vpop.f32.mrf.mxu3  ;;  %v1576_v52 = vpop.f32.mrf.mxu0 }
 0x38c   :  { %v1564_v55 = vadd.f32 %v1563_v51, %v1176_v48 }
 0x38d   :  { %v1591_v56 = vpop.f32.mrf.mxu1 }
 0x38e   :  { %v1577_v63 = vadd.f32 %v1576_v52, %v1564_v55 }
 0x390   :  { %v1608_v6 = vmax.f32 %v1577_v63, 0.0 }
 0x391   :  { %v1602_v0 = vpop.f32.mrf.mxu2 }
 0x392   :  { %v1603_v3 = vadd.f32 %v1602_v0, %v1590_v59 }
 0x393   :  { %v1565_v4 = vpop.f32.mrf.mxu3  ;;  %v1578_v5 = vpop.f32.mrf.mxu0 }
 0x394   :  { %v1609_v7 = vmax.f32 %v1603_v3, 0.0 }
 0x396   :  { %v1611_v9 = vpack.c.bf16 %v1609_v7, %v1608_v6 }
 0x398   :  { %v1615_v10 = vrot.slane %v1611_v9, 6  ;;  %v1616_v11 = vrot.slane %v1611_v9, 1 }
 0x399   :  { %v1604_v12 = vpop.f32.mrf.mxu2 }
 0x39a   :  { %v1624_v60 = vsel %vm1621_vm1, %v1615_v10, %v1616_v11 }
 0x39b   :  { %v1626_v62 = vsel %vm1625_vm2, %v1620_v61, %v1624_v60 }
 0x39c   :  { %1628 = vst [vmem:[%s3846_s16] sm:$0xf] %v1626_v62 }
 0x39d   :  { %2684 = dma.done.wait [#allocation3], 32  }
 0x39e   :  { %2685 = vsyncadd [#allocation3], 4294967264 }
 0x39f   :  { %2686 = dma.done.wait [#allocation5], 64  }
 0x3a0   :  { %2687 = vsyncadd [#allocation5], 4294967232 }
 0x3a1   :  { %1681 = vsyncpa [#allocation3], 1 }
 0x3a2   :  { %1682 = vsyncpa [#allocation5], 1 }

// kernel: _lambda_.11
= control target key start
LH: loop header
LB: loop body
LE: loop exit
PB: predicated region body
PF: predicated region fallthrough
CT: control target
= control target key end

     0   :  { %s1002_s12 = smov 0   ;;  %s1004_s13 = smov 0   ;;  %s1084_s0 = inlined_call_operand.vmem [shape: bf16[16,8,128], index: 0, kind: input, shape index: {}]   ;;  %s1085_s1 = inlined_call_operand.vmem [shape: bf16[4,4,128,128], index: 1, kind: input, shape index: {}]   ;;  %s1086_s2 = inlined_call_operand.vmem [shape: f32[1,128], index: 2, kind: input, shape index: {}]   ;;  %s1087_s3 = inlined_call_operand.vmem [shape: bf16[4,8,128], index: 3, kind: output, shape index: {}]  }
   0x1   :  { %s1006_s14 = smov 0  }
   0x2 LB: > { %s32_s15 = sadd.s32 1, %s976_s13  ;;  %p713_p0 = scmp.ge.s32.totalorder %s980_s14, 1  ;;  %s980_s14 = sphi %s1006_s14, %s13_s14   ;;  %s976_s13 = sphi %s1004_s13, %s1089_s13   ;;  %s972_s12 = sphi %s1002_s12, %s1088_s12  }
   0x3   : > { %p34_p1 = scmp.ge.s32.totalorder %s32_s15, 4  ;;  %p189_p2 = scmp.lt.s32.totalorder %s980_s14, 5 }
   0x5   : > { %s1091_s15 = smov (%p34_p1, %s32_s15), 0  ;;  %p190_p3 = pnand %p713_p0, %p189_p2 }
   0x6   : > { %p241_p4 = scmp.lt.s32.totalorder (!%p190_p3), %s972_s12, 3  ;;  %s714_s21 = sshll.u32 (!%p190_p3), %s972_s12, 2 }
   0x7   : > { %193 = sbr.rel (%p190_p3) target bundleno = 193 (0xc1), region = 32  ;;  %p233_p5 = scmp.lt.s32.totalorder (!%p190_p3), %s714_s21, 15 }
   0xc   : > { %s1024_s16 = scalar_select %p241_p4, %s972_s12, 3  ;;  %v957_v42 = vld [vmem:[%s1086_s2] ss:$0 sm:$0xff] }
   0xd   : > { %s1093_s21 = smov (!%p233_p5, %s714_s21), 15 }
   0xe   : > { %s900_s17 = sshll.u32 %s1024_s16, 8  ;;  %s715_s22 = sshll.u32 %s1093_s21, 2 }
   0xf   : > { %s1030_s20 = scalar_lea.vmem %s1085_s1, %s900_s17  ;;  %s239_s25 = scalar_lea.vmem %s1084_s0, %s715_s22 }
  0x10   : > { %v916_v0 = vld [vmem:[%s1030_s20 + $0x78] sm:$0xff]  ;;  %v915_v4 = vld [vmem:[%s1030_s20 + $0x70] sm:$0xff]  ;;  %v914_v8 = vld [vmem:[%s1030_s20 + $0x68] sm:$0xff]  ;;  %s718_s28 = sshll.u32 %s1024_s16, 2 }
  0x11   : > { %v908_v1 = vld [vmem:[%s1030_s20 + $0x38] sm:$0xff]  ;;  %346 = vmatpush.bf16.msra.mxu0 %v916_v0  ;;  %v907_v5 = vld [vmem:[%s1030_s20 + $0x30] sm:$0xff]  ;;  %v906_v9 = vld [vmem:[%s1030_s20 + $0x28] sm:$0xff]  ;;  %s261_s4 = scalar_lea.vmem %s1087_s3, %s718_s28 }
  0x12   : > { %v924_v2 = vld [vmem:[%s1030_s20 + $0xb8] sm:$0xff]  ;;  %407 = vmatpush.bf16.msra.mxu1 %v908_v1  ;;  %v923_v6 = vld [vmem:[%s1030_s20 + $0xb0] sm:$0xff]  ;;  %v922_v10 = vld [vmem:[%s1030_s20 + $0xa8] sm:$0xff] }
  0x13   : > { %v932_v3 = vld [vmem:[%s1030_s20 + $0xf8] sm:$0xff]  ;;  %487 = vmatpush.bf16.msra.mxu2 %v924_v2  ;;  %v931_v7 = vld [vmem:[%s1030_s20 + $0xf0] sm:$0xff]  ;;  %v930_v11 = vld [vmem:[%s1030_s20 + $0xe8] sm:$0xff] }
  0x14   : > { %568 = vmatpush.bf16.msra.mxu3 %v932_v3  ;;  %v913_v12 = vld [vmem:[%s1030_s20 + $0x60] sm:$0xff]  ;;  %v912_v16 = vld [vmem:[%s1030_s20 + $0x58] sm:$0xff]  ;;  %v911_v20 = vld [vmem:[%s1030_s20 + $0x50] sm:$0xff] }
  0x15   : > { %347 = vmatpush.bf16.msra.mxu0 %v915_v4  ;;  %v905_v13 = vld [vmem:[%s1030_s20 + $0x20] sm:$0xff]  ;;  %v904_v17 = vld [vmem:[%s1030_s20 + $0x18] sm:$0xff]  ;;  %v903_v21 = vld [vmem:[%s1030_s20 + $0x10] sm:$0xff] }
  0x16   : > { %408 = vmatpush.bf16.msra.mxu1 %v907_v5  ;;  %v921_v14 = vld [vmem:[%s1030_s20 + $0xa0] sm:$0xff]  ;;  %v920_v18 = vld [vmem:[%s1030_s20 + $0x98] sm:$0xff]  ;;  %v919_v22 = vld [vmem:[%s1030_s20 + $0x90] sm:$0xff] }
  0x17   : > { %488 = vmatpush.bf16.msra.mxu2 %v923_v6  ;;  %v929_v15 = vld [vmem:[%s1030_s20 + $0xe0] sm:$0xff]  ;;  %v928_v19 = vld [vmem:[%s1030_s20 + $0xd8] sm:$0xff]  ;;  %v927_v23 = vld [vmem:[%s1030_s20 + $0xd0] sm:$0xff] }
  0x18   : > { %569 = vmatpush.bf16.msra.mxu3 %v931_v7  ;;  %v910_v24 = vld [vmem:[%s1030_s20 + $0x48] sm:$0xff]  ;;  %v909_v28 = vld [vmem:[%s1030_s20 + $0x40] sm:$0xff] }
  0x19   : > { %348 = vmatpush.bf16.msra.mxu0 %v914_v8  ;;  %v902_v25 = vld [vmem:[%s1030_s20 + $0x8] sm:$0xff]  ;;  %v901_v29 = vld [vmem:[%s1030_s20] sm:$0xff] }
  0x1a   : > { %409 = vmatpush.bf16.msra.mxu1 %v906_v9  ;;  %v918_v26 = vld [vmem:[%s1030_s20 + $0x88] sm:$0xff]  ;;  %v917_v30 = vld [vmem:[%s1030_s20 + $0x80] sm:$0xff] }
  0x1b   : > { %489 = vmatpush.bf16.msra.mxu2 %v922_v10  ;;  %v926_v27 = vld [vmem:[%s1030_s20 + $0xc8] sm:$0xff]  ;;  %v925_v31 = vld [vmem:[%s1030_s20 + $0xc0] sm:$0xff] }
  0x1c   : > { %570 = vmatpush.bf16.msra.mxu3 %v930_v11  ;;  %v719_v32 = vld [vmem:[%s239_s25 + $0x4] sm:$0xf]  ;;  %v262_v33 = vld [vmem:[%s239_s25] sm:$0xf]  ;;  %v800_v34 = vld [vmem:[%s239_s25 + $0x8] sm:$0xf] }
  0x1d   : > { %349 = vmatpush.bf16.msra.mxu0 %v913_v12  ;;  %v849_v35 = vld [vmem:[%s239_s25 + $0xc] sm:$0xf] }
  0x1e   : > { %410 = vmatpush.bf16.msra.mxu1 %v905_v13 }
  0x1f   : > { %490 = vmatpush.bf16.msra.mxu2 %v921_v14 }
  0x20   : > { %571 = vmatpush.bf16.msra.mxu3 %v929_v15 }
  0x21   : > { %350 = vmatpush.bf16.msra.mxu0 %v912_v16 }
  0x22   : > { %411 = vmatpush.bf16.msra.mxu1 %v904_v17 }
  0x23   : > { %491 = vmatpush.bf16.msra.mxu2 %v920_v18 }
  0x24   : > { %572 = vmatpush.bf16.msra.mxu3 %v928_v19 }
  0x25   : > { %351 = vmatpush.bf16.msra.mxu0 %v911_v20 }
  0x26   : > { %412 = vmatpush.bf16.msra.mxu1 %v903_v21 }
  0x27   : > { %492 = vmatpush.bf16.msra.mxu2 %v919_v22 }
  0x28   : > { %573 = vmatpush.bf16.msra.mxu3 %v927_v23 }
  0x29   : > { %352 = vmatpush.bf16.msra.mxu0 %v910_v24 }
  0x2a   : > { %413 = vmatpush.bf16.msra.mxu1 %v902_v25 }
  0x2b   : > { %493 = vmatpush.bf16.msra.mxu2 %v918_v26 }
  0x2c   : > { %574 = vmatpush.bf16.msra.mxu3 %v926_v27 }
  0x2d   : > { %353 = vmatpush.bf16.msra.mxu0 %v909_v28 }
  0x2e   : > { %414 = vmatpush.bf16.msra.mxu1 %v901_v29 }
  0x2f   : > { %494 = vmatpush.bf16.msra.mxu2 %v917_v30 }
  0x30   : > { %575 = vmatpush.bf16.msra.mxu3 %v925_v31  ;;  %354 = vmatmul.bf16.vlgmr.msra.gmra.mxu0 %v719_v32 }
  0x31   : > { %415 = vmatmul.bf16.vlgmr.msra.gmra.mxu1 %v262_v33 }
  0x32   : > { %495 = vmatmul.bf16.vlgmr.msra.gmra.mxu2 %v800_v34 }
  0x33   : > { %576 = vmatmul.bf16.vlgmr.msra.gmra.mxu3 %v849_v35 }
  0xad   : > { %v355_v36 = vpop.f32.mrf.mxu0 }
  0xae   : > { %v416_v37 = vpop.f32.mrf.mxu1 }
  0xaf   : > { %v417_v38 = vadd.f32 %v416_v37, %v355_v36 }
  0xb5   : > { %v496_v39 = vpop.f32.mrf.mxu2  ;;  %v357_v43 = vpop.f32.mrf.mxu0 }
  0xb6   : > { %v577_v40 = vpop.f32.mrf.mxu3  ;;  %v500_v41 = vadd.f32 %v496_v39, %v417_v38  ;;  %v418_v44 = vpop.f32.mrf.mxu1 }
  0xb8   : > { %v581_v45 = vadd.f32 %v577_v40, %v500_v41 }
  0xba   : > { %v586_v46 = vadd.f32 %v957_v42, %v581_v45 }
  0xbc   : > { %v587_v47 = vmax.f32 %v586_v46, 0.0 }
  0xbd   : > { %v498_v48 = vpop.f32.mrf.mxu2 }
  0xbe   : > { %v579_v49 = vpop.f32.mrf.mxu3  ;;  %v588_v50 = vpack.c.bf16 %v587_v47, %v587_v47 }
  0xc0   : > { %589 = vst [vmem:[%s261_s4] sm:$0xf] %v588_v50 }
  0xc1 PF: > { %s13_s14 = sadd.s32 1, %s980_s14   ;;  %s1088_s12 = smov %s976_s13 }
  0xc2   : > { %p10_p6 = scmp.ge.s32.totalorder %s13_s14, 6   ;;  %s1089_s13 = smov %s1091_s15 }
  0xc4   :  { %12 = sbr.rel (!%p10_p6) target bundleno = 2 (0x2), region = 74 }

// kernel: _lambda_.12
= control target key start
LH: loop header
LB: loop body
LE: loop exit
PB: predicated region body
PF: predicated region fallthrough
CT: control target
= control target key end

     0   :  { %s987_s12 = smov 0   ;;  %s989_s13 = smov 0   ;;  %s1056_s0 = inlined_call_operand.vmem [shape: bf16[16,32,64], index: 0, kind: input, shape index: {}]   ;;  %s1057_s1 = inlined_call_operand.vmem [shape: bf16[4,4,64,128], index: 1, kind: input, shape index: {}]   ;;  %s1058_s2 = inlined_call_operand.vmem [shape: f32[1,128], index: 2, kind: input, shape index: {}]   ;;  %s1059_s3 = inlined_call_operand.vmem [shape: bf16[4,32,128], index: 3, kind: output, shape index: {}]  }
   0x1   :  { %s991_s14 = smov 0  }
   0x2 LB: > { %s32_s15 = sadd.s32 1, %s961_s13  ;;  %p730_p0 = scmp.ge.s32.totalorder %s965_s14, 1  ;;  %s965_s14 = sphi %s991_s14, %s13_s14   ;;  %s961_s13 = sphi %s989_s13, %s1061_s13   ;;  %s957_s12 = sphi %s987_s12, %s1060_s12  }
   0x3   : > { %p34_p1 = scmp.ge.s32.totalorder %s32_s15, 4  ;;  %p192_p2 = scmp.lt.s32.totalorder %s965_s14, 5 }
   0x5   : > { %s1063_s15 = smov (%p34_p1, %s32_s15), 0  ;;  %p193_p3 = pnand %p730_p0, %p192_p2 }
   0x6   : > { %p251_p4 = scmp.lt.s32.totalorder (!%p193_p3), %s957_s12, 3  ;;  %s731_s16 = sshll.u32 (!%p193_p3), %s957_s12, 2 }
   0x7   : > { %196 = sbr.rel (%p193_p3) target bundleno = 200 (0xc8), region = 32  ;;  %p241_p5 = scmp.lt.s32.totalorder (!%p193_p3), %s731_s16, 15 }
   0xc   : > { %s1065_s12 = smov (!%p251_p4, %s957_s12), 3  ;;  %s1067_s16 = smov (!%p241_p5, %s731_s16), 15  ;;  %vm336_vm0 = vcmask 523264   ;;  %v942_v33 = vld [vmem:[%s1058_s2] ss:$0 sm:$0xff] }
   0xd   : > { %s881_s17 = sshll.u32 %s1065_s12, 7  ;;  %s880_s21 = sshll.u32 %s1067_s16, 4 }
   0xe   : > { %s1011_s20 = scalar_lea.vmem %s1057_s1, %s881_s17  ;;  %s248_s24 = scalar_lea.vmem %s1056_s0, %s880_s21 }
   0xf   : > { %v894_v0 = vld [vmem:[%s1011_s20 + $0x38] sm:$0xff]  ;;  %v893_v4 = vld [vmem:[%s1011_s20 + $0x30] sm:$0xff]  ;;  %v892_v8 = vld [vmem:[%s1011_s20 + $0x28] sm:$0xff]  ;;  %s882_s27 = sshll.u32 %s1065_s12, 4 }
  0x10   : > { %v888_v1 = vld [vmem:[%s1011_s20 + $0x18] sm:$0xff]  ;;  %347 = vmatpush.bf16.msra.mxu0 %v894_v0  ;;  %v887_v5 = vld [vmem:[%s1011_s20 + $0x10] sm:$0xff]  ;;  %v886_v9 = vld [vmem:[%s1011_s20 + $0x8] sm:$0xff]  ;;  %s273_s30 = scalar_lea.vmem %s1059_s3, %s882_s27 }
  0x11   : > { %v900_v2 = vld [vmem:[%s1011_s20 + $0x58] sm:$0xff]  ;;  %406 = vmatpush.bf16.msra.mxu1 %v888_v1  ;;  %v899_v6 = vld [vmem:[%s1011_s20 + $0x50] sm:$0xff]  ;;  %v898_v10 = vld [vmem:[%s1011_s20 + $0x48] sm:$0xff] }
  0x12   : > { %v906_v3 = vld [vmem:[%s1011_s20 + $0x78] sm:$0xff]  ;;  %479 = vmatpush.bf16.msra.mxu2 %v900_v2  ;;  %v905_v7 = vld [vmem:[%s1011_s20 + $0x70] sm:$0xff]  ;;  %v904_v11 = vld [vmem:[%s1011_s20 + $0x68] sm:$0xff] }
  0x13   : > { %556 = vmatpush.bf16.msra.mxu3 %v906_v3  ;;  %v891_v12 = vld [vmem:[%s1011_s20 + $0x20] sm:$0xff]  ;;  %v889_v16 = vld [vmem:[%s248_s24 + $0x10] sm:$0xff]  ;;  %v890_v20 = vld [vmem:[%s248_s24 + $0x18] sm:$0xff] }
  0x14   : > { %348 = vmatpush.bf16.msra.mxu0 %v893_v4  ;;  %v885_v13 = vld [vmem:[%s1011_s20] sm:$0xff]  ;;  %v901_v19 = vld [vmem:[%s248_s24 + $0x30] sm:$0xff]  ;;  %v884_v21 = vld [vmem:[%s248_s24 + $0x8] sm:$0xff] }
  0x15   : > { %407 = vmatpush.bf16.msra.mxu1 %v887_v5  ;;  %v897_v14 = vld [vmem:[%s1011_s20 + $0x40] sm:$0xff]  ;;  %v896_v22 = vld [vmem:[%s248_s24 + $0x28] sm:$0xff]  ;;  %v902_v23 = vld [vmem:[%s248_s24 + $0x38] sm:$0xff] }
  0x16   : > { %480 = vmatpush.bf16.msra.mxu2 %v899_v6  ;;  %v903_v15 = vld [vmem:[%s1011_s20 + $0x60] sm:$0xff] }
  0x17   : > { %557 = vmatpush.bf16.msra.mxu3 %v905_v7  ;;  %v883_v17 = vld [vmem:[%s248_s24] sm:$0xff] }
  0x18   : > { %349 = vmatpush.bf16.msra.mxu0 %v892_v8  ;;  %v895_v18 = vld [vmem:[%s248_s24 + $0x20] sm:$0xff] }
  0x19   : > { %408 = vmatpush.bf16.msra.mxu1 %v886_v9 }
  0x1a   : > { %481 = vmatpush.bf16.msra.mxu2 %v898_v10 }
  0x1b   : > { %558 = vmatpush.bf16.msra.mxu3 %v904_v11 }
  0x1c   : > { %350 = vmatpush.bf16.msra.mxu0 %v891_v12 }
  0x1d   : > { %409 = vmatpush.bf16.msra.mxu1 %v885_v13 }
  0x1e   : > { %482 = vmatpush.bf16.msra.mxu2 %v897_v14 }
  0x1f   : > { %559 = vmatpush.bf16.msra.mxu3 %v903_v15  ;;  %774 = vmatmul.msk.bf16.vlgmr.msra.gmra.mxu0 %vm336_vm0, %v889_v16 }
  0x20   : > { %800 = vmatmul.msk.bf16.vlgmr.msra.gmra.mxu1 %vm336_vm0, %v883_v17 }
  0x21   : > { %838 = vmatmul.msk.bf16.vlgmr.msra.gmra.mxu2 %vm336_vm0, %v895_v18 }
  0x22   : > { %876 = vmatmul.msk.bf16.vlgmr.msra.gmra.mxu3 %vm336_vm0, %v901_v19 }
  0x2f   : > { %775 = vmatmul.msk.bf16.gmra.mxu0 %vm336_vm0, %v890_v20 }
  0x30   : > { %801 = vmatmul.msk.bf16.gmra.mxu1 %vm336_vm0, %v884_v21 }
  0x31   : > { %839 = vmatmul.msk.bf16.gmra.mxu2 %vm336_vm0, %v896_v22 }
  0x32   : > { %877 = vmatmul.msk.bf16.gmra.mxu3 %vm336_vm0, %v902_v23 }
  0x9c   : > { %v352_v24 = vpop.f32.mrf.mxu0 }
  0x9d   : > { %v411_v25 = vpop.f32.mrf.mxu1 }
  0x9e   : > { %v412_v26 = vadd.f32 %v411_v25, %v352_v24 }
  0xa4   : > { %v484_v27 = vpop.f32.mrf.mxu2  ;;  %v354_v29 = vpop.f32.mrf.mxu0 }
  0xa5   : > { %v561_v28 = vpop.f32.mrf.mxu3  ;;  %v413_v30 = vpop.f32.mrf.mxu1  ;;  %v494_v31 = vadd.f32 %v484_v27, %v412_v26 }
  0xa6   : > { %v414_v34 = vadd.f32 %v413_v30, %v354_v29 }
  0xa7   : > { %v571_v32 = vadd.f32 %v561_v28, %v494_v31 }
  0xa9   : > { %v579_v40 = vadd.f32 %v942_v33, %v571_v32 }
  0xab   : > { %v583_v43 = vmax.f32 %v579_v40, 0.0 }
  0xac   : > { %v486_v35 = vpop.f32.mrf.mxu2  ;;  %v357_v38 = vpop.f32.mrf.mxu0 }
  0xad   : > { %v563_v36 = vpop.f32.mrf.mxu3  ;;  %v495_v37 = vadd.f32 %v486_v35, %v414_v34  ;;  %v416_v39 = vpop.f32.mrf.mxu1 }
  0xae   : > { %v417_v45 = vadd.f32 %v416_v39, %v357_v38 }
  0xaf   : > { %v572_v41 = vadd.f32 %v563_v36, %v495_v37 }
  0xb1   : > { %v580_v42 = vadd.f32 %v942_v33, %v572_v41 }
  0xb3   : > { %v584_v44 = vmax.f32 %v580_v42, 0.0 }
  0xb4   : > { %v489_v46 = vpop.f32.mrf.mxu2  ;;  %v359_v50 = vpop.f32.mrf.mxu0 }
  0xb5   : > { %v566_v47 = vpop.f32.mrf.mxu3  ;;  %v910_v48 = vpack.c.bf16 %v584_v44, %v583_v43  ;;  %v496_v49 = vadd.f32 %v489_v46, %v417_v45  ;;  %v418_v51 = vpop.f32.mrf.mxu1 }
  0xb6   : > { %v419_v53 = vadd.f32 %v418_v51, %v359_v50 }
  0xb7   : > { %911 = vst [vmem:[%s273_s30] sm:$0xff] %v910_v48   ;;  %v573_v52 = vadd.f32 %v566_v47, %v496_v49 }
  0xb9   : > { %v581_v57 = vadd.f32 %v942_v33, %v573_v52 }
  0xbb   : > { %v585_v60 = vmax.f32 %v581_v57, 0.0 }
  0xbc   : > { %v491_v54 = vpop.f32.mrf.mxu2 }
  0xbd   : > { %v497_v55 = vadd.f32 %v491_v54, %v419_v53  ;;  %v568_v56 = vpop.f32.mrf.mxu3 }
  0xbf   : > { %v574_v58 = vadd.f32 %v568_v56, %v497_v55 }
  0xc1   : > { %v582_v59 = vadd.f32 %v942_v33, %v574_v58 }
  0xc3   : > { %v586_v61 = vmax.f32 %v582_v59, 0.0 }
  0xc5   : > { %v915_v62 = vpack.c.bf16 %v586_v61, %v585_v60 }
  0xc7   : > { %917 = vst [vmem:[%s273_s30 + $0x8] sm:$0xff] %v915_v62  }
  0xc8 PF: > { %s13_s14 = sadd.s32 1, %s965_s14   ;;  %s1060_s12 = smov %s961_s13 }
  0xc9   : > { %p10_p6 = scmp.ge.s32.totalorder %s13_s14, 6   ;;  %s1061_s13 = smov %s1063_s15 }
  0xcb   :  { %12 = sbr.rel (!%p10_p6) target bundleno = 2 (0x2), region = 74 }

// kernel: _lambda_.13
= control target key start
LH: loop header
LB: loop body
LE: loop exit
PB: predicated region body
PF: predicated region fallthrough
CT: control target
= control target key end

     0   :  { %s1824_s12 = smov 0   ;;  %s1826_s13 = smov 0   ;;  %s1976_s0 = inlined_call_operand.vmem [shape: bf16[16,128,32], index: 0, kind: input, shape index: {}]   ;;  %s1977_s1 = inlined_call_operand.vmem [shape: bf16[4,4,32,128], index: 1, kind: input, shape index: {}]   ;;  %s1978_s2 = inlined_call_operand.vmem [shape: f32[1,128], index: 2, kind: input, shape index: {}]   ;;  %s1979_s3 = inlined_call_operand.vmem [shape: f32[4,128,128], index: 3, kind: output, shape index: {}]  }
   0x1   :  { %s1828_s14 = smov 0  }
   0x2 LB: > { %s32_s15 = sadd.s32 1, %s1798_s13  ;;  %p1370_p0 = scmp.ge.s32.totalorder %s1802_s14, 1  ;;  %s1802_s14 = sphi %s1828_s14, %s13_s14   ;;  %s1798_s13 = sphi %s1826_s13, %s1981_s13   ;;  %s1794_s12 = sphi %s1824_s12, %s1980_s12  }
   0x3   : > { %p34_p1 = scmp.ge.s32.totalorder %s32_s15, 4  ;;  %p192_p2 = scmp.lt.s32.totalorder %s1802_s14, 5 }
   0x5   : > { %s1983_s15 = smov (%p34_p1, %s32_s15), 0  ;;  %p193_p3 = pnand %p1370_p0, %p192_p2 }
   0x6   : > { %p251_p4 = scmp.lt.s32.totalorder (!%p193_p3), %s1794_s12, 3  ;;  %s1371_s16 = sshll.u32 (!%p193_p3), %s1794_s12, 2 }
   0x7   : > { %196 = sbr.rel (%p193_p3) target bundleno = 311 (0x137), region = 32  ;;  %p241_p5 = scmp.lt.s32.totalorder (!%p193_p3), %s1371_s16, 15 }
   0xc   : > { %s1985_s12 = smov (!%p251_p4, %s1794_s12), 3  ;;  %s1987_s16 = smov (!%p241_p5, %s1371_s16), 15  ;;  %vm370_vm0 = vcmask 261120   ;;  %v1920_v46 = vld [vmem:[%s1978_s2] ss:$0 sm:$0xff] }
   0xd   : > { %s1649_s17 = sshll.u32 %s1985_s12, 6  ;;  %s1648_s21 = sshll.u32 %s1987_s16, 6 }
   0xe   : > { %s258_s20 = scalar_lea.vmem %s1977_s1, %s1649_s17  ;;  %s1851_s24 = scalar_lea.vmem %s1976_s0, %s1648_s21 }
   0xf   : > { %v1670_v0 = vld [vmem:[%s258_s20 + $0x18] sm:$0xff]  ;;  %v1660_v1 = vld [vmem:[%s258_s20 + $0x8] sm:$0xff]  ;;  %v1669_v4 = vld [vmem:[%s258_s20 + $0x10] sm:$0xff]  ;;  %s1650_s27 = sshll.u32 %s1985_s12, 7 }
  0x10   : > { %v1680_v2 = vld [vmem:[%s258_s20 + $0x28] sm:$0xff]  ;;  %v1690_v3 = vld [vmem:[%s258_s20 + $0x38] sm:$0xff]  ;;  %401 = vmatpush.bf16.msra.mxu0 %v1670_v0  ;;  %526 = vmatpush.bf16.msra.mxu1 %v1660_v1  ;;  %v1659_v5 = vld [vmem:[%s258_s20] sm:$0xff]  ;;  %s1930_s30 = scalar_lea.vmem %s1979_s3, %s1650_s27 }
  0x11   : > { %673 = vmatpush.bf16.msra.mxu2 %v1680_v2  ;;  %836 = vmatpush.bf16.msra.mxu3 %v1690_v3  ;;  %v1679_v6 = vld [vmem:[%s258_s20 + $0x20] sm:$0xff]  ;;  %v1689_v7 = vld [vmem:[%s258_s20 + $0x30] sm:$0xff]  ;;  %v1662_v12 = vld [vmem:[%s1851_s24 + $0x48] sm:$0xff] }
  0x12   : > { %v1661_v8 = vld [vmem:[%s1851_s24 + $0x40] sm:$0xff]  ;;  %v1652_v13 = vld [vmem:[%s1851_s24 + $0x8] sm:$0xff]  ;;  %v1663_v16 = vld [vmem:[%s1851_s24 + $0x50] sm:$0xff] }
  0x13   : > { %v1651_v9 = vld [vmem:[%s1851_s24] sm:$0xff]  ;;  %v1672_v14 = vld [vmem:[%s1851_s24 + $0x88] sm:$0xff]  ;;  %v1653_v17 = vld [vmem:[%s1851_s24 + $0x10] sm:$0xff] }
  0x14   : > { %402 = vmatpush.bf16.msra.mxu0 %v1669_v4  ;;  %527 = vmatpush.bf16.msra.mxu1 %v1659_v5  ;;  %v1671_v10 = vld [vmem:[%s1851_s24 + $0x80] sm:$0xff]  ;;  %v1682_v15 = vld [vmem:[%s1851_s24 + $0xc8] sm:$0xff]  ;;  %v1673_v18 = vld [vmem:[%s1851_s24 + $0x90] sm:$0xff] }
  0x15   : > { %v1681_v11 = vld [vmem:[%s1851_s24 + $0xc0] sm:$0xff]  ;;  %674 = vmatpush.bf16.msra.mxu2 %v1679_v6  ;;  %837 = vmatpush.bf16.msra.mxu3 %v1689_v7  ;;  %v1683_v19 = vld [vmem:[%s1851_s24 + $0xd0] sm:$0xff]  ;;  %v1664_v20 = vld [vmem:[%s1851_s24 + $0x58] sm:$0xff] }
  0x16   : > { %v1654_v21 = vld [vmem:[%s1851_s24 + $0x18] sm:$0xff]  ;;  %v1665_v24 = vld [vmem:[%s1851_s24 + $0x60] sm:$0xff]  ;;  %v1666_v28 = vld [vmem:[%s1851_s24 + $0x68] sm:$0xff] }
  0x17   : > { %1438 = vmatmul.msk.bf16.vlgmr.msra.gmra.mxu0 %vm370_vm0, %v1661_v8  ;;  %1486 = vmatmul.msk.bf16.vlgmr.msra.gmra.mxu1 %vm370_vm0, %v1651_v9  ;;  %v1674_v22 = vld [vmem:[%s1851_s24 + $0x98] sm:$0xff]  ;;  %v1655_v25 = vld [vmem:[%s1851_s24 + $0x20] sm:$0xff]  ;;  %v1656_v29 = vld [vmem:[%s1851_s24 + $0x28] sm:$0xff] }
  0x18   : > { %1554 = vmatmul.msk.bf16.vlgmr.msra.gmra.mxu2 %vm370_vm0, %v1671_v10  ;;  %1622 = vmatmul.msk.bf16.vlgmr.msra.gmra.mxu3 %vm370_vm0, %v1681_v11  ;;  %v1684_v23 = vld [vmem:[%s1851_s24 + $0xd8] sm:$0xff]  ;;  %v1675_v26 = vld [vmem:[%s1851_s24 + $0xa0] sm:$0xff]  ;;  %v1676_v30 = vld [vmem:[%s1851_s24 + $0xa8] sm:$0xff] }
  0x19   : > { %v1685_v27 = vld [vmem:[%s1851_s24 + $0xe0] sm:$0xff]  ;;  %v1686_v31 = vld [vmem:[%s1851_s24 + $0xe8] sm:$0xff]  ;;  %v1667_v32 = vld [vmem:[%s1851_s24 + $0x70] sm:$0xff] }
  0x1a   : > { %v1657_v33 = vld [vmem:[%s1851_s24 + $0x30] sm:$0xff]  ;;  %v1668_v36 = vld [vmem:[%s1851_s24 + $0x78] sm:$0xff] }
  0x1b   : > { %v1677_v34 = vld [vmem:[%s1851_s24 + $0xb0] sm:$0xff]  ;;  %v1658_v37 = vld [vmem:[%s1851_s24 + $0x38] sm:$0xff] }
  0x1c   : > { %v1687_v35 = vld [vmem:[%s1851_s24 + $0xf0] sm:$0xff]  ;;  %v1678_v38 = vld [vmem:[%s1851_s24 + $0xb8] sm:$0xff] }
  0x1d   : > { %v1688_v39 = vld [vmem:[%s1851_s24 + $0xf8] sm:$0xff] }
  0x27   : > { %1439 = vmatmul.msk.bf16.gmra.mxu0 %vm370_vm0, %v1662_v12  ;;  %1487 = vmatmul.msk.bf16.gmra.mxu1 %vm370_vm0, %v1652_v13 }
  0x28   : > { %1555 = vmatmul.msk.bf16.gmra.mxu2 %vm370_vm0, %v1672_v14  ;;  %1623 = vmatmul.msk.bf16.gmra.mxu3 %vm370_vm0, %v1682_v15 }
  0x37   : > { %1440 = vmatmul.msk.bf16.gmra.mxu0 %vm370_vm0, %v1663_v16  ;;  %1488 = vmatmul.msk.bf16.gmra.mxu1 %vm370_vm0, %v1653_v17 }
  0x38   : > { %1556 = vmatmul.msk.bf16.gmra.mxu2 %vm370_vm0, %v1673_v18  ;;  %1624 = vmatmul.msk.bf16.gmra.mxu3 %vm370_vm0, %v1683_v19 }
  0x47   : > { %1441 = vmatmul.msk.bf16.gmra.mxu0 %vm370_vm0, %v1664_v20  ;;  %1489 = vmatmul.msk.bf16.gmra.mxu1 %vm370_vm0, %v1654_v21 }
  0x48   : > { %1557 = vmatmul.msk.bf16.gmra.mxu2 %vm370_vm0, %v1674_v22  ;;  %1625 = vmatmul.msk.bf16.gmra.mxu3 %vm370_vm0, %v1684_v23 }
  0x57   : > { %1442 = vmatmul.msk.bf16.gmra.mxu0 %vm370_vm0, %v1665_v24  ;;  %1490 = vmatmul.msk.bf16.gmra.mxu1 %vm370_vm0, %v1655_v25 }
  0x58   : > { %1558 = vmatmul.msk.bf16.gmra.mxu2 %vm370_vm0, %v1675_v26  ;;  %1626 = vmatmul.msk.bf16.gmra.mxu3 %vm370_vm0, %v1685_v27 }
  0x67   : > { %1443 = vmatmul.msk.bf16.gmra.mxu0 %vm370_vm0, %v1666_v28  ;;  %1491 = vmatmul.msk.bf16.gmra.mxu1 %vm370_vm0, %v1656_v29 }
  0x68   : > { %1559 = vmatmul.msk.bf16.gmra.mxu2 %vm370_vm0, %v1676_v30  ;;  %1627 = vmatmul.msk.bf16.gmra.mxu3 %vm370_vm0, %v1686_v31 }
  0x77   : > { %1444 = vmatmul.msk.bf16.gmra.mxu0 %vm370_vm0, %v1667_v32  ;;  %1492 = vmatmul.msk.bf16.gmra.mxu1 %vm370_vm0, %v1657_v33 }
  0x78   : > { %1560 = vmatmul.msk.bf16.gmra.mxu2 %vm370_vm0, %v1677_v34  ;;  %1628 = vmatmul.msk.bf16.gmra.mxu3 %vm370_vm0, %v1687_v35 }
  0x87   : > { %1445 = vmatmul.msk.bf16.gmra.mxu0 %vm370_vm0, %v1668_v36  ;;  %1493 = vmatmul.msk.bf16.gmra.mxu1 %vm370_vm0, %v1658_v37 }
  0x88   : > { %1561 = vmatmul.msk.bf16.gmra.mxu2 %vm370_vm0, %v1678_v38  ;;  %1629 = vmatmul.msk.bf16.gmra.mxu3 %vm370_vm0, %v1688_v39 }
  0x94   : > { %v404_v40 = vpop.f32.mrf.mxu0  ;;  %v529_v41 = vpop.f32.mrf.mxu1 }
  0x95   : > { %v530_v42 = vadd.f32 %v529_v41, %v404_v40 }
  0x9b   : > { %v676_v43 = vpop.f32.mrf.mxu2  ;;  %v839_v44 = vpop.f32.mrf.mxu3 }
  0x9c   : > { %v716_v45 = vadd.f32 %v676_v43, %v530_v42  ;;  %v406_v47 = vpop.f32.mrf.mxu0  ;;  %v531_v48 = vpop.f32.mrf.mxu1 }
  0x9d   : > { %v532_v52 = vadd.f32 %v531_v48, %v406_v47 }
  0x9e   : > { %v879_v49 = vadd.f32 %v839_v44, %v716_v45 }
  0xa0   : > { %v899_v50 = vadd.f32 %v1920_v46, %v879_v49 }
  0xa2   : > { %v1630_v51 = vmul.f32 -1.442695, %v899_v50 }
  0xa3   : > { %v678_v53 = vpop.f32.mrf.mxu2  ;;  %v841_v54 = vpop.f32.mrf.mxu3 }
  0xa4   : > { %1716 = vpow2.f32 %v1630_v51  ;;  %v717_v55 = vadd.f32 %v678_v53, %v532_v52  ;;  %v409_v56 = vpop.f32.mrf.mxu0  ;;  %v534_v57 = vpop.f32.mrf.mxu1 }
  0xa5   : > { %v535_v60 = vadd.f32 %v534_v57, %v409_v56 }
  0xa6   : > { %v880_v58 = vadd.f32 %v841_v54, %v717_v55 }
  0xa8   : > { %v900_v59 = vadd.f32 %v1920_v46, %v880_v58 }
  0xaa   : > { %v1717_v61 = vpop.eup %1716  ;;  %v1631_v62 = vmul.f32 -1.442695, %v900_v59 }
  0xab   : > { %v963_v63 = vadd.f32 1.0, %v1717_v61  ;;  %v681_v0 = vpop.f32.mrf.mxu2  ;;  %v844_v1 = vpop.f32.mrf.mxu3 }
  0xac   : > { %1718 = vpow2.f32 %v1631_v62  ;;  %v718_v2 = vadd.f32 %v681_v0, %v535_v60  ;;  %v411_v3 = vpop.f32.mrf.mxu0  ;;  %v536_v4 = vpop.f32.mrf.mxu1 }
  0xad   : > { %1720 = vrcp.f32 %v963_v63  ;;  %v537_v9 = vadd.f32 %v536_v4, %v411_v3  ;;  %v990_v20 = vand.u32 2147483648, %v963_v63  ;;  %v988_v22 = vand.u32 2147483647, %v963_v63 }
  0xae   : > { %v881_v5 = vadd.f32 %v844_v1, %v718_v2  ;;  %vm984_vm2 = vweird.f32 %v963_v63 }
  0xaf   : > { %v991_v29 = vor.u32 1.1754944e-38, %v990_v20  ;;  %vm989_vm4 = vcmp.eq.f32.partialorder %v988_v22, 8.507059e+37 }
  0xb0   : > { %v901_v6 = vadd.f32 %v1920_v46, %v881_v5 }
  0xb2   : > { %v1719_v7 = vpop.eup %1718  ;;  %v1632_v8 = vmul.f32 -1.442695, %v901_v6 }
  0xb3   : > { %v1721_v10 = vpop.eup %1720  ;;  %v964_v11 = vadd.f32 1.0, %v1719_v7  ;;  %v683_v12 = vpop.f32.mrf.mxu2 }
  0xb4   : > { %v846_v13 = vpop.f32.mrf.mxu3  ;;  %v980_v14 = vmul.f32 %v1721_v10, %v963_v63  ;;  %1722 = vpow2.f32 %v1632_v8  ;;  %v719_v15 = vadd.f32 %v683_v12, %v537_v9  ;;  %v414_v16 = vpop.f32.mrf.mxu0  ;;  %vm985_vm1 = vweird.f32 %v1721_v10 }
  0xb5   : > { %v539_v17 = vpop.f32.mrf.mxu1  ;;  %1724 = vrcp.f32 %v964_v11  ;;  %vm986_vm3 = vmor %vm984_vm2, %vm985_vm1  ;;  %v1003_v40 = vand.u32 2147483647, %v964_v11  ;;  %v1005_v41 = vand.u32 2147483648, %v964_v11  ;;  %vm999_vm6 = vweird.f32 %v964_v11 }
  0xb6   : > { %v981_v18 = vsub.f32 1.0, %v980_v14  ;;  %v882_v19 = vadd.f32 %v846_v13, %v719_v15  ;;  %v540_v27 = vadd.f32 %v539_v17, %v414_v16 }
  0xb7   : > { %vm1004_vm8 = vcmp.eq.f32.partialorder %v1003_v40, 8.507059e+37  ;;  %v1006_v49 = vor.u32 1.1754944e-38, %v1005_v41 }
  0xb8   : > { %v982_v21 = vmul.f32 %v1721_v10, %v981_v18  ;;  %v902_v23 = vadd.f32 %v1920_v46, %v882_v19 }
  0xba   : > { %v1723_v24 = vpop.eup %1722  ;;  %v983_v25 = vadd.f32 %v1721_v10, %v982_v21  ;;  %v1633_v26 = vmul.f32 -1.442695, %v902_v23 }
  0xbb   : > { %v1725_v28 = vpop.eup %1724  ;;  %v965_v30 = vadd.f32 1.0, %v1723_v24  ;;  %v686_v31 = vpop.f32.mrf.mxu2 }
  0xbc   : > { %v849_v32 = vpop.f32.mrf.mxu3  ;;  %v987_v33 = vsel %vm986_vm3, %v1721_v10, %v983_v25  ;;  %v995_v34 = vmul.f32 %v1725_v28, %v964_v11  ;;  %1726 = vpow2.f32 %v1633_v26  ;;  %v416_v35 = vpop.f32.mrf.mxu0  ;;  %v720_v39 = vadd.f32 %v686_v31, %v540_v27 }
  0xbd   : > { %v541_v36 = vpop.f32.mrf.mxu1  ;;  %v992_v37 = vsel %vm989_vm4, %v991_v29, %v987_v33  ;;  %1728 = vrcp.f32 %v965_v30  ;;  %vm1000_vm5 = vweird.f32 %v1725_v28  ;;  %v1020_v62 = vand.u32 2147483648, %v965_v30 }
  0xbe   : > { %1219 = vst [vmem:[%s1930_s30] sm:$0xff] %v992_v37  ;;  %v996_v38 = vsub.f32 1.0, %v995_v34  ;;  %v883_v43 = vadd.f32 %v849_v32, %v720_v39  ;;  %vm1001_vm7 = vmor %vm999_vm6, %vm1000_vm5  ;;  %v542_v56 = vadd.f32 %v541_v36, %v416_v35  ;;  %v1018_v0 = vand.u32 2147483647, %v965_v30 }
  0xbf   : > { %vm1014_vm10 = vweird.f32 %v965_v30  ;;  %v1021_v6 = vor.u32 1.1754944e-38, %v1020_v62 }
  0xc0   : > { %v997_v42 = vmul.f32 %v1725_v28, %v996_v38  ;;  %v903_v47 = vadd.f32 %v1920_v46, %v883_v43  ;;  %vm1019_vm12 = vcmp.eq.f32.partialorder %v1018_v0, 8.507059e+37 }
  0xc2   : > { %v1727_v44 = vpop.eup %1726  ;;  %v998_v45 = vadd.f32 %v1725_v28, %v997_v42  ;;  %v1634_v55 = vmul.f32 -1.442695, %v903_v47 }
  0xc3   : > { %v1729_v48 = vpop.eup %1728  ;;  %v966_v50 = vadd.f32 1.0, %v1727_v44  ;;  %v688_v51 = vpop.f32.mrf.mxu2 }
  0xc4   : > { %v851_v52 = vpop.f32.mrf.mxu3  ;;  %v1002_v53 = vsel %vm1001_vm7, %v1725_v28, %v998_v45  ;;  %v1010_v54 = vmul.f32 %v1729_v48, %v965_v30  ;;  %v419_v57 = vpop.f32.mrf.mxu0  ;;  %v721_v61 = vadd.f32 %v688_v51, %v542_v56  ;;  %vm1015_vm9 = vweird.f32 %v1729_v48 }
  0xc5   : > { %v544_v58 = vpop.f32.mrf.mxu1  ;;  %v1007_v59 = vsel %vm1004_vm8, %v1006_v49, %v1002_v53  ;;  %1730 = vrcp.f32 %v966_v50  ;;  %vm1016_vm11 = vmor %vm1014_vm10, %vm1015_vm9  ;;  %v1035_v19 = vand.u32 2147483648, %v966_v50  ;;  %v1033_v21 = vand.u32 2147483647, %v966_v50 }
  0xc6   : > { %1220 = vst [vmem:[%s1930_s30 + $0x8] sm:$0xff] %v1007_v59  ;;  %v1011_v60 = vsub.f32 1.0, %v1010_v54  ;;  %1732 = vpow2.f32 %v1634_v55  ;;  %v884_v1 = vadd.f32 %v851_v52, %v721_v61  ;;  %v545_v2 = vadd.f32 %v544_v58, %v419_v57 }
  0xc7   : > { %vm1029_vm14 = vweird.f32 %v966_v50  ;;  %v1036_v26 = vor.u32 1.1754944e-38, %v1035_v19  ;;  %vm1034_vm0 = vcmp.eq.f32.partialorder %v1033_v21, 8.507059e+37 }
  0xc8   : > { %v1012_v63 = vmul.f32 %v1729_v48, %v1011_v60  ;;  %v904_v4 = vadd.f32 %v1920_v46, %v884_v1 }
  0xca   : > { %v1013_v3 = vadd.f32 %v1729_v48, %v1012_v63  ;;  %v1635_v12 = vmul.f32 -1.442695, %v904_v4 }
  0xcb   : > { %v1731_v5 = vpop.eup %1730  ;;  %v691_v7 = vpop.f32.mrf.mxu2 }
  0xcc   : > { %v854_v8 = vpop.f32.mrf.mxu3  ;;  %v1733_v9 = vpop.eup %1732  ;;  %v1017_v10 = vsel %vm1016_vm11, %v1729_v48, %v1013_v3  ;;  %v1025_v11 = vmul.f32 %v1731_v5, %v966_v50  ;;  %v722_v17 = vadd.f32 %v691_v7, %v545_v2  ;;  %1734 = vpow2.f32 %v1635_v12 }
  0xcd   : > { %v421_v13 = vpop.f32.mrf.mxu0  ;;  %v546_v14 = vpop.f32.mrf.mxu1  ;;  %v1022_v15 = vsel %vm1019_vm12, %v1021_v6, %v1017_v10  ;;  %v967_v16 = vadd.f32 1.0, %v1733_v9  ;;  %vm1030_vm13 = vweird.f32 %v1731_v5 }
  0xce   : > { %1221 = vst [vmem:[%s1930_s30 + $0x10] sm:$0xff] %v1022_v15  ;;  %v1026_v18 = vsub.f32 1.0, %v1025_v11  ;;  %v885_v22 = vadd.f32 %v854_v8, %v722_v17  ;;  %v547_v25 = vadd.f32 %v546_v14, %v421_v13  ;;  %vm1031_vm15 = vmor %vm1029_vm14, %vm1030_vm13 }
  0xcf   : > { %1736 = vrcp.f32 %v967_v16  ;;  %v1050_v43 = vand.u32 2147483648, %v967_v16  ;;  %v1048_v45 = vand.u32 2147483647, %v967_v16  ;;  %vm1044_vm2 = vweird.f32 %v967_v16 }
  0xd0   : > { %v1027_v20 = vmul.f32 %v1731_v5, %v1026_v18  ;;  %v905_v24 = vadd.f32 %v1920_v46, %v885_v22 }
  0xd1   : > { %v1051_v56 = vor.u32 1.1754944e-38, %v1050_v43  ;;  %vm1049_vm4 = vcmp.eq.f32.partialorder %v1048_v45, 8.507059e+37 }
  0xd2   : > { %v1028_v23 = vadd.f32 %v1731_v5, %v1027_v20  ;;  %v1735_v29 = vpop.eup %1734  ;;  %v1636_v31 = vmul.f32 -1.442695, %v905_v24 }
  0xd3   : > { %v693_v27 = vpop.f32.mrf.mxu2  ;;  %v968_v37 = vadd.f32 1.0, %v1735_v29 }
  0xd4   : > { %v856_v28 = vpop.f32.mrf.mxu3  ;;  %v1032_v30 = vsel %vm1031_vm15, %v1731_v5, %v1028_v23  ;;  %v723_v32 = vadd.f32 %v693_v27, %v547_v25  ;;  %1738 = vpow2.f32 %v1636_v31 }
  0xd5   : > { %v424_v33 = vpop.f32.mrf.mxu0  ;;  %v549_v34 = vpop.f32.mrf.mxu1  ;;  %v1037_v36 = vsel %vm1034_vm0, %v1036_v26, %v1032_v30  ;;  %1740 = vrcp.f32 %v968_v37  ;;  %v1063_v0 = vand.u32 2147483647, %v968_v37  ;;  %v1065_v1 = vand.u32 2147483648, %v968_v37 }
  0xd6   : > { %v1737_v35 = vpop.eup %1736  ;;  %1222 = vst [vmem:[%s1930_s30 + $0x18] sm:$0xff] %v1037_v36  ;;  %v886_v39 = vadd.f32 %v856_v28, %v723_v32  ;;  %v550_v42 = vadd.f32 %v549_v34, %v424_v33  ;;  %vm1059_vm6 = vweird.f32 %v968_v37 }
  0xd7   : > { %v1040_v38 = vmul.f32 %v1737_v35, %v967_v16  ;;  %vm1045_vm1 = vweird.f32 %v1737_v35  ;;  %v1066_v14 = vor.u32 1.1754944e-38, %v1065_v1  ;;  %vm1064_vm8 = vcmp.eq.f32.partialorder %v1063_v0, 8.507059e+37 }
  0xd8   : > { %v906_v41 = vadd.f32 %v1920_v46, %v886_v39  ;;  %vm1046_vm3 = vmor %vm1044_vm2, %vm1045_vm1 }
  0xd9   : > { %v1041_v40 = vsub.f32 1.0, %v1040_v38 }
  0xda   : > { %v1637_v47 = vmul.f32 -1.442695, %v906_v41  ;;  %v1739_v50 = vpop.eup %1738 }
  0xdb   : > { %v1042_v44 = vmul.f32 %v1737_v35, %v1041_v40  ;;  %v696_v48 = vpop.f32.mrf.mxu2  ;;  %v1741_v55 = vpop.eup %1740  ;;  %v969_v57 = vadd.f32 1.0, %v1739_v50 }
  0xdc   : > { %v859_v49 = vpop.f32.mrf.mxu3  ;;  %1742 = vpow2.f32 %v1637_v47  ;;  %v724_v52 = vadd.f32 %v696_v48, %v550_v42  ;;  %v1055_v59 = vmul.f32 %v1741_v55, %v968_v37  ;;  %vm1060_vm5 = vweird.f32 %v1741_v55 }
  0xdd   : > { %v1043_v51 = vadd.f32 %v1737_v35, %v1042_v44  ;;  %v426_v53 = vpop.f32.mrf.mxu0  ;;  %v551_v54 = vpop.f32.mrf.mxu1  ;;  %1744 = vrcp.f32 %v969_v57  ;;  %vm1061_vm7 = vmor %vm1059_vm6, %vm1060_vm5  ;;  %v1078_v21 = vand.u32 2147483647, %v969_v57  ;;  %v1080_v22 = vand.u32 2147483648, %v969_v57 }
  0xde   : > { %v887_v60 = vadd.f32 %v859_v49, %v724_v52  ;;  %v1056_v62 = vsub.f32 1.0, %v1055_v59  ;;  %v552_v5 = vadd.f32 %v551_v54, %v426_v53  ;;  %vm1074_vm10 = vweird.f32 %v969_v57 }
  0xdf   : > { %v1047_v58 = vsel %vm1046_vm3, %v1737_v35, %v1043_v51  ;;  %v1081_v35 = vor.u32 1.1754944e-38, %v1080_v22  ;;  %vm1079_vm12 = vcmp.eq.f32.partialorder %v1078_v21, 8.507059e+37 }
  0xe0   : > { %v1052_v61 = vsel %vm1049_vm4, %v1051_v56, %v1047_v58  ;;  %v907_v63 = vadd.f32 %v1920_v46, %v887_v60  ;;  %v1057_v3 = vmul.f32 %v1741_v55, %v1056_v62 }
  0xe1   : > { %1223 = vst [vmem:[%s1930_s30 + $0x20] sm:$0xff] %v1052_v61 }
  0xe2   : > { %v1743_v2 = vpop.eup %1742  ;;  %v1638_v4 = vmul.f32 -1.442695, %v907_v63  ;;  %v1058_v9 = vadd.f32 %v1741_v55, %v1057_v3 }
  0xe3   : > { %v970_v6 = vadd.f32 1.0, %v1743_v2  ;;  %v698_v7 = vpop.f32.mrf.mxu2  ;;  %v1745_v13 = vpop.eup %1744 }
  0xe4   : > { %v861_v8 = vpop.f32.mrf.mxu3  ;;  %1746 = vpow2.f32 %v1638_v4  ;;  %v725_v10 = vadd.f32 %v698_v7, %v552_v5  ;;  %v1062_v15 = vsel %vm1061_vm7, %v1741_v55, %v1058_v9  ;;  %v1070_v16 = vmul.f32 %v1745_v13, %v969_v57 }
  0xe5   : > { %v429_v11 = vpop.f32.mrf.mxu0  ;;  %v554_v12 = vpop.f32.mrf.mxu1  ;;  %1748 = vrcp.f32 %v970_v6  ;;  %v1067_v18 = vsel %vm1064_vm8, %v1066_v14, %v1062_v15  ;;  %vm1075_vm9 = vweird.f32 %v1745_v13  ;;  %v1093_v40 = vand.u32 2147483647, %v970_v6 }
  0xe6   : > { %v888_v17 = vadd.f32 %v861_v8, %v725_v10  ;;  %1224 = vst [vmem:[%s1930_s30 + $0x28] sm:$0xff] %v1067_v18  ;;  %v1071_v19 = vsub.f32 1.0, %v1070_v16  ;;  %v555_v26 = vadd.f32 %v554_v12, %v429_v11  ;;  %vm1076_vm11 = vmor %vm1074_vm10, %vm1075_vm9  ;;  %v1095_v41 = vand.u32 2147483648, %v970_v6 }
  0xe7   : > { %vm1089_vm14 = vweird.f32 %v970_v6  ;;  %vm1094_vm0 = vcmp.eq.f32.partialorder %v1093_v40, 8.507059e+37 }
  0xe8   : > { %v908_v20 = vadd.f32 %v1920_v46, %v888_v17  ;;  %v1072_v24 = vmul.f32 %v1745_v13, %v1071_v19  ;;  %v1096_v49 = vor.u32 1.1754944e-38, %v1095_v41 }
  0xea   : > { %v1747_v23 = vpop.eup %1746  ;;  %v1639_v25 = vmul.f32 -1.442695, %v908_v20  ;;  %v1073_v31 = vadd.f32 %v1745_v13, %v1072_v24 }
  0xeb   : > { %v1749_v27 = vpop.eup %1748  ;;  %v1944_v28 = vadd.f32 1.0, %v1747_v23  ;;  %v701_v29 = vpop.f32.mrf.mxu2 }
  0xec   : > { %v864_v30 = vpop.f32.mrf.mxu3  ;;  %v1085_v32 = vmul.f32 %v1749_v27, %v970_v6  ;;  %1750 = vpow2.f32 %v1639_v25  ;;  %v1077_v36 = vsel %vm1076_vm11, %v1745_v13, %v1073_v31  ;;  %v726_v38 = vadd.f32 %v701_v29, %v555_v26 }
  0xed   : > { %v431_v33 = vpop.f32.mrf.mxu0  ;;  %v556_v34 = vpop.f32.mrf.mxu1  ;;  %1752 = vrcp.f32 %v1944_v28  ;;  %v1082_v39 = vsel %vm1079_vm12, %v1081_v35, %v1077_v36  ;;  %vm1090_vm13 = vweird.f32 %v1749_v27  ;;  %v1110_v62 = vand.u32 2147483648, %v1944_v28 }
  0xee   : > { %v1086_v37 = vsub.f32 1.0, %v1085_v32  ;;  %1225 = vst [vmem:[%s1930_s30 + $0x30] sm:$0xff] %v1082_v39  ;;  %v889_v43 = vadd.f32 %v864_v30, %v726_v38  ;;  %vm1091_vm15 = vmor %vm1089_vm14, %vm1090_vm13  ;;  %v557_v56 = vadd.f32 %v556_v34, %v431_v33  ;;  %v1108_v0 = vand.u32 2147483647, %v1944_v28 }
  0xef   : > { %vm1104_vm2 = vweird.f32 %v1944_v28  ;;  %v1111_v6 = vor.u32 1.1754944e-38, %v1110_v62 }
  0xf0   : > { %v1087_v42 = vmul.f32 %v1749_v27, %v1086_v37  ;;  %v909_v47 = vadd.f32 %v1920_v46, %v889_v43  ;;  %vm1109_vm4 = vcmp.eq.f32.partialorder %v1108_v0, 8.507059e+37 }
  0xf2   : > { %v1751_v44 = vpop.eup %1750  ;;  %v1088_v45 = vadd.f32 %v1749_v27, %v1087_v42  ;;  %v1640_v55 = vmul.f32 -1.442695, %v909_v47 }
  0xf3   : > { %v1753_v48 = vpop.eup %1752  ;;  %v972_v50 = vadd.f32 1.0, %v1751_v44  ;;  %v703_v51 = vpop.f32.mrf.mxu2 }
  0xf4   : > { %v866_v52 = vpop.f32.mrf.mxu3  ;;  %v1092_v53 = vsel %vm1091_vm15, %v1749_v27, %v1088_v45  ;;  %v1100_v54 = vmul.f32 %v1753_v48, %v1944_v28  ;;  %v727_v61 = vadd.f32 %v703_v51, %v557_v56  ;;  %vm1105_vm1 = vweird.f32 %v1753_v48 }
  0xf5   : > { %v434_v57 = vpop.f32.mrf.mxu0  ;;  %v559_v58 = vpop.f32.mrf.mxu1  ;;  %v1097_v59 = vsel %vm1094_vm0, %v1096_v49, %v1092_v53  ;;  %1754 = vrcp.f32 %v972_v50  ;;  %vm1106_vm3 = vmor %vm1104_vm2, %vm1105_vm1  ;;  %v1125_v19 = vand.u32 2147483648, %v972_v50  ;;  %v1123_v21 = vand.u32 2147483647, %v972_v50 }
  0xf6   : > { %1226 = vst [vmem:[%s1930_s30 + $0x38] sm:$0xff] %v1097_v59  ;;  %v1101_v60 = vsub.f32 1.0, %v1100_v54  ;;  %1756 = vpow2.f32 %v1640_v55  ;;  %v890_v1 = vadd.f32 %v866_v52, %v727_v61  ;;  %v560_v2 = vadd.f32 %v559_v58, %v434_v57 }
  0xf7   : > { %vm1119_vm6 = vweird.f32 %v972_v50  ;;  %v1126_v26 = vor.u32 1.1754944e-38, %v1125_v19  ;;  %vm1124_vm8 = vcmp.eq.f32.partialorder %v1123_v21, 8.507059e+37 }
  0xf8   : > { %v1102_v63 = vmul.f32 %v1753_v48, %v1101_v60  ;;  %v910_v4 = vadd.f32 %v1920_v46, %v890_v1 }
  0xfa   : > { %v1103_v3 = vadd.f32 %v1753_v48, %v1102_v63  ;;  %v1641_v12 = vmul.f32 -1.442695, %v910_v4 }
  0xfb   : > { %v1755_v5 = vpop.eup %1754  ;;  %v706_v7 = vpop.f32.mrf.mxu2 }
  0xfc   : > { %v869_v8 = vpop.f32.mrf.mxu3  ;;  %v1757_v9 = vpop.eup %1756  ;;  %v1107_v10 = vsel %vm1106_vm3, %v1753_v48, %v1103_v3  ;;  %v1115_v11 = vmul.f32 %v1755_v5, %v972_v50  ;;  %v728_v17 = vadd.f32 %v706_v7, %v560_v2  ;;  %1758 = vpow2.f32 %v1641_v12 }
  0xfd   : > { %v436_v13 = vpop.f32.mrf.mxu0  ;;  %v561_v14 = vpop.f32.mrf.mxu1  ;;  %v1112_v15 = vsel %vm1109_vm4, %v1111_v6, %v1107_v10  ;;  %v973_v16 = vadd.f32 1.0, %v1757_v9  ;;  %vm1120_vm5 = vweird.f32 %v1755_v5 }
  0xfe   : > { %1227 = vst [vmem:[%s1930_s30 + $0x40] sm:$0xff] %v1112_v15  ;;  %v1116_v18 = vsub.f32 1.0, %v1115_v11  ;;  %v891_v22 = vadd.f32 %v869_v8, %v728_v17  ;;  %v562_v25 = vadd.f32 %v561_v14, %v436_v13  ;;  %vm1121_vm7 = vmor %vm1119_vm6, %vm1120_vm5 }
  0xff   : > { %1760 = vrcp.f32 %v973_v16  ;;  %v1140_v43 = vand.u32 2147483648, %v973_v16  ;;  %v1138_v45 = vand.u32 2147483647, %v973_v16  ;;  %vm1134_vm10 = vweird.f32 %v973_v16 }
 0x100   : > { %v1117_v20 = vmul.f32 %v1755_v5, %v1116_v18  ;;  %v911_v24 = vadd.f32 %v1920_v46, %v891_v22 }
 0x101   : > { %v1141_v54 = vor.u32 1.1754944e-38, %v1140_v43  ;;  %vm1139_vm12 = vcmp.eq.f32.partialorder %v1138_v45, 8.507059e+37 }
 0x102   : > { %v1118_v23 = vadd.f32 %v1755_v5, %v1117_v20  ;;  %v1759_v29 = vpop.eup %1758  ;;  %v1642_v31 = vmul.f32 -1.442695, %v911_v24 }
 0x103   : > { %v708_v27 = vpop.f32.mrf.mxu2  ;;  %v974_v35 = vadd.f32 1.0, %v1759_v29 }
 0x104   : > { %v871_v28 = vpop.f32.mrf.mxu3  ;;  %v1122_v30 = vsel %vm1121_vm7, %v1755_v5, %v1118_v23  ;;  %v729_v32 = vadd.f32 %v708_v27, %v562_v25  ;;  %1762 = vpow2.f32 %v1642_v31 }
 0x105   : > { %v1761_v33 = vpop.eup %1760  ;;  %v1127_v34 = vsel %vm1124_vm8, %v1126_v26, %v1122_v30  ;;  %v439_v36 = vpop.f32.mrf.mxu0  ;;  %1764 = vrcp.f32 %v974_v35  ;;  %v1153_v0 = vand.u32 2147483647, %v974_v35  ;;  %v1155_v1 = vand.u32 2147483648, %v974_v35 }
 0x106   : > { %v564_v37 = vpop.f32.mrf.mxu1  ;;  %1228 = vst [vmem:[%s1930_s30 + $0x48] sm:$0xff] %v1127_v34  ;;  %v1130_v38 = vmul.f32 %v1761_v33, %v973_v16  ;;  %v892_v39 = vadd.f32 %v871_v28, %v729_v32  ;;  %vm1135_vm9 = vweird.f32 %v1761_v33  ;;  %vm1149_vm14 = vweird.f32 %v974_v35 }
 0x107   : > { %v565_v42 = vadd.f32 %v564_v37, %v439_v36  ;;  %vm1136_vm11 = vmor %vm1134_vm10, %vm1135_vm9  ;;  %v1156_v11 = vor.u32 1.1754944e-38, %v1155_v1  ;;  %vm1154_vm0 = vcmp.eq.f32.partialorder %v1153_v0, 8.507059e+37 }
 0x108   : > { %v1131_v40 = vsub.f32 1.0, %v1130_v38  ;;  %v912_v41 = vadd.f32 %v1920_v46, %v892_v39 }
 0x10a   : > { %v1132_v44 = vmul.f32 %v1761_v33, %v1131_v40  ;;  %v1643_v47 = vmul.f32 -1.442695, %v912_v41  ;;  %v1763_v50 = vpop.eup %1762 }
 0x10b   : > { %v711_v48 = vpop.f32.mrf.mxu2  ;;  %v1765_v53 = vpop.eup %1764  ;;  %v975_v55 = vadd.f32 1.0, %v1763_v50 }
 0x10c   : > { %v874_v49 = vpop.f32.mrf.mxu3  ;;  %v1133_v51 = vadd.f32 %v1761_v33, %v1132_v44  ;;  %1766 = vpow2.f32 %v1643_v47  ;;  %v730_v52 = vadd.f32 %v711_v48, %v565_v42  ;;  %v1145_v57 = vmul.f32 %v1765_v53, %v974_v35 }
 0x10d   : > { %1768 = vrcp.f32 %v975_v55  ;;  %v441_v60 = vpop.f32.mrf.mxu0  ;;  %vm1150_vm13 = vweird.f32 %v1765_v53  ;;  %v1170_v19 = vand.u32 2147483648, %v975_v55  ;;  %v1168_v22 = vand.u32 2147483647, %v975_v55 }
 0x10e   : > { %v1137_v56 = vsel %vm1136_vm11, %v1761_v33, %v1133_v51  ;;  %v893_v58 = vadd.f32 %v874_v49, %v730_v52  ;;  %v566_v61 = vpop.f32.mrf.mxu1  ;;  %v1146_v62 = vsub.f32 1.0, %v1145_v57  ;;  %vm1151_vm15 = vmor %vm1149_vm14, %vm1150_vm13  ;;  %vm1164_vm2 = vweird.f32 %v975_v55 }
 0x10f   : > { %v1142_v59 = vsel %vm1139_vm12, %v1141_v54, %v1137_v56  ;;  %v567_v5 = vadd.f32 %v566_v61, %v441_v60  ;;  %v1171_v28 = vor.u32 1.1754944e-38, %v1170_v19  ;;  %vm1169_vm4 = vcmp.eq.f32.partialorder %v1168_v22, 8.507059e+37 }
 0x110   : > { %1229 = vst [vmem:[%s1930_s30 + $0x50] sm:$0xff] %v1142_v59  ;;  %v913_v63 = vadd.f32 %v1920_v46, %v893_v58  ;;  %v1147_v3 = vmul.f32 %v1765_v53, %v1146_v62 }
 0x112   : > { %v1767_v2 = vpop.eup %1766  ;;  %v1644_v4 = vmul.f32 -1.442695, %v913_v63  ;;  %v1148_v8 = vadd.f32 %v1765_v53, %v1147_v3 }
 0x113   : > { %v976_v6 = vadd.f32 1.0, %v1767_v2  ;;  %v713_v7 = vpop.f32.mrf.mxu2  ;;  %v1769_v10 = vpop.eup %1768 }
 0x114   : > { %1770 = vpow2.f32 %v1644_v4  ;;  %v731_v9 = vadd.f32 %v713_v7, %v567_v5  ;;  %v876_v12 = vpop.f32.mrf.mxu3  ;;  %v1152_v13 = vsel %vm1151_vm15, %v1765_v53, %v1148_v8  ;;  %v1160_v14 = vmul.f32 %v1769_v10, %v975_v55 }
 0x115   : > { %1772 = vrcp.f32 %v976_v6  ;;  %v1157_v16 = vsel %vm1154_vm0, %v1156_v11, %v1152_v13  ;;  %vm1165_vm1 = vweird.f32 %v1769_v10  ;;  %v1185_v31 = vand.u32 2147483648, %v976_v6 }
 0x116   : > { %v894_v15 = vadd.f32 %v876_v12, %v731_v9  ;;  %1230 = vst [vmem:[%s1930_s30 + $0x58] sm:$0xff] %v1157_v16  ;;  %v1161_v17 = vsub.f32 1.0, %v1160_v14  ;;  %vm1166_vm3 = vmor %vm1164_vm2, %vm1165_vm1  ;;  %v1183_v33 = vand.u32 2147483647, %v976_v6  ;;  %vm1179_vm6 = vweird.f32 %v976_v6 }
 0x117   : > { %v1186_v37 = vor.u32 1.1754944e-38, %v1185_v31 }
 0x118   : > { %v914_v18 = vadd.f32 %v1920_v46, %v894_v15  ;;  %v1162_v21 = vmul.f32 %v1769_v10, %v1161_v17  ;;  %vm1184_vm8 = vcmp.eq.f32.partialorder %v1183_v33, 8.507059e+37 }
 0x11a   : > { %v1771_v20 = vpop.eup %1770  ;;  %v1645_v23 = vmul.f32 -1.442695, %v914_v18  ;;  %v1163_v26 = vadd.f32 %v1769_v10, %v1162_v21 }
 0x11b   : > { %v1773_v24 = vpop.eup %1772  ;;  %v977_v25 = vadd.f32 1.0, %v1771_v20 }
 0x11c   : > { %v1175_v27 = vmul.f32 %v1773_v24, %v976_v6  ;;  %1774 = vpow2.f32 %v1645_v23  ;;  %v1167_v29 = vsel %vm1166_vm3, %v1769_v10, %v1163_v26  ;;  %vm1180_vm5 = vweird.f32 %v1773_v24 }
 0x11d   : > { %1776 = vrcp.f32 %v977_v25  ;;  %v1172_v46 = vsel %vm1169_vm4, %v1171_v28, %v1167_v29  ;;  %vm1181_vm7 = vmor %vm1179_vm6, %vm1180_vm5  ;;  %v1200_v43 = vand.u32 2147483648, %v977_v25  ;;  %v1198_v45 = vand.u32 2147483647, %v977_v25 }
 0x11e   : > { %v1176_v30 = vsub.f32 1.0, %v1175_v27  ;;  %1231 = vst [vmem:[%s1930_s30 + $0x60] sm:$0xff] %v1172_v46  ;;  %vm1194_vm10 = vweird.f32 %v977_v25 }
 0x11f   : > { %v1201_v49 = vor.u32 1.1754944e-38, %v1200_v43  ;;  %vm1199_vm12 = vcmp.eq.f32.partialorder %v1198_v45, 8.507059e+37 }
 0x120   : > { %v1177_v32 = vmul.f32 %v1773_v24, %v1176_v30 }
 0x122   : > { %v1775_v34 = vpop.eup %1774  ;;  %v1178_v35 = vadd.f32 %v1773_v24, %v1177_v32 }
 0x123   : > { %v1777_v36 = vpop.eup %1776  ;;  %v978_v38 = vadd.f32 1.0, %v1775_v34 }
 0x124   : > { %v1182_v39 = vsel %vm1181_vm7, %v1773_v24, %v1178_v35  ;;  %v1190_v40 = vmul.f32 %v1777_v36, %v977_v25  ;;  %vm1195_vm9 = vweird.f32 %v1777_v36 }
 0x125   : > { %v1187_v41 = vsel %vm1184_vm8, %v1186_v37, %v1182_v39  ;;  %1778 = vrcp.f32 %v978_v38  ;;  %vm1196_vm11 = vmor %vm1194_vm10, %vm1195_vm9  ;;  %v1215_v54 = vand.u32 2147483648, %v978_v38  ;;  %v1213_v56 = vand.u32 2147483647, %v978_v38 }
 0x126   : > { %1232 = vst [vmem:[%s1930_s30 + $0x68] sm:$0xff] %v1187_v41  ;;  %v1191_v42 = vsub.f32 1.0, %v1190_v40  ;;  %vm1209_vm14 = vweird.f32 %v978_v38 }
 0x127   : > { %v1216_v58 = vor.u32 1.1754944e-38, %v1215_v54  ;;  %vm1214_vm0 = vcmp.eq.f32.partialorder %v1213_v56, 8.507059e+37 }
 0x128   : > { %v1192_v44 = vmul.f32 %v1777_v36, %v1191_v42 }
 0x12a   : > { %v1193_v47 = vadd.f32 %v1777_v36, %v1192_v44 }
 0x12b   : > { %v1779_v48 = vpop.eup %1778 }
 0x12c   : > { %v1197_v50 = vsel %vm1196_vm11, %v1777_v36, %v1193_v47  ;;  %v1205_v51 = vmul.f32 %v1779_v48, %v978_v38  ;;  %vm1210_vm13 = vweird.f32 %v1779_v48 }
 0x12d   : > { %v1202_v52 = vsel %vm1199_vm12, %v1201_v49, %v1197_v50  ;;  %vm1211_vm15 = vmor %vm1209_vm14, %vm1210_vm13 }
 0x12e   : > { %1233 = vst [vmem:[%s1930_s30 + $0x70] sm:$0xff] %v1202_v52  ;;  %v1206_v53 = vsub.f32 1.0, %v1205_v51 }
 0x130   : > { %v1207_v55 = vmul.f32 %v1779_v48, %v1206_v53 }
 0x132   : > { %v1208_v57 = vadd.f32 %v1779_v48, %v1207_v55 }
 0x134   : > { %v1212_v59 = vsel %vm1211_vm15, %v1779_v48, %v1208_v57 }
 0x135   : > { %v1217_v60 = vsel %vm1214_vm0, %v1216_v58, %v1212_v59 }
 0x136   : > { %1234 = vst [vmem:[%s1930_s30 + $0x78] sm:$0xff] %v1217_v60 }
 0x137 PF: > { %s13_s14 = sadd.s32 1, %s1802_s14   ;;  %s1980_s12 = smov %s1798_s13 }
 0x138   : > { %p10_p6 = scmp.ge.s32.totalorder %s13_s14, 6   ;;  %s1981_s13 = smov %s1983_s15 }
 0x13a   :  { %12 = sbr.rel (!%p10_p6) target bundleno = 2 (0x2), region = 74 }

</bundles_post_ra>
